<compile_context>
chip_gen: v7x
topology: tpu7x:2x2x1
jax: 0.10.0
libtpu: 0.0.40
codegen_flags: <defaults>
</compile_context>

<pallas_src>
import jax
import jax.numpy as jnp
from jax.experimental import pallas as pl
from jax.experimental.pallas import tpu as pltpu


def _round_up(x: int, m: int) -> int:
    return (x + m - 1) // m * m


def _device_defaults():
    """Best-effort (vmem_capacity_bytes, device_kind_lowercase)."""
    vmem_cap = 128 << 20
    try:
        info = pltpu.get_tpu_info()
        vmem_cap = int(getattr(info, "vmem_capacity_bytes", vmem_cap)) or vmem_cap
    except Exception:
        pass
    kind = ""
    try:
        kind = jax.devices()[0].device_kind.lower()
    except Exception:
        pass
    return vmem_cap, kind


def prepack_jamba_mlp_weights(w_gate_up, w_down, *, tile_i=None,
                              compute_dtype=jnp.bfloat16):
    """One-time weight cast + relayout (do at load time, NOT per forward).

    w_gate_up: [H, 2*I]  ->  [2*nk, H, ti]  (gate chunk k at index k,
                                             up chunk k at index nk + k;
                                             each chunk is a contiguous slab)
    w_down:    [I, H]    ->  [I, H] cast    (row-major chunks already contiguous)
    """
    H, I2 = w_gate_up.shape
    I, H2 = w_down.shape
    assert H == H2 and I2 == 2 * I

    if tile_i is None:
        tile_i = I
        for cand in (512, 256, 128):
            if I % cand == 0:
                tile_i = cand
                break
    ti = tile_i
    assert I % ti == 0, "intermediate_size must be divisible by tile_i"
    assert ti == I or ti % 128 == 0, "tile_i must be a multiple of 128 or == I"
    nk = I // ti

    wgu = w_gate_up.astype(compute_dtype)
    # Column chunk j of [H, 2I] becomes packed[j] of shape (H, ti).
    wgu_packed = wgu.reshape(H, 2 * nk, ti).transpose(1, 0, 2)
    wd = w_down.astype(compute_dtype)
    return wgu_packed, wd


def _jamba_mlp_kernel(x_ref, wg_ref, wu_ref, wd_ref, o_ref, acc_ref):
    # x_ref:   (tm, H)     token tile (resident across the k axis)
    # wg_ref:  (1, H, ti)  gate-projection weight chunk (contiguous slab)
    # wu_ref:  (1, H, ti)  up-projection weight chunk (contiguous slab)
    # wd_ref:  (ti, H)     down-projection weight chunk
    # o_ref:   (tm, H)     output tile (written on the last k step)
    # acc_ref: (tm, H)     fp32 accumulator, resident across the k axis
    k = pl.program_id(1)
    last = pl.num_programs(1) - 1

    @pl.when(k == 0)
    def _():
        acc_ref[...] = jnp.zeros_like(acc_ref)

    x = x_ref[...]
    # Two chunked dots: only [tm, ti] fp32 live per half (no [tm, 2I] slab).
    gate = jnp.dot(x, wg_ref[0], preferred_element_type=jnp.float32)
    up = jnp.dot(x, wu_ref[0], preferred_element_type=jnp.float32)
    # SiluAndMul in fp32: silu(gate) * up
    act = (gate * jax.lax.logistic(gate)) * up
    # Partial down projection for this intermediate chunk.
    partial = jnp.dot(act.astype(wd_ref.dtype), wd_ref[...],
                      preferred_element_type=jnp.float32)

    # Fold the last partial straight into the output store: saves one full
    # (tm, H) fp32 accumulator store + reload per token tile.
    @pl.when(k < last)
    def _():
        acc_ref[...] += partial

    @pl.when(k == last)
    def _():
        o_ref[...] = (acc_ref[...] + partial).astype(o_ref.dtype)


def jamba_mlp(x, wgu_packed, w_down, *, tile_t=None,
              compute_dtype=jnp.bfloat16):
    """x: [T, H], wgu_packed: [2*nk, H, ti] (from prepack), w_down: [I, H]."""
    T, H = x.shape
    two_nk, H2, ti = wgu_packed.shape
    I, H3 = w_down.shape
    nk = two_nk // 2
    assert H == H2 == H3 and two_nk == 2 * nk and nk * ti == I
    # Weights must be pre-cast (prepack) so no per-forward HBM copy is made.
    assert wgu_packed.dtype == jnp.dtype(compute_dtype)
    assert w_down.dtype == jnp.dtype(compute_dtype)

    out_dtype = x.dtype
    cbytes = jnp.dtype(compute_dtype).itemsize
    obytes = jnp.dtype(out_dtype).itemsize

    vmem_cap, kind = _device_defaults()

    # ---- Token tile: per-generation default (review item #1). ----
    if tile_t is None:
        if "v5" in kind:
            target_tm = 256            # v5e crossover ~240 FLOPs/byte
        elif "v7" in kind or vmem_cap <= (64 << 20):
            target_tm = 512            # v7x: 64 MiB VMEM caps the tile
        else:
            target_tm = 1024           # v6e / unknown: crossover ~650 FLOPs/byte
        tile_t = min(target_tm, _round_up(T, 16))   # 16: bf16 sublane packing
    tm = tile_t
    assert tm % 8 == 0, "tile_t must be a multiple of 8"

    # ---- VMEM budget (honest: includes fp32 temporaries) + per-gen ceiling. ----
    headroom = (16 << 20) if vmem_cap > (64 << 20) else (8 << 20)
    vmem_ceiling = max(vmem_cap - headroom, 32 << 20)

    def footprint(tm_):
        return (2 * 3 * H * ti * cbytes    # gate/up/down weight chunks, double-buffered
                + 2 * tm_ * H * cbytes     # x tile, double-buffered
                + 2 * tm_ * H * obytes     # output tile, double-buffered
                + tm_ * H * 4              # fp32 accumulator scratch
                + 3 * tm_ * ti * 4         # gate/up/act fp32 temporaries
                + tm_ * ti * cbytes        # bf16 cast of act fed to down matmul
                + (2 << 20))               # slack

    while footprint(tm) > vmem_ceiling and tm > 128:
        tm = max(128, (tm // 2) // 16 * 16)

    T_pad = _round_up(T, tm)
    grid = (T_pad // tm, nk)

    xc = x.astype(compute_dtype)
    if T_pad != T:  # ragged token counts: zero-pad rows, slice afterwards
        xc = jnp.pad(xc, ((0, T_pad - T), (0, 0)))

    vmem_limit = int(min(max(footprint(tm), 32 << 20), vmem_ceiling))

    # ---- Cost estimate so XLA schedules neighbours sensibly. ----
    n_t_tiles = T_pad // tm
    cost = pl.CostEstimate(
        flops=6 * T_pad * H * I,                    # gate + up + down matmuls
        transcendentals=T_pad * I,                  # logistic in SiLU
        bytes_accessed=(T_pad * H * cbytes          # x
                        + n_t_tiles * 3 * H * I * cbytes  # weights re-streamed per token tile
                        + T_pad * H * obytes),      # output
    )

    out = pl.pallas_call(
        _jamba_mlp_kernel,
        out_shape=jax.ShapeDtypeStruct((T_pad, H), out_dtype),
        grid_spec=pltpu.PrefetchScalarGridSpec(
            num_scalar_prefetch=0,
            grid=grid,
            in_specs=[
                pl.BlockSpec((tm, H), lambda i, k: (i, 0)),           # x tile
                pl.BlockSpec((1, H, ti), lambda i, k: (k, 0, 0)),     # gate chunk k
                pl.BlockSpec((1, H, ti), lambda i, k: (k + nk, 0, 0)),  # up chunk k
                pl.BlockSpec((ti, H), lambda i, k: (k, 0)),           # down chunk k
            ],
            out_specs=pl.BlockSpec((tm, H), lambda i, k: (i, 0)),
            scratch_shapes=[pltpu.VMEM((tm, H), jnp.float32)],
        ),
        compiler_params=pltpu.CompilerParams(
            dimension_semantics=("parallel", "arbitrary"),
            vmem_limit_bytes=vmem_limit,
        ),
        cost_estimate=cost,
    )(xc, wgu_packed, wgu_packed, w_down)   # packed gate_up passed twice (gate / up halves)

    return out[:T] if T_pad != T else out


def jamba_mlp_ref(x, w_gate_up, w_down):
    """Pure-JAX reference mirroring the PyTorch forward (bf16 MXU, fp32 acc)."""
    I = w_down.shape[0]
    gate = jnp.dot(x, w_gate_up[:, :I], preferred_element_type=jnp.float32)
    up = jnp.dot(x, w_gate_up[:, I:], preferred_element_type=jnp.float32)
    act = (gate * jax.lax.logistic(gate)) * up
    out = jnp.dot(act.astype(w_down.dtype), w_down,
                  preferred_element_type=jnp.float32)
    return out.astype(x.dtype)


if __name__ == "__main__":
    # Small, tile-friendly shapes: tokens / hidden_size / intermediate_size.
    # I=1024 with ti=512 exercises the 2-step intermediate reduction, the
    # accumulator fold, and the init/finalize paths; T=384 exercises token
    # padding on devices where the default tm rounds to 256.
    T, H, I = 384, 256, 1024

    key = jax.random.PRNGKey(0)
    kx, kg, kd = jax.random.split(key, 3)

    x = jax.random.normal(kx, (T, H), dtype=jnp.float32).astype(jnp.bfloat16)
    w_gate_up = (jax.random.normal(kg, (H, 2 * I), dtype=jnp.float32) * 0.05
                 ).astype(jnp.bfloat16)
    w_down = (jax.random.normal(kd, (I, H), dtype=jnp.float32) * 0.05
              ).astype(jnp.bfloat16)

    # One-time weight relayout/cast (load time), then the fused forward.
    wgu_packed, wd_packed = prepack_jamba_mlp_weights(w_gate_up, w_down)
    out = jamba_mlp(x, wgu_packed, wd_packed)
    out = jax.block_until_ready(out)

    ref = jamba_mlp_ref(x, w_gate_up, w_down)
    assert out.shape == (T, H)
    assert jnp.allclose(out.astype(jnp.float32), ref.astype(jnp.float32),
                        atol=2e-2, rtol=2e-2), "mismatch vs reference"

    print("KERNEL_OK")
</pallas_src>

<mosaic_0001>
module attributes {stable_mosaic.version = 11 : i64} {
  func.func @_jamba_mlp_kernel(%arg0: i32, %arg1: i32, %arg2: memref<384x256xbf16, #tpu.memory_space<vmem>>, %arg3: memref<1x256x512xbf16, #tpu.memory_space<vmem>>, %arg4: memref<1x256x512xbf16, #tpu.memory_space<vmem>>, %arg5: memref<512x256xbf16, #tpu.memory_space<vmem>>, %arg6: memref<384x256xbf16, #tpu.memory_space<vmem>>, %arg7: memref<384x256xf32, #tpu.memory_space<vmem>>) attributes {dimension_semantics = [#tpu.dimension_semantics<parallel>, #tpu.dimension_semantics<arbitrary>], iteration_bounds = array<i64: 1, 2>, scalar_prefetch = 0 : i64, scratch_operands = 1 : i64, tpu.core_type = #tpu.core_type<tc>, window_params = [{transform_indices = @transform_0, window_bounds = array<i64: 384, 256>}, {transform_indices = @transform_1, window_bounds = array<i64: 1, 256, 512>}, {transform_indices = @transform_2, window_bounds = array<i64: 1, 256, 512>}, {transform_indices = @transform_3, window_bounds = array<i64: 512, 256>}, {transform_indices = @transform_4, window_bounds = array<i64: 384, 256>}]} {
    %c0_i32 = arith.constant 0 : i32
    %0 = arith.cmpi eq, %arg1, %c0_i32 : i32
    %1 = arith.extui %0 : i1 to i32
    %c0_i32_0 = arith.constant 0 : i32
    %2 = arith.cmpi ne, %1, %c0_i32_0 : i32
    scf.if %2 {
      %cst_16 = arith.constant 0.000000e+00 : f32
      %26 = vector.broadcast %cst_16 : f32 to vector<384x256xf32>
      %c0_17 = arith.constant 0 : index
      %c0_18 = arith.constant 0 : index
      %27 = vector.load %arg7[%c0_17, %c0_18] : memref<384x256xf32, #tpu.memory_space<vmem>>, vector<384x256xf32>
      tpu.vector_store %arg7[%c0_17, %c0_18], %26 {strides = array<i32>} : memref<384x256xf32, #tpu.memory_space<vmem>>, vector<384x256xf32>,
    } else {
    }
    %c0 = arith.constant 0 : index
    %c0_1 = arith.constant 0 : index
    %3 = vector.load %arg2[%c0, %c0_1] : memref<384x256xbf16, #tpu.memory_space<vmem>>, vector<384x256xbf16>
    %c0_2 = arith.constant 0 : index
    %c0_3 = arith.constant 0 : index
    %c0_4 = arith.constant 0 : index
    %4 = vector.load %arg3[%c0_2, %c0_3, %c0_4] : memref<1x256x512xbf16, #tpu.memory_space<vmem>>, vector<1x256x512xbf16>
    %5 = vector.shape_cast %4 : vector<1x256x512xbf16> to vector<256x512xbf16>
    %cst = arith.constant dense<0.000000e+00> : vector<384x512xf32>
    %6 = tpu.matmul %3, %5, %cst {dimension_numbers = #tpu.dot_dimension_numbers<[1], [0], [0], [1], [0, 0, 1, 1], [], []>} : vector<384x256xbf16>, vector<256x512xbf16>, vector<384x512xf32> -> vector<384x512xf32>
    %c0_5 = arith.constant 0 : index
    %c0_6 = arith.constant 0 : index
    %c0_7 = arith.constant 0 : index
    %7 = vector.load %arg4[%c0_5, %c0_6, %c0_7] : memref<1x256x512xbf16, #tpu.memory_space<vmem>>, vector<1x256x512xbf16>
    %8 = vector.shape_cast %7 : vector<1x256x512xbf16> to vector<256x512xbf16>
    %cst_8 = arith.constant dense<0.000000e+00> : vector<384x512xf32>
    %9 = tpu.matmul %3, %8, %cst_8 {dimension_numbers = #tpu.dot_dimension_numbers<[1], [0], [0], [1], [0, 0, 1, 1], [], []>} : vector<384x256xbf16>, vector<256x512xbf16>, vector<384x512xf32> -> vector<384x512xf32>
    %10 = arith.negf %6 : vector<384x512xf32>
    %11 = math.exp %10 : vector<384x512xf32>
    %cst_9 = arith.constant 1.000000e+00 : f32
    %12 = vector.broadcast %cst_9 : f32 to vector<384x512xf32>
    %13 = arith.addf %12, %11 : vector<384x512xf32>
    %14 = arith.divf %12, %13 : vector<384x512xf32>
    %15 = arith.mulf %6, %14 : vector<384x512xf32>
    %16 = arith.mulf %15, %9 : vector<384x512xf32>
    %17 = arith.truncf %16 : vector<384x512xf32> to vector<384x512xbf16>
    %c0_10 = arith.constant 0 : index
    %c0_11 = arith.constant 0 : index
    %18 = vector.load %arg5[%c0_10, %c0_11] : memref<512x256xbf16, #tpu.memory_space<vmem>>, vector<512x256xbf16>
    %cst_12 = arith.constant dense<0.000000e+00> : vector<384x256xf32>
    %19 = tpu.matmul %17, %18, %cst_12 {dimension_numbers = #tpu.dot_dimension_numbers<[1], [0], [0], [1], [0, 0, 1, 1], [], []>} : vector<384x512xbf16>, vector<512x256xbf16>, vector<384x256xf32> -> vector<384x256xf32>
    %c1_i32 = arith.constant 1 : i32
    %20 = arith.cmpi slt, %arg1, %c1_i32 : i32
    %21 = arith.extui %20 : i1 to i32
    %c0_i32_13 = arith.constant 0 : i32
    %22 = arith.cmpi ne, %21, %c0_i32_13 : i32
    scf.if %22 {
      %c0_16 = arith.constant 0 : index
      %c0_17 = arith.constant 0 : index
      %26 = vector.load %arg7[%c0_16, %c0_17] : memref<384x256xf32, #tpu.memory_space<vmem>>, vector<384x256xf32>
      %27 = arith.addf %26, %19 : vector<384x256xf32>
      %c0_18 = arith.constant 0 : index
      %c0_19 = arith.constant 0 : index
      %28 = vector.load %arg7[%c0_18, %c0_19] : memref<384x256xf32, #tpu.memory_space<vmem>>, vector<384x256xf32>
      tpu.vector_store %arg7[%c0_18, %c0_19], %27 {strides = array<i32>} : memref<384x256xf32, #tpu.memory_space<vmem>>, vector<384x256xf32>,
    } else {
    }
    %c1_i32_14 = arith.constant 1 : i32
    %23 = arith.cmpi eq, %arg1, %c1_i32_14 : i32
    %24 = arith.extui %23 : i1 to i32
    %c0_i32_15 = arith.constant 0 : i32
    %25 = arith.cmpi ne, %24, %c0_i32_15 : i32
    scf.if %25 {
      %c0_16 = arith.constant 0 : index
      %c0_17 = arith.constant 0 : index
      %26 = vector.load %arg7[%c0_16, %c0_17] : memref<384x256xf32, #tpu.memory_space<vmem>>, vector<384x256xf32>
      %27 = arith.addf %26, %19 : vector<384x256xf32>
      %28 = arith.truncf %27 : vector<384x256xf32> to vector<384x256xbf16>
      %c0_18 = arith.constant 0 : index
      %c0_19 = arith.constant 0 : index
      %29 = vector.load %arg6[%c0_18, %c0_19] : memref<384x256xbf16, #tpu.memory_space<vmem>>, vector<384x256xbf16>
      tpu.vector_store %arg6[%c0_18, %c0_19], %28 {strides = array<i32>} : memref<384x256xbf16, #tpu.memory_space<vmem>>, vector<384x256xbf16>,
    } else {
    }
    return
  }
  func.func @transform_0(%arg0: i32, %arg1: i32) -> (i32, i32) {
    %c0_i32 = arith.constant 0 : i32
    %c0_i32_0 = arith.constant 0 : i32
    return %arg0, %c0_i32 : i32, i32
  }
  func.func @transform_1(%arg0: i32, %arg1: i32) -> (i32, i32, i32) {
    %c0_i32 = arith.constant 0 : i32
    %c0_i32_0 = arith.constant 0 : i32
    %c0_i32_1 = arith.constant 0 : i32
    return %arg1, %c0_i32, %c0_i32_0 : i32, i32, i32
  }
  func.func @transform_2(%arg0: i32, %arg1: i32) -> (i32, i32, i32) {
    %c2_i32 = arith.constant 2 : i32
    %0 = arith.addi %arg1, %c2_i32 : i32
    %c0_i32 = arith.constant 0 : i32
    %c0_i32_0 = arith.constant 0 : i32
    %c0_i32_1 = arith.constant 0 : i32
    return %0, %c0_i32, %c0_i32_0 : i32, i32, i32
  }
  func.func @transform_3(%arg0: i32, %arg1: i32) -> (i32, i32) {
    %c0_i32 = arith.constant 0 : i32
    %c0_i32_0 = arith.constant 0 : i32
    return %arg1, %c0_i32 : i32, i32
  }
  func.func @transform_4(%arg0: i32, %arg1: i32) -> (i32, i32) {
    %c0_i32 = arith.constant 0 : i32
    %c0_i32_0 = arith.constant 0 : i32
    return %arg0, %c0_i32 : i32, i32
  }
}

</mosaic_0001>

<bundles_post_ra>
// kernel: tpu_custom_call.1
= control target key start
LH: loop header
LB: loop body
LE: loop exit
PB: predicated region body
PF: predicated region fallthrough
CT: control target
= control target key end

     0   :  { %s10596_s0 = inlined_call_operand.hbm [shape: bf16[384,256], index: 0, kind: input, shape index: {}]   ;;  %s10597_s1 = inlined_call_operand.hbm [shape: bf16[4,256,512], index: 1, kind: input, shape index: {}]   ;;  %s10598_s2 = inlined_call_operand.hbm [shape: bf16[4,256,512], index: 2, kind: input, shape index: {}]   ;;  %s10599_s3 = inlined_call_operand.hbm [shape: bf16[1024,256], index: 3, kind: input, shape index: {}]   ;;  %s10600_s4 = inlined_call_operand.hbm [shape: bf16[384,256], index: 4, kind: output, shape index: {}]  }
   0x1   :  { %10686 = sst [smem:[#allocation80_spill]] %s10597_s1 }
   0x2   :  { %10687 = sst [smem:[#allocation81_spill]] %s10600_s4 }
   0x3   :  { %9 = vsyncpa [#allocation4], 0 }
   0x4   :  { %10 = vsyncpa [#allocation7], 0 }
   0x5   :  { %12 = vsyncpa [#allocation7 + $0x1], 0 }
   0x6   :  { %13 = vsyncpa [#allocation10], 0 }
   0x7   :  { %15 = vsyncpa [#allocation10 + $0x1], 0 }
   0x8   :  { %16 = vsyncpa [#allocation5], 0  ;;  %s8331_s15 = smov 0   ;;  %s8333_s16 = smov 0  }
   0x9   :  { %s8335_s17 = smov 0   ;;  %s8337_s18 = smov 0  }
   0xa   :  { %s8339_s19 = smov 0   ;;  %s8341_s20 = smov 0  }
   0xb   :  { %s8343_s21 = smov 0   ;;  %s8345_s22 = smov 0  }
   0xc   :  { %s8347_s23 = smov 0  }
   0xd LB: > { %10688 = sst [smem:[#allocation17_spill]] %s8284_s21  ;;  %s31_s24 = sadd.s32 1, %s8288_s22  ;;  %s8292_s23 = sphi %s8347_s23, %s22_s23   ;;  %s8288_s22 = sphi %s8345_s22, %s10999_s22   ;;  %s8284_s21 = sphi %s8343_s21, %s10998_s21   ;;  %s8280_s20 = sphi %s8341_s20, %s11005_s20   ;;  %s8276_s19 = sphi %s8339_s19, %s11004_s19   ;;  %s8272_s18 = sphi %s8337_s18, %s11003_s18   ;;  %s8268_s17 = sphi %s8335_s17, %s11002_s17   ;;  %s8264_s16 = sphi %s8333_s16, %s11001_s16   ;;  %s8260_s15 = sphi %s8331_s15, %s11000_s15  }
   0xe   : > { %10689 = sst [smem:[#allocation18_spill]] %s8288_s22  ;;  %s67_s25 = sadd.s32 1, %s8280_s20 }
   0xf   : > { %p32_p0 = scmp.ge.s32.totalorder %s31_s24, 2  ;;  %p74_p1 = scmp.ne.s32.totalorder %s8280_s20, %s8276_s19 }
  0x10   : > { %p10602_p2 = scmp.eq.s32.totalorder %s8292_s23, 0  ;;  %s90_s26 = sadd.s32 2, %s8288_s22 }
  0x11   : > { %s11007_s24 = smov (%p32_p0, %s31_s24), 0  ;;  %p10601_p6 = scmp.lt.s32.totalorder %s8292_s23, 2 }
  0x12   : > { %10690 = sst [smem:[#allocation19_spill]] %s11007_s24  ;;  %p8386_p3 = por %p10602_p2, %p74_p1 }
  0x13   : > { %s64_s28 = ssub.s32 %s8288_s22, %s11007_s24  ;;  %s91_s29 = sadd.s32 2, %s11007_s24 }
  0x14   : > { %p65_p4 = scmp.eq.s32.totalorder %s64_s28, 0  ;;  %s8393_s30 = ssub.s32 %s90_s26, %s91_s29 }
  0x15   : > { %s201_s6 = sand.u32 1, %s8292_s23   ;;  %s10603_s7 = sand.u32 1, %s8280_s20  }
  0x16   : > { %s8398_s5 = scalar_select %p65_p4, %s8280_s20, %s67_s25  }
  0x17   : > { %s8404_s8 = sshll.u32 %s10603_s7, 9  ;;  %s8407_s9 = sshll.u32 %s8288_s22, 13 }
  0x18   : > { %10692 = sst [smem:[#allocation20_spill]] %s8398_s5  ;;  %s10693_s1 = sld [smem:[#allocation80_spill]] }
  0x19   : > { %s205_s13 = scalar_lea.vmem [#allocation6], %s8404_s8  ;;  %p8422_p7 = pnand %p10601_p6, %p8386_p3 }
  0x1a   : > { %s212_s14 = sshll.u32 %s205_s13, 4  ;;  %s8426_s26 = scalar_lea.sflag [#allocation7], %s201_s6  ;;  %s8416_s14 = int_to_ptr.vmem [resolvable:$true] %s212_s14 }
  0x1b   : > { %s10694_s25 = scalar_select %p8422_p7, 1, 0 }
  0x1c   : > { %p10609_p9 = pneg %p8422_p7 }
  0x1e   : > { %s8413_s12 = scalar_lea.hbm %s10693_s1, %s8407_s9  ;;  %s8062_s27 = scalar_lea.hbm %s10693_s1, 32768 }
  0x1f   : > { %s8057_s28 = scalar_lea.hbm %s8413_s12, 8192  ;;  %p8063_p12 = scmp.lt.u32.totalorder %s8413_s12, %s10693_s1 }
  0x20   : > { %p8058_p8 = scmp.ne.s32.totalorder %s8413_s12, %s8057_s28  ;;  %p8064_p13 = scmp.lt.u32.totalorder %s8062_s27, %s8057_s28 }
  0x21   : > { %p8066_p1 = scmp.lt.u32.totalorder %s8057_s28, %s8413_s12 }
  0x22   : > { %p8060_p10 = pnand %p10609_p9, %p8058_p8  ;;  %p8065_p0 = por %p8064_p13, %p8063_p12 }
  0x24   : > { %p8061_p11 = pneg %p8060_p10  ;;  %p8067_p3 = por %p8066_p1, %p8065_p0 }
  0x26   : > { %p8068_p4 = pnand %p8067_p3, %p8061_p11 }
  0x28   : > { %8071 = shalt.err (!%p8068_p4)
}
  0x29   : > { %s8072_s6 = scalar_lea.vmem %s8416_s14, 8192  ;;  %s8294_s29 = smov [#allocation6]  }
  0x2a   : > { %p8073_p8 = scmp.ne.s32.totalorder %s8416_s14, %s8072_s6  ;;  %s8077_s10 = sshll.u32 %s8294_s29, 4  ;;  %s8078_s10 = int_to_ptr.vmem [resolvable:$false] %s8077_s10 }
  0x2b   : > { %s8079_s11 = scalar_lea.vmem %s8078_s10, 16384  ;;  %p8080_p2 = scmp.lt.s32.totalorder %s8416_s14, %s8078_s10 }
  0x2c   : > { %p8075_p10 = pnand %p8073_p8, %p10609_p9  ;;  %p8081_p12 = scmp.lt.s32.totalorder %s8079_s11, %s8072_s6 }
  0x2e   : > { %p8076_p6 = pneg %p8075_p10  ;;  %p8082_p13 = por %p8081_p12, %p8080_p2 }
  0x30   : > { %p8083_p0 = pnand %p8082_p13, %p8076_p6 }
  0x32   : > { %8086 = shalt.err (!%p8083_p0)
}
  0x33   : > { %s10604_s28 = smov 256   ;;  %s10605_s27 = smov 16  }
  0x34   : > { %6769 = dma.hbm_to_vmem [thread:$0]  (!%p8422_p7), %s8413_s12, 8192, %s8416_s14, %s8426_s26, %s10604_s28, %s10604_s28, %s10605_s27  }
  0x35   : > { %s8458_s13 = sadd.s32 4294967295, %s8292_s23   ;;  %p80_p2 = scmp.ne.s32.totalorder %s8276_s19, %s8272_s18 }
  0x36   : > { %p10608_p6 = scmp.eq.s32.totalorder %s8458_s13, 0  ;;  %p108_p11 = scmp.ne.s32.totalorder %s8264_s16, %s8260_s15 }
  0x37   : > { %p6097_p1 = scmp.ge.s32.totalorder %s8292_s23, 1  ;;  %p171_p4 = scmp.lt.s32.totalorder %s8292_s23, 3 }
  0x38   : > { %p8468_p3 = por %p10608_p6, %p80_p2  ;;  %p8475_p8 = por %p108_p11, %p10608_p6 }
  0x39   : > { %p8479_p10 = pnand %p6097_p1, %p171_p4  ;;  %s8297_s18 = smov [#allocation3]  }
  0x3a   : > { %s10695_s6 = scalar_select %p8468_p3, 1, 0 }
  0x3b   : > { %s10696_s12 = scalar_select %p8475_p8, 1, 0 }
  0x3c   : > { %s10698_s14 = scalar_select %p8479_p10, 1, 0 }
  0x3d   : > { %10697 = sst [smem:[#allocation21_spill]] %s10696_s12  ;;  %s187_s29 = sshll.u32 %s8297_s18, 4  ;;  %s188_s29 = int_to_ptr.vmem [resolvable:$true] %s187_s29 }
  0x3e   : > { %p6762_p12 = pneg %p8479_p10  ;;  %s95_s10 = sadd.s32 1, %s8268_s17 }
  0x3f   : > { %s224_s11 = sand.u32 1, %s8268_s17   ;;  %s8087_s27 = scalar_lea.hbm %s10596_s0, 6144 }
  0x40   : > { %p8487_p13 = pnand %p6762_p12, %p10608_p6  ;;  %p8088_p2 = scmp.ne.s32.totalorder %s10596_s0, %s8087_s27 }
  0x41   : > { %p8094_p12 = scmp.lt.u32.totalorder %s8087_s27, %s10596_s0 }
  0x42   : > { %p8089_p11 = pneg %p8487_p13 }
  0x44   : > { %p8090_p1 = pnand %p8089_p11, %p8088_p2 }
  0x46   : > { %p8091_p4 = pneg %p8090_p1 }
  0x48   : > { %p8096_p6 = pnand %p8094_p12, %p8091_p4 }
  0x4a   : > { %8099 = shalt.err (!%p8096_p6)
}
  0x4b   : > { %s8100_s5 = scalar_lea.vmem %s188_s29, 6144  ;;  %p8108_p8 = scmp.lt.s32.totalorder %s188_s29, %s188_s29 }
  0x4c   : > { %p8101_p9 = scmp.ne.s32.totalorder %s188_s29, %s8100_s5  ;;  %p8109_p3 = scmp.lt.s32.totalorder %s8100_s5, %s8100_s5 }
  0x4e   : > { %p8103_p0 = pnand %p8101_p9, %p8089_p11  ;;  %p8110_p10 = por %p8109_p3, %p8108_p8 }
  0x50   : > { %p8104_p5 = pneg %p8103_p0 }
  0x52   : > { %p8111_p7 = pnand %p8110_p10, %p8104_p5 }
  0x54   : > { %8114 = shalt.err (!%p8111_p7)
}
  0x55   : > { %s10618_s1 = smov 128   ;;  %s8299_s22 = smov 8  }
  0x56   : > { %6765 = dma.hbm_to_vmem [thread:$0]  (!%p8487_p13), %s10596_s0, 6144, %s188_s29, [#allocation4], %s10618_s1, %s10618_s1, %s8299_s22  }
  0x57   : > { %p10700_p5 = scmp.eq.s32.totalorder %s8393_s30, 0  ;;  %p10701_p7 = scmp.eq.s32.totalorder %s8292_s23, 0 }
  0x58   : > { %p10702_p9 = scmp.ne.s32.totalorder %s8268_s17, %s8264_s16  ;;  %s6103_s28 = sshll.u32 %s224_s11, 9 }
  0x59   : > { %s8517_s7 = scalar_select %p10700_p5, %s8268_s17, %s95_s10  }
  0x5a   : > { %p104_p6 = por %p10702_p9, %p10701_p7  ;;  %s6013_s4 = scalar_lea.hbm %s10598_s2, %s8407_s9 }
  0x5b   : > { %s8528_s21 = scalar_lea.hbm %s6013_s4, 16384  ;;  %s226_s15 = scalar_lea.vmem [#allocation8], %s6103_s28 }
  0x5c   : > { %s234_s12 = sshll.u32 %s226_s15, 4  ;;  %p10703_p3 = scmp.lt.s32.totalorder %s8292_s23, 2  ;;  %s8530_s12 = int_to_ptr.vmem [resolvable:$true] %s234_s12 }
  0x5d   : > { %s8542_s11 = scalar_lea.hbm %s10599_s3, %s8407_s9  ;;  %s8145_s24 = scalar_lea.hbm %s6013_s4, 24576 }
  0x5e   : > { %p8534_p8 = pnand %p10703_p3, %p104_p6  ;;  %p8116_p10 = scmp.ne.s32.totalorder %s8528_s21, %s8145_s24 }
  0x5f   : > { %s8120_s27 = scalar_lea.hbm %s10598_s2, 32768  ;;  %p8121_p11 = scmp.lt.u32.totalorder %s8528_s21, %s10598_s2 }
  0x60   : > { %p8117_p13 = pneg %p8534_p8  ;;  %p8122_p1 = scmp.lt.u32.totalorder %s8120_s27, %s8145_s24 }
  0x61   : > { %p8124_p12 = scmp.lt.u32.totalorder %s8145_s24, %s8528_s21 }
  0x62   : > { %p8118_p0 = pnand %p8117_p13, %p8116_p10  ;;  %p8123_p4 = por %p8122_p1, %p8121_p11 }
  0x64   : > { %p8119_p2 = pneg %p8118_p0  ;;  %p8125_p5 = por %p8124_p12, %p8123_p4 }
  0x66   : > { %p8126_p7 = pnand %p8125_p5, %p8119_p2 }
  0x68   : > { %8129 = shalt.err (!%p8126_p7)
}
  0x69   : > { %s8130_s4 = scalar_lea.vmem %s8530_s12, 8192  ;;  %s8300_s9 = smov [#allocation8]  }
  0x6a   : > { %p8131_p9 = scmp.ne.s32.totalorder %s8530_s12, %s8130_s4  ;;  %s8135_s29 = sshll.u32 %s8300_s9, 4  ;;  %s8136_s29 = int_to_ptr.vmem [resolvable:$false] %s8135_s29 }
  0x6b   : > { %s8137_s10 = scalar_lea.vmem %s8136_s29, 16384  ;;  %p8138_p10 = scmp.lt.s32.totalorder %s8530_s12, %s8136_s29 }
  0x6c   : > { %p8133_p6 = pnand %p8131_p9, %p8117_p13  ;;  %p8139_p0 = scmp.lt.s32.totalorder %s8137_s10, %s8130_s4 }
  0x6e   : > { %p8134_p3 = pneg %p8133_p6  ;;  %p8140_p11 = por %p8139_p0, %p8138_p10 }
  0x70   : > { %p8141_p1 = pnand %p8140_p11, %p8134_p3 }
  0x72   : > { %8144 = shalt.err (!%p8141_p1)
}
  0x73   : > { %s10705_s24 = smov 16   ;;  %s10706_s5 = smov 256  }
  0x74   : > { %6772 = dma.hbm_to_vmem [thread:$0]  (!%p8534_p8), %s8528_s21, 8192, %s8530_s12, %s8426_s26, %s10706_s5, %s10706_s5, %s10705_s24  }
  0x75   : > { %s248_s28 = scalar_lea.vmem [#allocation9], %s8404_s8  ;;  %s10707_s18 = sand.u32 1, %s8280_s20  }
  0x76   : > { %s256_s27 = sshll.u32 %s248_s28, 4  ;;  %s8577_s30 = scalar_lea.sflag [#allocation10], %s10707_s18  ;;  %s8573_s27 = int_to_ptr.vmem [resolvable:$true] %s256_s27 }
  0x77   : > { %s8146_s15 = scalar_lea.hbm %s8542_s11, 8192  ;;  %p10708_p2 = scmp.ne.s32.totalorder %s10694_s25, 0 }
  0x78   : > { %p8147_p13 = scmp.ne.s32.totalorder %s8542_s11, %s8146_s15  ;;  %s8151_s29 = scalar_lea.hbm %s10599_s3, 16384 }
  0x79   : > { %p10709_p4 = pneg %p10708_p2  ;;  %p8152_p8 = scmp.lt.u32.totalorder %s8542_s11, %s10599_s3 }
  0x7a   : > { %p8153_p7 = scmp.lt.u32.totalorder %s8151_s29, %s8146_s15  ;;  %p8155_p6 = scmp.lt.u32.totalorder %s8146_s15, %s8542_s11 }
  0x7b   : > { %p8149_p12 = pnand %p8147_p13, %p10709_p4 }
  0x7c   : > { %p8154_p9 = por %p8153_p7, %p8152_p8 }
  0x7d   : > { %p8150_p5 = pneg %p8149_p12 }
  0x7e   : > { %p8156_p3 = por %p8155_p6, %p8154_p9 }
  0x80   : > { %p8157_p10 = pnand %p8156_p3, %p8150_p5 }
  0x82   : > { %8160 = shalt.err (!%p8157_p10)
}
  0x83   : > { %s8161_s21 = scalar_lea.vmem %s8573_s27, 8192  ;;  %p10710_p11 = pmov %p10709_p4 }
  0x84   : > { %p8162_p0 = scmp.ne.s32.totalorder %s8573_s27, %s8161_s21  ;;  %s8301_s8 = smov [#allocation9]  }
  0x85   : > { %s8166_s26 = sshll.u32 %s8301_s8, 4  ;;  %s8167_s26 = int_to_ptr.vmem [resolvable:$false] %s8166_s26 }
  0x86   : > { %p8164_p1 = pnand %p8162_p0, %p10710_p11  ;;  %s8168_s12 = scalar_lea.vmem %s8167_s26, 16384 }
  0x87   : > { %p8169_p4 = scmp.lt.s32.totalorder %s8573_s27, %s8167_s26  ;;  %p8170_p12 = scmp.lt.s32.totalorder %s8168_s12, %s8161_s21 }
  0x88   : > { %p8165_p13 = pneg %p8164_p1 }
  0x89   : > { %p8171_p8 = por %p8170_p12, %p8169_p4 }
  0x8b   : > { %p8172_p7 = pnand %p8171_p8, %p8165_p13 }
  0x8d   : > { %8175 = shalt.err (!%p8172_p7)
}
  0x8e   : > { %s10711_s1 = smov 128   ;;  %p10712_p5 = scmp.ne.s32.totalorder %s10698_s14, 0 }
  0x8f   : > { %6775 = dma.hbm_to_vmem [thread:$0]  (!%p10708_p2), %s8542_s11, 8192, %s8573_s27, %s8577_s30, %s10711_s1, %s10711_s1, %s8299_s22  }
  0x90   : > { %268 = sbr.rel (%p10712_p5) target bundleno = 1444 (0x5a4), region = 36 }
  0x97   : > { %p10713_p9 = scmp.eq.s32.totalorder %s8458_s13, 0 }
  0x99   : > { %8239 = dma.done.wait (%p10713_p9), [#allocation4], 6144   ;;  %p10714_p6 = pmov %p10713_p9 }
  0x9a   : > { %s274_s25 = sand.u32 1, %s8458_s13   ;;  %s276_s24 = sand.u32 1, %s8276_s19  }
  0x9b   : > { %8241 = vsyncadd (%p10714_p6), [#allocation4], 4294961152  ;;  %s6111_s5 = sshll.u32 %s276_s24, 9  ;;  %s275_s28 = scalar_lea.sflag [#allocation7], %s274_s25 }
  0x9c   : > { %s8614_s18 = scalar_lea.vmem [#allocation6], %s6111_s5  ;;  %p10715_p3 = scmp.ne.s32.totalorder %s10695_s6, 0 }
  0x9e   : > { %8243 = dma.done.wait (%p10715_p3), %s275_s28, 8192  }
  0x9f   : > { %8245 = vsyncadd (%p10715_p3), %s275_s28, 4294959104  ;;  %s10716_s14 = sld [smem:[#allocation21_spill]]  ;;  %s285_s22 = sand.u32 1, %s8264_s16  }
  0xa0   : > { %s6112_s11 = sshll.u32 %s285_s22, 9 }
  0xa1   : > { %s8621_s27 = scalar_lea.vmem [#allocation8], %s6112_s11 }
  0xa5   : > { %p10717_p2 = scmp.ne.s32.totalorder %s10716_s14, 0 }
  0xa7   : > { %8247 = dma.done.wait (%p10717_p2), %s275_s28, 8192  }
  0xa8   : > { %8249 = vsyncadd (%p10717_p2), %s275_s28, 4294959104  ;;  %s293_s30 = scalar_lea.sflag [#allocation10], %s276_s24  ;;  %s8627_s15 = scalar_lea.vmem [#allocation9], %s6111_s5 }
  0xa9   : > { %8251 = dma.done.wait (%p10715_p3), %s293_s30, 8192  }
  0xaa   : > { %8253 = vsyncadd (%p10715_p3), %s293_s30, 4294959104  ;;  %s10718_s4 = sld [smem:[#allocation17_spill]] }
  0xb0   : > { %p6114_p10 = scmp.ne.s32.totalorder %s10718_s4, 0 }
  0xb1   : > { %v8302_v0 = vmov (!%p6114_p10), 0.0  }
  0xb2   : > { %333 = sbr.rel (%p6114_p10) target bundleno = 226 (0xe2), region = 56  ;;  %334 = vst [vmem:[#allocation2] sm:$0xff] (!%p6114_p10), %v8302_v0  ;;  %335 = vst [vmem:[#allocation2 + $0x8] sm:$0xff] (!%p6114_p10), %v8302_v0 }
  0xb3   : > { %336 = vst [vmem:[#allocation2 + $0x10] sm:$0xff] (!%p6114_p10), %v8302_v0  ;;  %337 = vst [vmem:[#allocation2 + $0x18] sm:$0xff] (!%p6114_p10), %v8302_v0 }
  0xb4   : > { %338 = vst [vmem:[#allocation2 + $0x20] sm:$0xff] (!%p6114_p10), %v8302_v0  ;;  %339 = vst [vmem:[#allocation2 + $0x28] sm:$0xff] (!%p6114_p10), %v8302_v0 }
  0xb5   : > { %340 = vst [vmem:[#allocation2 + $0x30] sm:$0xff] (!%p6114_p10), %v8302_v0  ;;  %341 = vst [vmem:[#allocation2 + $0x38] sm:$0xff] (!%p6114_p10), %v8302_v0 }
  0xb6   : > { %342 = vst [vmem:[#allocation2 + $0x40] sm:$0xff] (!%p6114_p10), %v8302_v0  ;;  %343 = vst [vmem:[#allocation2 + $0x48] sm:$0xff] (!%p6114_p10), %v8302_v0 }
  0xb7   : > { %344 = vst [vmem:[#allocation2 + $0x50] sm:$0xff] (!%p6114_p10), %v8302_v0  ;;  %345 = vst [vmem:[#allocation2 + $0x58] sm:$0xff] (!%p6114_p10), %v8302_v0 }
  0xb8   : > { %346 = vst [vmem:[#allocation2 + $0x60] sm:$0xff] (!%p6114_p10), %v8302_v0  ;;  %347 = vst [vmem:[#allocation2 + $0x68] sm:$0xff] (!%p6114_p10), %v8302_v0 }
  0xb9   : > { %348 = vst [vmem:[#allocation2 + $0x70] sm:$0xff] %v8302_v0  ;;  %349 = vst [vmem:[#allocation2 + $0x78] sm:$0xff] %v8302_v0 }
  0xba   : > { %350 = vst [vmem:[#allocation2 + $0x80] sm:$0xff] %v8302_v0  ;;  %351 = vst [vmem:[#allocation2 + $0x88] sm:$0xff] %v8302_v0 }
  0xbb   : > { %352 = vst [vmem:[#allocation2 + $0x90] sm:$0xff] %v8302_v0  ;;  %353 = vst [vmem:[#allocation2 + $0x98] sm:$0xff] %v8302_v0 }
  0xbc   : > { %354 = vst [vmem:[#allocation2 + $0xa0] sm:$0xff] %v8302_v0  ;;  %355 = vst [vmem:[#allocation2 + $0xa8] sm:$0xff] %v8302_v0 }
  0xbd   : > { %356 = vst [vmem:[#allocation2 + $0xb0] sm:$0xff] %v8302_v0  ;;  %357 = vst [vmem:[#allocation2 + $0xb8] sm:$0xff] %v8302_v0 }
  0xbe   : > { %358 = vst [vmem:[#allocation2 + $0xc0] sm:$0xff] %v8302_v0  ;;  %359 = vst [vmem:[#allocation2 + $0xc8] sm:$0xff] %v8302_v0 }
  0xbf   : > { %360 = vst [vmem:[#allocation2 + $0xd0] sm:$0xff] %v8302_v0  ;;  %361 = vst [vmem:[#allocation2 + $0xd8] sm:$0xff] %v8302_v0 }
  0xc0   : > { %362 = vst [vmem:[#allocation2 + $0xe0] sm:$0xff] %v8302_v0  ;;  %363 = vst [vmem:[#allocation2 + $0xe8] sm:$0xff] %v8302_v0 }
  0xc1   : > { %364 = vst [vmem:[#allocation2 + $0xf0] sm:$0xff] %v8302_v0  ;;  %365 = vst [vmem:[#allocation2 + $0xf8] sm:$0xff] %v8302_v0 }
  0xc2   : > { %366 = vst [vmem:[#allocation2 + $0x100] sm:$0xff] %v8302_v0  ;;  %367 = vst [vmem:[#allocation2 + $0x108] sm:$0xff] %v8302_v0 }
  0xc3   : > { %368 = vst [vmem:[#allocation2 + $0x110] sm:$0xff] %v8302_v0  ;;  %369 = vst [vmem:[#allocation2 + $0x118] sm:$0xff] %v8302_v0 }
  0xc4   : > { %370 = vst [vmem:[#allocation2 + $0x120] sm:$0xff] %v8302_v0  ;;  %371 = vst [vmem:[#allocation2 + $0x128] sm:$0xff] %v8302_v0 }
  0xc5   : > { %372 = vst [vmem:[#allocation2 + $0x130] sm:$0xff] %v8302_v0  ;;  %373 = vst [vmem:[#allocation2 + $0x138] sm:$0xff] %v8302_v0 }
  0xc6   : > { %374 = vst [vmem:[#allocation2 + $0x140] sm:$0xff] %v8302_v0  ;;  %375 = vst [vmem:[#allocation2 + $0x148] sm:$0xff] %v8302_v0 }
  0xc7   : > { %376 = vst [vmem:[#allocation2 + $0x150] sm:$0xff] %v8302_v0  ;;  %377 = vst [vmem:[#allocation2 + $0x158] sm:$0xff] %v8302_v0 }
  0xc8   : > { %378 = vst [vmem:[#allocation2 + $0x160] sm:$0xff] %v8302_v0  ;;  %379 = vst [vmem:[#allocation2 + $0x168] sm:$0xff] %v8302_v0 }
  0xc9   : > { %380 = vst [vmem:[#allocation2 + $0x170] sm:$0xff] %v8302_v0  ;;  %381 = vst [vmem:[#allocation2 + $0x178] sm:$0xff] %v8302_v0 }
  0xca   : > { %382 = vst [vmem:[#allocation2 + $0x180] sm:$0xff] %v8302_v0  ;;  %383 = vst [vmem:[#allocation2 + $0x188] sm:$0xff] %v8302_v0 }
  0xcb   : > { %384 = vst [vmem:[#allocation2 + $0x190] sm:$0xff] %v8302_v0  ;;  %385 = vst [vmem:[#allocation2 + $0x198] sm:$0xff] %v8302_v0 }
  0xcc   : > { %386 = vst [vmem:[#allocation2 + $0x1a0] sm:$0xff] %v8302_v0  ;;  %387 = vst [vmem:[#allocation2 + $0x1a8] sm:$0xff] %v8302_v0 }
  0xcd   : > { %388 = vst [vmem:[#allocation2 + $0x1b0] sm:$0xff] %v8302_v0  ;;  %389 = vst [vmem:[#allocation2 + $0x1b8] sm:$0xff] %v8302_v0 }
  0xce   : > { %390 = vst [vmem:[#allocation2 + $0x1c0] sm:$0xff] %v8302_v0  ;;  %391 = vst [vmem:[#allocation2 + $0x1c8] sm:$0xff] %v8302_v0 }
  0xcf   : > { %392 = vst [vmem:[#allocation2 + $0x1d0] sm:$0xff] %v8302_v0  ;;  %393 = vst [vmem:[#allocation2 + $0x1d8] sm:$0xff] %v8302_v0 }
  0xd0   : > { %394 = vst [vmem:[#allocation2 + $0x1e0] sm:$0xff] %v8302_v0  ;;  %395 = vst [vmem:[#allocation2 + $0x1e8] sm:$0xff] %v8302_v0 }
  0xd1   : > { %396 = vst [vmem:[#allocation2 + $0x1f0] sm:$0xff] %v8302_v0  ;;  %397 = vst [vmem:[#allocation2 + $0x1f8] sm:$0xff] %v8302_v0 }
  0xd2   : > { %398 = vst [vmem:[#allocation2 + $0x200] sm:$0xff] %v8302_v0  ;;  %399 = vst [vmem:[#allocation2 + $0x208] sm:$0xff] %v8302_v0 }
  0xd3   : > { %400 = vst [vmem:[#allocation2 + $0x210] sm:$0xff] %v8302_v0  ;;  %401 = vst [vmem:[#allocation2 + $0x218] sm:$0xff] %v8302_v0 }
  0xd4   : > { %402 = vst [vmem:[#allocation2 + $0x220] sm:$0xff] %v8302_v0  ;;  %403 = vst [vmem:[#allocation2 + $0x228] sm:$0xff] %v8302_v0 }
  0xd5   : > { %404 = vst [vmem:[#allocation2 + $0x230] sm:$0xff] %v8302_v0  ;;  %405 = vst [vmem:[#allocation2 + $0x238] sm:$0xff] %v8302_v0 }
  0xd6   : > { %406 = vst [vmem:[#allocation2 + $0x240] sm:$0xff] %v8302_v0  ;;  %407 = vst [vmem:[#allocation2 + $0x248] sm:$0xff] %v8302_v0 }
  0xd7   : > { %408 = vst [vmem:[#allocation2 + $0x250] sm:$0xff] %v8302_v0  ;;  %409 = vst [vmem:[#allocation2 + $0x258] sm:$0xff] %v8302_v0 }
  0xd8   : > { %410 = vst [vmem:[#allocation2 + $0x260] sm:$0xff] %v8302_v0  ;;  %411 = vst [vmem:[#allocation2 + $0x268] sm:$0xff] %v8302_v0 }
  0xd9   : > { %412 = vst [vmem:[#allocation2 + $0x270] sm:$0xff] %v8302_v0  ;;  %413 = vst [vmem:[#allocation2 + $0x278] sm:$0xff] %v8302_v0 }
  0xda   : > { %414 = vst [vmem:[#allocation2 + $0x280] sm:$0xff] %v8302_v0  ;;  %415 = vst [vmem:[#allocation2 + $0x288] sm:$0xff] %v8302_v0 }
  0xdb   : > { %416 = vst [vmem:[#allocation2 + $0x290] sm:$0xff] %v8302_v0  ;;  %417 = vst [vmem:[#allocation2 + $0x298] sm:$0xff] %v8302_v0 }
  0xdc   : > { %418 = vst [vmem:[#allocation2 + $0x2a0] sm:$0xff] %v8302_v0  ;;  %419 = vst [vmem:[#allocation2 + $0x2a8] sm:$0xff] %v8302_v0 }
  0xdd   : > { %420 = vst [vmem:[#allocation2 + $0x2b0] sm:$0xff] %v8302_v0  ;;  %421 = vst [vmem:[#allocation2 + $0x2b8] sm:$0xff] %v8302_v0 }
  0xde   : > { %422 = vst [vmem:[#allocation2 + $0x2c0] sm:$0xff] %v8302_v0  ;;  %423 = vst [vmem:[#allocation2 + $0x2c8] sm:$0xff] %v8302_v0 }
  0xdf   : > { %424 = vst [vmem:[#allocation2 + $0x2d0] sm:$0xff] %v8302_v0  ;;  %425 = vst [vmem:[#allocation2 + $0x2d8] sm:$0xff] %v8302_v0 }
  0xe0   : > { %426 = vst [vmem:[#allocation2 + $0x2e0] sm:$0xff] %v8302_v0  ;;  %427 = vst [vmem:[#allocation2 + $0x2e8] sm:$0xff] %v8302_v0 }
  0xe1   : > { %428 = vst [vmem:[#allocation2 + $0x2f0] sm:$0xff] %v8302_v0  ;;  %429 = vst [vmem:[#allocation2 + $0x2f8] sm:$0xff] %v8302_v0 }
  0xe2 PF: > { %v6862_v1 = vld [vmem:[%s8614_s18 + $0x4] ss:$16 sps:$4 sm:$0xff]   ;;  %v6864_v2 = vld [vmem:[%s8614_s18] ss:$16 sps:$4 sm:$0xff]   ;;  %v6942_v61 = vld [vmem:[%s8614_s18 + $0xc] ss:$16 sps:$4 sm:$0xff]  }
  0xe3   : > { %1102 = vmatprep.subr.bf16.mxu1 %v6862_v1  ;;  %v6865_v3 = vld [vmem:[%s8614_s18 + $0x24] ss:$16 sps:$4 sm:$0xff]   ;;  %v6867_v4 = vld [vmem:[%s8614_s18 + $0x20] ss:$16 sps:$4 sm:$0xff]   ;;  %v6940_v63 = vld [vmem:[%s8614_s18 + $0x8] ss:$16 sps:$4 sm:$0xff]  }
  0xe4   : > { %1103 = vmatpush1.bf16.msra.mxu1 %v6864_v2  ;;  %v6868_v5 = vld [vmem:[%s8614_s18 + $0x44] ss:$16 sps:$4 sm:$0xff]   ;;  %v6870_v6 = vld [vmem:[%s8614_s18 + $0x40] ss:$16 sps:$4 sm:$0xff]   ;;  %v6957_v2 = vld [vmem:[%s8614_s18 + $0x2c] ss:$16 sps:$4 sm:$0xff]  }
  0xe5   : > { %1104 = vmatprep.subr.bf16.mxu1 %v6865_v3  ;;  %v6871_v7 = vld [vmem:[%s8614_s18 + $0x64] ss:$16 sps:$4 sm:$0xff]   ;;  %v6873_v8 = vld [vmem:[%s8614_s18 + $0x60] ss:$16 sps:$4 sm:$0xff]   ;;  %s10891_s6 = sld [smem:[#allocation17_spill]] }
  0xe6   : > { %v6885_v9 = vld [vmem:[%s8621_s27 + $0x4] ss:$16 sps:$4 sm:$0xff]   ;;  %v6888_v10 = vld [vmem:[%s8621_s27] ss:$16 sps:$4 sm:$0xff]  }
  0xe7   : > { %v6874_v11 = vld [vmem:[%s8614_s18 + $0x84] ss:$16 sps:$4 sm:$0xff]   ;;  %2032 = vmatprep.subr.bf16.mxu0 %v6885_v9  ;;  %v6894_v13 = vld [vmem:[%s8621_s27 + $0x20] ss:$16 sps:$4 sm:$0xff]  }
  0xe8   : > { %1105 = vmatpush1.bf16.msra.mxu1 %v6867_v4  ;;  %v6891_v12 = vld [vmem:[%s8621_s27 + $0x24] ss:$16 sps:$4 sm:$0xff]   ;;  %2033 = vmatpush1.bf16.msra.mxu0 %v6888_v10  ;;  %v6876_v14 = vld [vmem:[%s8614_s18 + $0x80] ss:$16 sps:$4 sm:$0xff]  }
  0xe9   : > { %1106 = vmatprep.subr.bf16.mxu1 %v6868_v5  ;;  %2034 = vmatprep.subr.bf16.mxu0 %v6891_v12  ;;  %v6877_v15 = vld [vmem:[%s8614_s18 + $0xa4] ss:$16 sps:$4 sm:$0xff]   ;;  %v6900_v17 = vld [vmem:[%s8621_s27 + $0x40] ss:$16 sps:$4 sm:$0xff]   ;;  %v6955_v5 = vld [vmem:[%s8614_s18 + $0x28] ss:$16 sps:$4 sm:$0xff]  }
  0xea   : > { %v6897_v16 = vld [vmem:[%s8621_s27 + $0x44] ss:$16 sps:$4 sm:$0xff]   ;;  %v6879_v18 = vld [vmem:[%s8614_s18 + $0xa0] ss:$16 sps:$4 sm:$0xff]   ;;  %v6984_v12 = vld [vmem:[%s8614_s18 + $0x6c] ss:$16 sps:$4 sm:$0xff]  }
  0xeb   : > { %v6903_v19 = vld [vmem:[%s8621_s27 + $0x64] ss:$16 sps:$4 sm:$0xff]   ;;  %v6882_v21 = vld [vmem:[%s8614_s18 + $0xc0] ss:$16 sps:$4 sm:$0xff]   ;;  %p6547_p0 = scmp.ge.s32.totalorder %s10891_s6, 1 }
  0xec   : > { %1107 = vmatpush1.bf16.msra.mxu1 %v6870_v6  ;;  %2035 = vmatpush1.bf16.msra.mxu0 %v6894_v13  ;;  %v6880_v20 = vld [vmem:[%s8614_s18 + $0xc4] ss:$16 sps:$4 sm:$0xff]   ;;  %v6906_v22 = vld [vmem:[%s8621_s27 + $0x60] ss:$16 sps:$4 sm:$0xff]   ;;  %v6982_v13 = vld [vmem:[%s8614_s18 + $0x68] ss:$16 sps:$4 sm:$0xff]  }
  0xed   : > { %1108 = vmatprep.subr.bf16.mxu1 %v6871_v7  ;;  %2036 = vmatprep.subr.bf16.mxu0 %v6897_v16  ;;  %v6909_v23 = vld [vmem:[%s8621_s27 + $0x84] ss:$16 sps:$4 sm:$0xff]   ;;  %v6912_v25 = vld [vmem:[%s8621_s27 + $0x80] ss:$16 sps:$4 sm:$0xff]   ;;  %v6975_v7 = vld [vmem:[%s8614_s18 + $0x4c] ss:$16 sps:$4 sm:$0xff]  }
  0xee   : > { %v6883_v24 = vld [vmem:[%s8614_s18 + $0xe4] ss:$16 sps:$4 sm:$0xff]   ;;  %v6887_v26 = vld [vmem:[%s8614_s18 + $0xe0] ss:$16 sps:$4 sm:$0xff]  }
  0xef   : > { %v6915_v27 = vld [vmem:[%s8621_s27 + $0xa4] ss:$16 sps:$4 sm:$0xff]   ;;  %v6893_v29 = vld [vmem:[%s8614_s18 + $0x100] ss:$16 sps:$4 sm:$0xff]  }
  0xf0   : > { %1109 = vmatpush1.bf16.msra.mxu1 %v6873_v8  ;;  %2037 = vmatpush1.bf16.msra.mxu0 %v6900_v17  ;;  %v6889_v28 = vld [vmem:[%s8614_s18 + $0x104] ss:$16 sps:$4 sm:$0xff]   ;;  %v6918_v30 = vld [vmem:[%s8621_s27 + $0xa0] ss:$16 sps:$4 sm:$0xff]   ;;  %v6991_v17 = vld [vmem:[%s8614_s18 + $0x88] ss:$16 sps:$4 sm:$0xff]  }
  0xf1   : > { %1110 = vmatprep.subr.bf16.mxu1 %v6874_v11  ;;  %2038 = vmatprep.subr.bf16.mxu0 %v6903_v19  ;;  %v6921_v31 = vld [vmem:[%s8621_s27 + $0xc4] ss:$16 sps:$4 sm:$0xff]   ;;  %v6924_v33 = vld [vmem:[%s8621_s27 + $0xc0] ss:$16 sps:$4 sm:$0xff]   ;;  %v6973_v11 = vld [vmem:[%s8614_s18 + $0x48] ss:$16 sps:$4 sm:$0xff]  }
  0xf2   : > { %v6895_v32 = vld [vmem:[%s8614_s18 + $0x124] ss:$16 sps:$4 sm:$0xff]   ;;  %v6899_v35 = vld [vmem:[%s8614_s18 + $0x120] ss:$16 sps:$4 sm:$0xff]   ;;  %v6997_v19 = vld [vmem:[%s8614_s18 + $0xa8] ss:$16 sps:$4 sm:$0xff]  }
  0xf3   : > { %v6937_v34 = vld [vmem:[#allocation3 + $0x4] ss:$8 sps:$4 sm:$0xff]   ;;  %v6930_v38 = vld [vmem:[%s8621_s27 + $0xe0] ss:$16 sps:$4 sm:$0xff]   ;;  %v8794_v1 = vld [vmem:[#allocation3 + $0x14] ss:$8 sps:$4 sm:$0xff]  }
  0xf4   : > { %1111 = vmatpush1.bf16.msra.mxu1 %v6876_v14  ;;  %2039 = vmatpush1.bf16.msra.mxu0 %v6906_v22  ;;  %v6927_v36 = vld [vmem:[%s8621_s27 + $0xe4] ss:$16 sps:$4 sm:$0xff]   ;;  %v6905_v39 = vld [vmem:[%s8614_s18 + $0x140] ss:$16 sps:$4 sm:$0xff]   ;;  %v6993_v14 = vld [vmem:[%s8614_s18 + $0x8c] ss:$16 sps:$4 sm:$0xff]  }
  0xf5   : > { %1112 = vmatprep.subr.bf16.mxu1 %v6877_v15  ;;  %2040 = vmatprep.subr.bf16.mxu0 %v6909_v23  ;;  %v6901_v37 = vld [vmem:[%s8614_s18 + $0x144] ss:$16 sps:$4 sm:$0xff]   ;;  %v6936_v42 = vld [vmem:[%s8621_s27 + $0x100] ss:$16 sps:$4 sm:$0xff]   ;;  %v7006_v23 = vld [vmem:[%s8614_s18 + $0xc8] ss:$16 sps:$4 sm:$0xff]  }
  0xf6   : > { %1134 = vmatprep.mubr.bf16.mxu1 %v6937_v34  ;;  %2064 = vmatprep.mubr.bf16.mxu0 %v6937_v34  ;;  %v6933_v40 = vld [vmem:[%s8621_s27 + $0x104] ss:$16 sps:$4 sm:$0xff]   ;;  %v6911_v43 = vld [vmem:[%s8614_s18 + $0x160] ss:$16 sps:$4 sm:$0xff]  }
  0xf7   : > { %v6907_v41 = vld [vmem:[%s8614_s18 + $0x164] ss:$16 sps:$4 sm:$0xff]   ;;  %v6945_v46 = vld [vmem:[%s8621_s27 + $0x120] ss:$16 sps:$4 sm:$0xff]  }
  0xf8   : > { %1113 = vmatpush1.bf16.msra.mxu1 %v6879_v18  ;;  %2041 = vmatpush1.bf16.msra.mxu0 %v6912_v25  ;;  %v6943_v44 = vld [vmem:[%s8621_s27 + $0x124] ss:$16 sps:$4 sm:$0xff]   ;;  %v6917_v47 = vld [vmem:[%s8614_s18 + $0x180] ss:$16 sps:$4 sm:$0xff]   ;;  %v6999_v18 = vld [vmem:[%s8614_s18 + $0xac] ss:$16 sps:$4 sm:$0xff]  }
  0xf9   : > { %1114 = vmatprep.subr.bf16.mxu1 %v6880_v20  ;;  %2042 = vmatprep.subr.bf16.mxu0 %v6915_v27  ;;  %v6913_v45 = vld [vmem:[%s8614_s18 + $0x184] ss:$16 sps:$4 sm:$0xff]   ;;  %v6948_v50 = vld [vmem:[%s8621_s27 + $0x140] ss:$16 sps:$4 sm:$0xff]   ;;  %v7012_v25 = vld [vmem:[%s8614_s18 + $0xe8] ss:$16 sps:$4 sm:$0xff]  }
  0xfa   : > { %v6946_v48 = vld [vmem:[%s8621_s27 + $0x144] ss:$16 sps:$4 sm:$0xff]   ;;  %v6923_v51 = vld [vmem:[%s8614_s18 + $0x1a0] ss:$16 sps:$4 sm:$0xff]  }
  0xfb   : > { %v6919_v49 = vld [vmem:[%s8614_s18 + $0x1a4] ss:$16 sps:$4 sm:$0xff]   ;;  %v6954_v54 = vld [vmem:[%s8621_s27 + $0x160] ss:$16 sps:$4 sm:$0xff]  }
  0xfc   : > { %1115 = vmatpush1.bf16.msra.mxu1 %v6882_v21  ;;  %2043 = vmatpush1.bf16.msra.mxu0 %v6918_v30  ;;  %v6952_v52 = vld [vmem:[%s8621_s27 + $0x164] ss:$16 sps:$4 sm:$0xff]   ;;  %v6929_v55 = vld [vmem:[%s8614_s18 + $0x1c0] ss:$16 sps:$4 sm:$0xff]   ;;  %v7008_v21 = vld [vmem:[%s8614_s18 + $0xcc] ss:$16 sps:$4 sm:$0xff]  }
  0xfd   : > { %1116 = vmatprep.subr.bf16.mxu1 %v6883_v24  ;;  %2044 = vmatprep.subr.bf16.mxu0 %v6921_v31  ;;  %v6925_v53 = vld [vmem:[%s8614_s18 + $0x1c4] ss:$16 sps:$4 sm:$0xff]   ;;  %v6960_v58 = vld [vmem:[%s8621_s27 + $0x180] ss:$16 sps:$4 sm:$0xff]   ;;  %v7014_v24 = vld [vmem:[%s8614_s18 + $0xec] ss:$16 sps:$4 sm:$0xff]  }
  0xfe   : > { %v6958_v56 = vld [vmem:[%s8621_s27 + $0x184] ss:$16 sps:$4 sm:$0xff]   ;;  %v6935_v59 = vld [vmem:[%s8614_s18 + $0x1e0] ss:$16 sps:$4 sm:$0xff]   ;;  %v7029_v30 = vld [vmem:[%s8614_s18 + $0x12c] ss:$16 sps:$4 sm:$0xff]  }
  0xff   : > { %v6931_v57 = vld [vmem:[%s8614_s18 + $0x1e4] ss:$16 sps:$4 sm:$0xff]   ;;  %v8790_v62 = vld [vmem:[#allocation3] ss:$8 sps:$4 sm:$0xff]   ;;  %v8804_v8 = vld [vmem:[#allocation3 + $0x10] ss:$8 sps:$4 sm:$0xff]  }
 0x100   : > { %1117 = vmatpush1.bf16.msra.mxu1 %v6887_v26  ;;  %2045 = vmatpush1.bf16.msra.mxu0 %v6924_v33  ;;  %v6964_v60 = vld [vmem:[%s8621_s27 + $0x1a4] ss:$16 sps:$4 sm:$0xff]   ;;  %v6966_v0 = vld [vmem:[%s8621_s27 + $0x1a0] ss:$16 sps:$4 sm:$0xff]   ;;  %v7023_v26 = vld [vmem:[%s8614_s18 + $0x10c] ss:$16 sps:$4 sm:$0xff]  }
 0x101   : > { %1118 = vmatprep.subr.bf16.mxu1 %v6889_v28  ;;  %2046 = vmatprep.subr.bf16.mxu0 %v6927_v36  ;;  %v6967_v3 = vld [vmem:[%s8621_s27 + $0x1c4] ss:$16 sps:$4 sm:$0xff]   ;;  %v6969_v4 = vld [vmem:[%s8621_s27 + $0x1c0] ss:$16 sps:$4 sm:$0xff]   ;;  %v7027_v31 = vld [vmem:[%s8614_s18 + $0x128] ss:$16 sps:$4 sm:$0xff]  }
 0x102   : > { %v6976_v6 = vld [vmem:[%s8621_s27 + $0x1e4] ss:$16 sps:$4 sm:$0xff]   ;;  %v6978_v9 = vld [vmem:[%s8621_s27 + $0x1e0] ss:$16 sps:$4 sm:$0xff]   ;;  %v7044_v36 = vld [vmem:[%s8614_s18 + $0x16c] ss:$16 sps:$4 sm:$0xff]  }
 0x103   : > { %v8807_v10 = vld [vmem:[#allocation3 + $0x24] ss:$8 sps:$4 sm:$0xff]   ;;  %v8816_v15 = vld [vmem:[#allocation3 + $0x20] ss:$8 sps:$4 sm:$0xff]   ;;  %v8819_v16 = vld [vmem:[#allocation3 + $0x34] ss:$8 sps:$4 sm:$0xff]  }
 0x104   : > { %1119 = vmatpush1.bf16.msra.mxu1 %v6893_v29  ;;  %2047 = vmatpush1.bf16.msra.mxu0 %v6930_v38  ;;  %v8826_v20 = vld [vmem:[#allocation3 + $0x30] ss:$8 sps:$4 sm:$0xff]   ;;  %v8829_v22 = vld [vmem:[#allocation3 + $0x44] ss:$8 sps:$4 sm:$0xff]   ;;  %v8839_v27 = vld [vmem:[#allocation3 + $0x40] ss:$8 sps:$4 sm:$0xff]  }
 0x105   : > { %1120 = vmatprep.subr.bf16.mxu1 %v6895_v32  ;;  %2048 = vmatprep.subr.bf16.mxu0 %v6933_v40  ;;  %v8841_v28 = vld [vmem:[#allocation3 + $0x54] ss:$8 sps:$4 sm:$0xff]   ;;  %v7021_v29 = vld [vmem:[%s8614_s18 + $0x108] ss:$16 sps:$4 sm:$0xff]   ;;  %v8853_v34 = vld [vmem:[#allocation3 + $0x64] ss:$8 sps:$4 sm:$0xff]  }
 0x106   : > { %v7038_v32 = vld [vmem:[%s8614_s18 + $0x14c] ss:$16 sps:$4 sm:$0xff]   ;;  %v8851_v33 = vld [vmem:[#allocation3 + $0x50] ss:$8 sps:$4 sm:$0xff]  }
 0x107   : > { %v7053_v38 = vld [vmem:[%s8614_s18 + $0x18c] ss:$16 sps:$4 sm:$0xff]  }
 0x108   : > { %1121 = vmatpush1.bf16.msra.mxu1 %v6899_v35  ;;  %2049 = vmatpush1.bf16.msra.mxu0 %v6936_v42  ;;  %v7036_v35 = vld [vmem:[%s8614_s18 + $0x148] ss:$16 sps:$4 sm:$0xff]   ;;  %v8865_v40 = vld [vmem:[#allocation3 + $0x74] ss:$8 sps:$4 sm:$0xff]  }
 0x109   : > { %1122 = vmatprep.subr.bf16.mxu1 %v6901_v37  ;;  %2050 = vmatprep.subr.bf16.mxu0 %v6943_v44  ;;  %v7042_v37 = vld [vmem:[%s8614_s18 + $0x168] ss:$16 sps:$4 sm:$0xff]   ;;  %v7059_v42 = vld [vmem:[%s8614_s18 + $0x1ac] ss:$16 sps:$4 sm:$0xff]  }
 0x10a   : > { %v7068_v44 = vld [vmem:[%s8614_s18 + $0x1cc] ss:$16 sps:$4 sm:$0xff]  }
 0x10c   : > { %1123 = vmatpush1.bf16.msra.mxu1 %v6905_v39  ;;  %2051 = vmatpush1.bf16.msra.mxu0 %v6945_v46  ;;  %v8863_v39 = vld [vmem:[#allocation3 + $0x60] ss:$8 sps:$4 sm:$0xff]   ;;  %v8877_v46 = vld [vmem:[#allocation3 + $0x84] ss:$8 sps:$4 sm:$0xff]  }
 0x10d   : > { %1124 = vmatprep.subr.bf16.mxu1 %v6907_v41  ;;  %2052 = vmatprep.subr.bf16.mxu0 %v6946_v48  ;;  %v7051_v41 = vld [vmem:[%s8614_s18 + $0x188] ss:$16 sps:$4 sm:$0xff]   ;;  %v7074_v48 = vld [vmem:[%s8614_s18 + $0x1ec] ss:$16 sps:$4 sm:$0xff]  }
 0x110   : > { %1125 = vmatpush1.bf16.msra.mxu1 %v6911_v43  ;;  %2053 = vmatpush1.bf16.msra.mxu0 %v6948_v50  ;;  %v7057_v43 = vld [vmem:[%s8614_s18 + $0x1a8] ss:$16 sps:$4 sm:$0xff]  }
 0x111   : > { %1126 = vmatprep.subr.bf16.mxu1 %v6913_v45  ;;  %2054 = vmatprep.subr.bf16.mxu0 %v6952_v52  ;;  %v8875_v45 = vld [vmem:[#allocation3 + $0x70] ss:$8 sps:$4 sm:$0xff]  }
 0x112   : > { %v7072_v50 = vld [vmem:[%s8614_s18 + $0x1e8] ss:$16 sps:$4 sm:$0xff]  }
 0x113   : > { %v7081_v52 = vld [vmem:[%s8627_s15 + $0x10] ss:$8 sps:$4 sm:$0xff]  }
 0x114   : > { %1127 = vmatpush1.bf16.msra.mxu1 %v6917_v47  ;;  %2055 = vmatpush1.bf16.msra.mxu0 %v6954_v54  ;;  %v7066_v47 = vld [vmem:[%s8614_s18 + $0x1c8] ss:$16 sps:$4 sm:$0xff]  }
 0x115   : > { %1128 = vmatprep.subr.bf16.mxu1 %v6919_v49  ;;  %2056 = vmatprep.subr.bf16.mxu0 %v6958_v56  ;;  %v7080_v49 = vld [vmem:[%s8627_s15 + $0x4] ss:$8 sps:$4 sm:$0xff]   ;;  %v8890_v54 = vld [vmem:[#allocation3 + $0x80] ss:$8 sps:$4 sm:$0xff]  }
 0x116   : > { %v7089_v56 = vld [vmem:[%s8627_s15 + $0x24] ss:$8 sps:$4 sm:$0xff]  }
 0x118   : > { %1129 = vmatpush1.bf16.msra.mxu1 %v6923_v51  ;;  %2057 = vmatpush1.bf16.msra.mxu0 %v6960_v58  ;;  %v7078_v51 = vld [vmem:[%s8627_s15] ss:$8 sps:$4 sm:$0xff]   ;;  %v7086_v58 = vld [vmem:[%s8621_s27 + $0xc] ss:$16 sps:$4 sm:$0xff]  }
 0x119   : > { %1130 = vmatprep.subr.bf16.mxu1 %v6925_v53  ;;  %2058 = vmatprep.subr.bf16.mxu0 %v6964_v60  ;;  %v7083_v53 = vld [vmem:[%s8627_s15 + $0x14] ss:$8 sps:$4 sm:$0xff]   ;;  %v7090_v60 = vld [vmem:[%s8627_s15 + $0x30] ss:$8 sps:$4 sm:$0xff]  }
 0x11c   : > { %1131 = vmatpush1.bf16.msra.mxu1 %v6929_v55  ;;  %2059 = vmatpush1.bf16.msra.mxu0 %v6966_v0  ;;  %v8892_v55 = vld [vmem:[#allocation3 + $0x94] ss:$8 sps:$4 sm:$0xff]   ;;  %v7095_v0 = vld [vmem:[%s8627_s15 + $0x44] ss:$8 sps:$4 sm:$0xff]  }
 0x11d   : > { %1132 = vmatprep.subr.bf16.mxu1 %v6931_v57  ;;  %2060 = vmatprep.subr.bf16.mxu0 %v6967_v3  ;;  %v7087_v57 = vld [vmem:[%s8627_s15 + $0x20] ss:$8 sps:$4 sm:$0xff]   ;;  %v7101_v3 = vld [vmem:[%s8627_s15 + $0x54] ss:$8 sps:$4 sm:$0xff]  }
 0x120   : > { %1133 = vmatpush1.bf16.msra.mxu1 %v6935_v59  ;;  %2061 = vmatpush1.bf16.msra.mxu0 %v6969_v4  ;;  %v7092_v59 = vld [vmem:[%s8627_s15 + $0x34] ss:$8 sps:$4 sm:$0xff]   ;;  %v7099_v4 = vld [vmem:[%s8627_s15 + $0x50] ss:$8 sps:$4 sm:$0xff]  }
 0x121   : > { %1375 = vmatprep.subr.bf16.mxu1 %v6942_v61  ;;  %2062 = vmatprep.subr.bf16.mxu0 %v6976_v6  ;;  %v8904_v61 = vld [vmem:[#allocation3 + $0x90] ss:$8 sps:$4 sm:$0xff]   ;;  %v8919_v6 = vld [vmem:[#allocation3 + $0xb4] ss:$8 sps:$4 sm:$0xff]  }
 0x123   : > { %1135 = vmatmul.mubr.bf16.vlgmr.msra.gmra.mrb[0].mxu1 %v8790_v62 }
 0x124   : > { %1376 = vmatpush1.bf16.msra.mxu1 %v6940_v63  ;;  %1144 = vmatprep.mubr.bf16.mxu1 %v8794_v1  ;;  %v8907_v63 = vld [vmem:[#allocation3 + $0xa4] ss:$8 sps:$4 sm:$0xff]  }
 0x125   : > { %1377 = vmatprep.subr.bf16.mxu1 %v6957_v2  ;;  %2063 = vmatpush1.bf16.msra.mxu0 %v6978_v9  ;;  %v7093_v2 = vld [vmem:[%s8627_s15 + $0x40] ss:$8 sps:$4 sm:$0xff]  }
 0x126   : > { %4594 = vmatprep.subr.bf16.mxu0 %v7080_v49  ;;  %v7102_v9 = vld [vmem:[%s8627_s15 + $0x60] ss:$8 sps:$4 sm:$0xff]   ;;  %v7039_v49 = vld [vmem:[#allocation3 + $0x104] ss:$8 sps:$4 sm:$0xff]  }
 0x128   : > { %1378 = vmatpush1.bf16.msra.mxu1 %v6955_v5  ;;  %2065 = vmatmul.mubr.bf16.vlgmr.msra.gmra.mrb[0].mxu0 %v8790_v62  ;;  %v8916_v5 = vld [vmem:[#allocation3 + $0xa0] ss:$8 sps:$4 sm:$0xff]  }
 0x129   : > { %1379 = vmatprep.subr.bf16.mxu1 %v6975_v7  ;;  %2074 = vmatprep.mubr.bf16.mxu0 %v8794_v1  ;;  %v7104_v7 = vld [vmem:[%s8627_s15 + $0x64] ss:$8 sps:$4 sm:$0xff]  }
 0x12a   : > { %4595 = vmatpush1.bf16.msra.mxu0 %v7078_v51  ;;  %v7041_v51 = vld [vmem:[#allocation3 + $0x100] ss:$8 sps:$4 sm:$0xff]  }
 0x12b   : > { %1145 = vmatmul.mubr.bf16.gmra.mrb[4].mxu1 %v8804_v8  ;;  %4596 = vmatprep.subr.bf16.mxu0 %v7083_v53  ;;  %v7047_v53 = vld [vmem:[#allocation3 + $0x110] ss:$8 sps:$4 sm:$0xff]  }
 0x12c   : > { %1154 = vmatprep.mubr.bf16.mxu1 %v8807_v10  ;;  %1380 = vmatpush1.bf16.msra.mxu1 %v6973_v11  ;;  %v7107_v11 = vld [vmem:[%s8627_s15 + $0x74] ss:$8 sps:$4 sm:$0xff]  }
 0x12d   : > { %1381 = vmatprep.subr.bf16.mxu1 %v6984_v12  ;;  %v7105_v12 = vld [vmem:[%s8627_s15 + $0x70] ss:$8 sps:$4 sm:$0xff]  }
 0x12e   : > { %4597 = vmatpush1.bf16.msra.mxu0 %v7081_v52  ;;  %v7045_v52 = vld [vmem:[#allocation3 + $0x114] ss:$8 sps:$4 sm:$0xff]  }
 0x12f   : > { %4598 = vmatprep.subr.bf16.mxu0 %v7089_v56  ;;  %v7048_v56 = vld [vmem:[#allocation3 + $0x124] ss:$8 sps:$4 sm:$0xff]  }
 0x130   : > { %1382 = vmatpush1.bf16.msra.mxu1 %v6982_v13  ;;  %2075 = vmatmul.mubr.bf16.gmra.mrb[4].mxu0 %v8804_v8  ;;  %v8928_v13 = vld [vmem:[#allocation3 + $0xb0] ss:$8 sps:$4 sm:$0xff]  }
 0x131   : > { %1383 = vmatprep.subr.bf16.mxu1 %v6993_v14  ;;  %2084 = vmatprep.mubr.bf16.mxu0 %v8807_v10  ;;  %v8931_v14 = vld [vmem:[#allocation3 + $0xc4] ss:$8 sps:$4 sm:$0xff]  }
 0x132   : > { %4599 = vmatpush1.bf16.msra.mxu0 %v7087_v57  ;;  %v7050_v57 = vld [vmem:[#allocation3 + $0x120] ss:$8 sps:$4 sm:$0xff]  }
 0x133   : > { %1155 = vmatmul.mubr.bf16.gmra.mrb[8].mxu1 %v8816_v15  ;;  %4600 = vmatprep.subr.bf16.mxu0 %v7092_v59  ;;  %v7056_v59 = vld [vmem:[#allocation3 + $0x130] ss:$8 sps:$4 sm:$0xff]  }
 0x134   : > { %1164 = vmatprep.mubr.bf16.mxu1 %v8819_v16  ;;  %1384 = vmatpush1.bf16.msra.mxu1 %v6991_v17  ;;  %v7113_v17 = vld [vmem:[%s8627_s15 + $0x84] ss:$8 sps:$4 sm:$0xff]  }
 0x135   : > { %1385 = vmatprep.subr.bf16.mxu1 %v6999_v18  ;;  %v7111_v18 = vld [vmem:[%s8627_s15 + $0x80] ss:$8 sps:$4 sm:$0xff]  }
 0x136   : > { %4601 = vmatpush1.bf16.msra.mxu0 %v7090_v60  ;;  %v7060_v60 = vld [vmem:[#allocation3 + $0x144] ss:$8 sps:$4 sm:$0xff]  }
 0x137   : > { %4602 = vmatprep.subr.bf16.mxu0 %v7095_v0  ;;  %v7062_v0 = vld [vmem:[#allocation3 + $0x140] ss:$8 sps:$4 sm:$0xff]  }
 0x138   : > { %1386 = vmatpush1.bf16.msra.mxu1 %v6997_v19  ;;  %2085 = vmatmul.mubr.bf16.gmra.mrb[8].mxu0 %v8816_v15  ;;  %v7116_v19 = vld [vmem:[%s8627_s15 + $0x94] ss:$8 sps:$4 sm:$0xff]  }
 0x139   : > { %1387 = vmatprep.subr.bf16.mxu1 %v7008_v21  ;;  %2094 = vmatprep.mubr.bf16.mxu0 %v8819_v16  ;;  %v7114_v21 = vld [vmem:[%s8627_s15 + $0x90] ss:$8 sps:$4 sm:$0xff]  }
 0x13a   : > { %4603 = vmatpush1.bf16.msra.mxu0 %v7093_v2  ;;  %v7063_v2 = vld [vmem:[#allocation3 + $0x154] ss:$8 sps:$4 sm:$0xff]  }
 0x13b   : > { %1165 = vmatmul.mubr.bf16.gmra.mrb[12].mxu1 %v8826_v20  ;;  %4604 = vmatprep.subr.bf16.mxu0 %v7101_v3  ;;  %v7065_v3 = vld [vmem:[#allocation3 + $0x150] ss:$8 sps:$4 sm:$0xff]  }
 0x13c   : > { %1174 = vmatprep.mubr.bf16.mxu1 %v8829_v22  ;;  %1388 = vmatpush1.bf16.msra.mxu1 %v7006_v23  ;;  %v7020_v23 = vld [vmem:[#allocation3 + $0xc0] ss:$8 sps:$4 sm:$0xff]  }
 0x13d   : > { %1389 = vmatprep.subr.bf16.mxu1 %v7014_v24  ;;  %v7024_v24 = vld [vmem:[#allocation3 + $0xd4] ss:$8 sps:$4 sm:$0xff]  }
 0x13e   : > { %4605 = vmatpush1.bf16.msra.mxu0 %v7099_v4  ;;  %v7069_v4 = vld [vmem:[#allocation3 + $0x164] ss:$8 sps:$4 sm:$0xff]  }
 0x13f   : > { %4606 = vmatprep.subr.bf16.mxu0 %v7104_v7  ;;  %v7071_v7 = vld [vmem:[#allocation3 + $0x160] ss:$8 sps:$4 sm:$0xff]  }
 0x140   : > { %1390 = vmatpush1.bf16.msra.mxu1 %v7012_v25  ;;  %2095 = vmatmul.mubr.bf16.gmra.mrb[12].mxu0 %v8826_v20  ;;  %v7119_v25 = vld [vmem:[%s8627_s15 + $0xa4] ss:$8 sps:$4 sm:$0xff]  }
 0x141   : > { %1391 = vmatprep.subr.bf16.mxu1 %v7023_v26  ;;  %2104 = vmatprep.mubr.bf16.mxu0 %v8829_v22  ;;  %v7117_v26 = vld [vmem:[%s8627_s15 + $0xa0] ss:$8 sps:$4 sm:$0xff]  }
 0x142   : > { %4607 = vmatpush1.bf16.msra.mxu0 %v7102_v9  ;;  %v7075_v9 = vld [vmem:[#allocation3 + $0x174] ss:$8 sps:$4 sm:$0xff]  }
 0x143   : > { %1175 = vmatmul.mubr.bf16.gmra.mrb[16].mxu1 %v8839_v27  ;;  %4608 = vmatprep.subr.bf16.mxu0 %v7107_v11  ;;  %v7077_v11 = vld [vmem:[#allocation3 + $0x170] ss:$8 sps:$4 sm:$0xff]  }
 0x144   : > { %1184 = vmatprep.mubr.bf16.mxu1 %v8841_v28  ;;  %1392 = vmatpush1.bf16.msra.mxu1 %v7021_v29  ;;  %v7125_v29 = vld [vmem:[%s8627_s15 + $0xb4] ss:$8 sps:$4 sm:$0xff]  }
 0x145   : > { %1393 = vmatprep.subr.bf16.mxu1 %v7029_v30  ;;  %v7026_v30 = vld [vmem:[#allocation3 + $0xd0] ss:$8 sps:$4 sm:$0xff]  }
 0x146   : > { %4609 = vmatpush1.bf16.msra.mxu0 %v7105_v12  ;;  %v7990_v12 = vld [vmem:[#allocation3 + $0x4] ss:$8 sps:$4 sm:$0xff]  }
 0x147   : > { %4610 = vmatprep.subr.bf16.mxu0 %v7113_v17  ;;  %v7084_v17 = vld [vmem:[%s8621_s27 + $0x8] ss:$16 sps:$4 sm:$0xff]  }
 0x148   : > { %1394 = vmatpush1.bf16.msra.mxu1 %v7027_v31  ;;  %2105 = vmatmul.mubr.bf16.gmra.mrb[16].mxu0 %v8839_v27  ;;  %v7123_v31 = vld [vmem:[%s8627_s15 + $0xb0] ss:$8 sps:$4 sm:$0xff]  }
 0x149   : > { %1395 = vmatprep.subr.bf16.mxu1 %v7038_v32  ;;  %2114 = vmatprep.mubr.bf16.mxu0 %v8841_v28  ;;  %v7030_v32 = vld [vmem:[#allocation3 + $0xe4] ss:$8 sps:$4 sm:$0xff]  }
 0x14a   : > { %4611 = vmatpush1.bf16.msra.mxu0 %v7111_v18  ;;  %v7098_v18 = vld [vmem:[%s8621_s27 + $0x2c] ss:$16 sps:$4 sm:$0xff]  }
 0x14b   : > { %1185 = vmatmul.mubr.bf16.gmra.mrb[20].mxu1 %v8851_v33  ;;  %4612 = vmatprep.subr.bf16.mxu0 %v7116_v19  ;;  %v7096_v19 = vld [vmem:[%s8621_s27 + $0x28] ss:$16 sps:$4 sm:$0xff]  }
 0x14c   : > { %1194 = vmatprep.mubr.bf16.mxu1 %v8853_v34  ;;  %1396 = vmatpush1.bf16.msra.mxu1 %v7036_v35  ;;  %v7128_v35 = vld [vmem:[%s8627_s15 + $0xc4] ss:$8 sps:$4 sm:$0xff]  }
 0x14d   : > { %1397 = vmatprep.subr.bf16.mxu1 %v7044_v36  ;;  %v7126_v36 = vld [vmem:[%s8627_s15 + $0xc0] ss:$8 sps:$4 sm:$0xff]  }
 0x14e   : > { %4613 = vmatpush1.bf16.msra.mxu0 %v7114_v21  ;;  %v7110_v21 = vld [vmem:[%s8621_s27 + $0x4c] ss:$16 sps:$4 sm:$0xff]  }
 0x14f   : > { %4614 = vmatprep.subr.bf16.mxu0 %v7119_v25  ;;  %v7132_v25 = vld [vmem:[%s8621_s27 + $0x88] ss:$16 sps:$4 sm:$0xff]  }
 0x150   : > { %1398 = vmatpush1.bf16.msra.mxu1 %v7042_v37  ;;  %2115 = vmatmul.mubr.bf16.gmra.mrb[20].mxu0 %v8851_v33  ;;  %v7131_v37 = vld [vmem:[%s8627_s15 + $0xd4] ss:$8 sps:$4 sm:$0xff]  }
 0x151   : > { %1399 = vmatprep.subr.bf16.mxu1 %v7053_v38  ;;  %2124 = vmatprep.mubr.bf16.mxu0 %v8853_v34  ;;  %v7032_v38 = vld [vmem:[#allocation3 + $0xe0] ss:$8 sps:$4 sm:$0xff]  }
 0x152   : > { %4615 = vmatpush1.bf16.msra.mxu0 %v7117_v26  ;;  %v7143_v26 = vld [vmem:[%s8621_s27 + $0xac] ss:$16 sps:$4 sm:$0xff]  }
 0x153   : > { %1195 = vmatmul.mubr.bf16.gmra.mrb[24].mxu1 %v8863_v39  ;;  %4616 = vmatprep.subr.bf16.mxu0 %v7125_v29  ;;  %v7141_v29 = vld [vmem:[%s8621_s27 + $0xa8] ss:$16 sps:$4 sm:$0xff]  }
 0x154   : > { %1204 = vmatprep.mubr.bf16.mxu1 %v8865_v40  ;;  %1400 = vmatpush1.bf16.msra.mxu1 %v7051_v41  ;;  %v7129_v41 = vld [vmem:[%s8627_s15 + $0xd0] ss:$8 sps:$4 sm:$0xff]  }
 0x155   : > { %1401 = vmatprep.subr.bf16.mxu1 %v7059_v42  ;;  %v7033_v42 = vld [vmem:[#allocation3 + $0xf4] ss:$8 sps:$4 sm:$0xff]  }
 0x156   : > { %4617 = vmatpush1.bf16.msra.mxu0 %v7123_v31 }
 0x157   : > { %4618 = vmatprep.subr.bf16.mxu0 %v7128_v35 }
 0x158   : > { %1402 = vmatpush1.bf16.msra.mxu1 %v7057_v43  ;;  %2125 = vmatmul.mubr.bf16.gmra.mrb[24].mxu0 %v8863_v39  ;;  %v7137_v43 = vld [vmem:[%s8627_s15 + $0xe4] ss:$8 sps:$4 sm:$0xff]  }
 0x159   : > { %1403 = vmatprep.subr.bf16.mxu1 %v7068_v44  ;;  %2134 = vmatprep.mubr.bf16.mxu0 %v8865_v40  ;;  %v7135_v44 = vld [vmem:[%s8627_s15 + $0xe0] ss:$8 sps:$4 sm:$0xff]  }
 0x15a   : > { %4619 = vmatpush1.bf16.msra.mxu0 %v7126_v36 }
 0x15b   : > { %1205 = vmatmul.mubr.bf16.gmra.mrb[28].mxu1 %v8875_v45  ;;  %4620 = vmatprep.subr.bf16.mxu0 %v7131_v37  ;;  %v7149_v37 = vld [vmem:[%s8621_s27 + $0xec] ss:$16 sps:$4 sm:$0xff]  }
 0x15c   : > { %1214 = vmatprep.mubr.bf16.mxu1 %v8877_v46  ;;  %1404 = vmatpush1.bf16.msra.mxu1 %v7066_v47  ;;  %v7035_v47 = vld [vmem:[#allocation3 + $0xf0] ss:$8 sps:$4 sm:$0xff]  }
 0x15d   : > { %1405 = vmatprep.subr.bf16.mxu1 %v7074_v48  ;;  %v7140_v48 = vld [vmem:[%s8627_s15 + $0xf4] ss:$8 sps:$4 sm:$0xff]  }
 0x15e   : > { %4621 = vmatpush1.bf16.msra.mxu0 %v7129_v41  ;;  %v7147_v41 = vld [vmem:[%s8621_s27 + $0xe8] ss:$16 sps:$4 sm:$0xff]  }
 0x15f   : > { %4622 = vmatprep.subr.bf16.mxu0 %v7137_v43 }
 0x160   : > { %1406 = vmatpush1.bf16.msra.mxu1 %v7072_v50  ;;  %2135 = vmatmul.mubr.bf16.gmra.mrb[28].mxu0 %v8875_v45  ;;  %v7138_v50 = vld [vmem:[%s8627_s15 + $0xf0] ss:$8 sps:$4 sm:$0xff]  }
 0x161   : > { %2305 = vmatprep.subr.bf16.mxu1 %v7086_v58  ;;  %2144 = vmatprep.mubr.bf16.mxu0 %v8877_v46  ;;  %v7054_v58 = vld [vmem:[#allocation3 + $0x134] ss:$8 sps:$4 sm:$0xff]  }
 0x162   : > { %4623 = vmatpush1.bf16.msra.mxu0 %v7135_v44 }
 0x163   : > { %1215 = vmatmul.mubr.bf16.gmra.mrb[32].mxu1 %v8890_v54  ;;  %4624 = vmatprep.subr.bf16.mxu0 %v7140_v48 }
 0x164   : > { %1224 = vmatprep.mubr.bf16.mxu1 %v8892_v55 }
 0x166   : > { %4625 = vmatpush1.bf16.msra.mxu0 %v7138_v50 }
 0x168   : > { %2145 = vmatmul.mubr.bf16.gmra.mrb[32].mxu0 %v8890_v54 }
 0x169   : > { %2154 = vmatprep.mubr.bf16.mxu0 %v8892_v55 }
 0x16b   : > { %1225 = vmatmul.mubr.bf16.gmra.mrb[36].mxu1 %v8904_v61 }
 0x16c   : > { %1234 = vmatprep.mubr.bf16.mxu1 %v8907_v63 }
 0x170   : > { %2155 = vmatmul.mubr.bf16.gmra.mrb[36].mxu0 %v8904_v61 }
 0x171   : > { %2164 = vmatprep.mubr.bf16.mxu0 %v8907_v63 }
 0x173   : > { %1235 = vmatmul.mubr.bf16.gmra.mrb[40].mxu1 %v8916_v5 }
 0x174   : > { %1244 = vmatprep.mubr.bf16.mxu1 %v8919_v6 }
 0x178   : > { %2165 = vmatmul.mubr.bf16.gmra.mrb[40].mxu0 %v8916_v5 }
 0x179   : > { %2174 = vmatprep.mubr.bf16.mxu0 %v8919_v6 }
 0x17b   : > { %1245 = vmatmul.mubr.bf16.gmra.mrb[44].mxu1 %v8928_v13 }
 0x17c   : > { %1254 = vmatprep.mubr.bf16.mxu1 %v8931_v14 }
 0x180   : > { %2175 = vmatmul.mubr.bf16.gmra.mrb[44].mxu0 %v8928_v13 }
 0x181   : > { %2184 = vmatprep.mubr.bf16.mxu0 %v8931_v14 }
 0x183   : > { %1255 = vmatmul.mubr.bf16.gmra.mrb[48].mxu1 %v7020_v23 }
 0x184   : > { %1264 = vmatprep.mubr.bf16.mxu1 %v7024_v24 }
 0x188   : > { %2185 = vmatmul.mubr.bf16.gmra.mrb[48].mxu0 %v7020_v23  ;;  %v7108_v23 = vld [vmem:[%s8621_s27 + $0x48] ss:$16 sps:$4 sm:$0xff]  }
 0x189   : > { %2194 = vmatprep.mubr.bf16.mxu0 %v7024_v24  ;;  %v7122_v24 = vld [vmem:[%s8621_s27 + $0x6c] ss:$16 sps:$4 sm:$0xff]  }
 0x18b   : > { %1265 = vmatmul.mubr.bf16.gmra.mrb[52].mxu1 %v7026_v30 }
 0x18c   : > { %1274 = vmatprep.mubr.bf16.mxu1 %v7030_v32 }
 0x190   : > { %2195 = vmatmul.mubr.bf16.gmra.mrb[52].mxu0 %v7026_v30 }
 0x191   : > { %2204 = vmatprep.mubr.bf16.mxu0 %v7030_v32 }
 0x193   : > { %1275 = vmatmul.mubr.bf16.gmra.mrb[56].mxu1 %v7032_v38 }
 0x194   : > { %1284 = vmatprep.mubr.bf16.mxu1 %v7033_v42 }
 0x198   : > { %2205 = vmatmul.mubr.bf16.gmra.mrb[56].mxu0 %v7032_v38 }
 0x199   : > { %2214 = vmatprep.mubr.bf16.mxu0 %v7033_v42  ;;  %v7152_v42 = vld [vmem:[%s8621_s27 + $0x10c] ss:$16 sps:$4 sm:$0xff]  }
 0x19b   : > { %1285 = vmatmul.mubr.bf16.gmra.mrb[60].mxu1 %v7035_v47 }
 0x19c   : > { %1294 = vmatprep.mubr.bf16.mxu1 %v7039_v49 }
 0x1a0   : > { %2215 = vmatmul.mubr.bf16.gmra.mrb[60].mxu0 %v7035_v47 }
 0x1a1   : > { %2224 = vmatprep.mubr.bf16.mxu0 %v7039_v49 }
 0x1a3   : > { %1295 = vmatmul.mubr.bf16.gmra.mrb[64].mxu1 %v7041_v51 }
 0x1a4   : > { %1304 = vmatprep.mubr.bf16.mxu1 %v7045_v52 }
 0x1a8   : > { %2225 = vmatmul.mubr.bf16.gmra.mrb[64].mxu0 %v7041_v51 }
 0x1a9   : > { %2234 = vmatprep.mubr.bf16.mxu0 %v7045_v52  ;;  %v7155_v52 = vld [vmem:[%s8621_s27 + $0x12c] ss:$16 sps:$4 sm:$0xff]  }
 0x1ab   : > { %1305 = vmatmul.mubr.bf16.gmra.mrb[68].mxu1 %v7047_v53 }
 0x1ac   : > { %1314 = vmatprep.mubr.bf16.mxu1 %v7048_v56 }
 0x1b0   : > { %2235 = vmatmul.mubr.bf16.gmra.mrb[68].mxu0 %v7047_v53 }
 0x1b1   : > { %2244 = vmatprep.mubr.bf16.mxu0 %v7048_v56 }
 0x1b3   : > { %1315 = vmatmul.mubr.bf16.gmra.mrb[72].mxu1 %v7050_v57 }
 0x1b4   : > { %1324 = vmatprep.mubr.bf16.mxu1 %v7054_v58 }
 0x1b8   : > { %2245 = vmatmul.mubr.bf16.gmra.mrb[72].mxu0 %v7050_v57 }
 0x1b9   : > { %2254 = vmatprep.mubr.bf16.mxu0 %v7054_v58 }
 0x1bb   : > { %1325 = vmatmul.mubr.bf16.gmra.mrb[76].mxu1 %v7056_v59 }
 0x1bc   : > { %1334 = vmatprep.mubr.bf16.mxu1 %v7060_v60 }
 0x1c0   : > { %2255 = vmatmul.mubr.bf16.gmra.mrb[76].mxu0 %v7056_v59 }
 0x1c1   : > { %2264 = vmatprep.mubr.bf16.mxu0 %v7060_v60 }
 0x1c3   : > { %1335 = vmatmul.mubr.bf16.gmra.mrb[80].mxu1 %v7062_v0 }
 0x1c4   : > { %1344 = vmatprep.mubr.bf16.mxu1 %v7063_v2 }
 0x1c8   : > { %2265 = vmatmul.mubr.bf16.gmra.mrb[80].mxu0 %v7062_v0 }
 0x1c9   : > { %2274 = vmatprep.mubr.bf16.mxu0 %v7063_v2  ;;  %v7153_v2 = vld [vmem:[%s8621_s27 + $0x128] ss:$16 sps:$4 sm:$0xff]  }
 0x1cb   : > { %1345 = vmatmul.mubr.bf16.gmra.mrb[84].mxu1 %v7065_v3 }
 0x1cc   : > { %1354 = vmatprep.mubr.bf16.mxu1 %v7069_v4 }
 0x1d0   : > { %2275 = vmatmul.mubr.bf16.gmra.mrb[84].mxu0 %v7065_v3 }
 0x1d1   : > { %2284 = vmatprep.mubr.bf16.mxu0 %v7069_v4 }
 0x1d3   : > { %1355 = vmatmul.mubr.bf16.gmra.mrb[88].mxu1 %v7071_v7 }
 0x1d4   : > { %1364 = vmatprep.mubr.bf16.mxu1 %v7075_v9 }
 0x1d8   : > { %2285 = vmatmul.mubr.bf16.gmra.mrb[88].mxu0 %v7071_v7  ;;  %v7158_v7 = vld [vmem:[%s8621_s27 + $0x14c] ss:$16 sps:$4 sm:$0xff]  }
 0x1d9   : > { %2294 = vmatprep.mubr.bf16.mxu0 %v7075_v9 }
 0x1db   : > { %1365 = vmatmul.mubr.bf16.gmra.mrb[92].mxu1 %v7077_v11 }
 0x1dc   : > { %1407 = vmatprep.mubr.bf16.mxu1 %v7990_v12 }
 0x1e0   : > { %2295 = vmatmul.mubr.bf16.gmra.mrb[92].mxu0 %v7077_v11 }
 0x1e3   : > { %1408 = vmatmul.mubr.bf16.vlgmr.msra.gmra.mrb[96].mxu1 %v8790_v62  ;;  %v7120_v62 = vld [vmem:[%s8621_s27 + $0x68] ss:$16 sps:$4 sm:$0xff]  }
 0x1e4   : > { %2306 = vmatpush1.bf16.msra.mxu1 %v7084_v17  ;;  %1417 = vmatprep.mubr.bf16.mxu1 %v8794_v1  ;;  %v7134_v1 = vld [vmem:[%s8621_s27 + $0x8c] ss:$16 sps:$4 sm:$0xff]  }
 0x1e5   : > { %2307 = vmatprep.subr.bf16.mxu1 %v7098_v18 }
 0x1e8   : > { %2308 = vmatpush1.bf16.msra.mxu1 %v7096_v19 }
 0x1e9   : > { %2309 = vmatprep.subr.bf16.mxu1 %v7110_v21  ;;  %v7156_v21 = vld [vmem:[%s8621_s27 + $0x148] ss:$16 sps:$4 sm:$0xff]  }
 0x1eb   : > { %1418 = vmatmul.mubr.bf16.gmra.mrb[100].mxu1 %v8804_v8  ;;  %v7146_v8 = vld [vmem:[%s8621_s27 + $0xcc] ss:$16 sps:$4 sm:$0xff]  }
 0x1ec   : > { %1427 = vmatprep.mubr.bf16.mxu1 %v8807_v10  ;;  %2310 = vmatpush1.bf16.msra.mxu1 %v7108_v23 }
 0x1ed   : > { %2311 = vmatprep.subr.bf16.mxu1 %v7122_v24 }
 0x1f0   : > { %2312 = vmatpush1.bf16.msra.mxu1 %v7120_v62 }
 0x1f1   : > { %2313 = vmatprep.subr.bf16.mxu1 %v7134_v1  ;;  %v7161_v1 = vld [vmem:[%s8621_s27 + $0x16c] ss:$16 sps:$4 sm:$0xff]  }
 0x1f3   : > { %1428 = vmatmul.mubr.bf16.gmra.mrb[104].mxu1 %v8816_v15  ;;  %v7144_v15 = vld [vmem:[%s8621_s27 + $0xc8] ss:$16 sps:$4 sm:$0xff]  }
 0x1f4   : > { %1437 = vmatprep.mubr.bf16.mxu1 %v8819_v16  ;;  %2314 = vmatpush1.bf16.msra.mxu1 %v7132_v25 }
 0x1f5   : > { %2315 = vmatprep.subr.bf16.mxu1 %v7143_v26 }
 0x1f6   : > { %v8973_v30 = vpop.f32.mrb[0].mxu1 }
 0x1f7   : > { %v6291_v10 = vmul.f32 -1.442695, %v8973_v30  ;;  %v8976_v31 = vpop.f32.mrb[1].mxu1 }
 0x1f8   : > { %v6292_v32 = vmul.f32 -1.442695, %v8976_v31  ;;  %v8979_v35 = vpop.f32.mrb[2].mxu1  ;;  %2316 = vmatpush1.bf16.msra.mxu1 %v7141_v29 }
 0x1f9   : > { %7222 = vpow2.f32 %v6291_v10  ;;  %v6295_v16 = vmul.f32 -1.442695, %v8979_v35  ;;  %v8983_v36 = vpop.f32.mrb[3].mxu1  ;;  %2317 = vmatprep.subr.bf16.mxu1 %v7146_v8 }
 0x1fa   : > { %7224 = vpow2.f32 %v6292_v32  ;;  %v6296_v38 = vmul.f32 -1.442695, %v8983_v36 }
 0x1fb   : > { %7226 = vpow2.f32 %v6295_v16  ;;  %1438 = vmatmul.mubr.bf16.gmra.mrb[108].mxu1 %v8826_v20  ;;  %v7150_v20 = vld [vmem:[%s8621_s27 + $0x108] ss:$16 sps:$4 sm:$0xff]   ;;  %v9003_v51 = vpop.f32.mrb[0].mxu0 }
 0x1fc   : > { %7228 = vpow2.f32 %v6296_v38  ;;  %1447 = vmatprep.mubr.bf16.mxu1 %v8829_v22  ;;  %2318 = vmatpush1.bf16.msra.mxu1 %v7144_v15  ;;  %v9007_v56 = vpop.f32.mrb[1].mxu0  ;;  %v7159_v16 = vld [vmem:[%s8621_s27 + $0x168] ss:$16 sps:$4 sm:$0xff]  }
 0x1fd   : > { %2319 = vmatprep.subr.bf16.mxu1 %v7149_v37  ;;  %v9010_v58 = vpop.f32.mrb[2].mxu0 }
 0x1fe   : > { %v8991_v43 = vpop.f32.mrb[4].mxu1  ;;  %v9013_v0 = vpop.f32.mrb[3].mxu0 }
 0x1ff   : > { %v6299_v44 = vmul.f32 -1.442695, %v8991_v43  ;;  %v8994_v47 = vpop.f32.mrb[5].mxu1 }
 0x200   : > { %v6300_v48 = vmul.f32 -1.442695, %v8994_v47  ;;  %v8997_v49 = vpop.f32.mrb[6].mxu1  ;;  %2320 = vmatpush1.bf16.msra.mxu1 %v7147_v41 }
 0x201   : > { %7230 = vpow2.f32 %v6299_v44  ;;  %v6303_v22 = vmul.f32 -1.442695, %v8997_v49  ;;  %v9001_v50 = vpop.f32.mrb[7].mxu1  ;;  %2321 = vmatprep.subr.bf16.mxu1 %v7152_v42 }
 0x202   : > { %7232 = vpow2.f32 %v6300_v48  ;;  %v6304_v53 = vmul.f32 -1.442695, %v9001_v50 }
 0x203   : > { %v7223_v57 = vpop.eup %7222  ;;  %7234 = vpow2.f32 %v6303_v22  ;;  %1448 = vmatmul.mubr.bf16.gmra.mrb[112].mxu1 %v8839_v27  ;;  %v9029_v62 = vpop.f32.mrb[4].mxu0 }
 0x204   : > { %v7225_v59 = vpop.eup %7224  ;;  %v3154_v60 = vadd.f32 1.0, %v7223_v57  ;;  %7236 = vpow2.f32 %v6304_v53  ;;  %1457 = vmatprep.mubr.bf16.mxu1 %v8841_v28  ;;  %2322 = vmatpush1.bf16.msra.mxu1 %v7150_v20  ;;  %v9033_v26 = vpop.f32.mrb[5].mxu0 }
 0x205   : > { %v7227_v3 = vpop.eup %7226  ;;  %v3155_v4 = vadd.f32 1.0, %v7225_v59  ;;  %2323 = vmatprep.subr.bf16.mxu1 %v7155_v52  ;;  %v9036_v8 = vpop.f32.mrb[6].mxu0 }
 0x206   : > { %v7229_v9 = vpop.eup %7228  ;;  %7238 = vrcp.f32 %v3154_v60  ;;  %v3158_v11 = vadd.f32 1.0, %v7227_v3  ;;  %v9017_v27 = vpop.f32.mrb[8].mxu1 }
 0x207   : > { %7240 = vrcp.f32 %v3155_v4  ;;  %v3159_v12 = vadd.f32 1.0, %v7229_v9  ;;  %v6307_v17 = vmul.f32 -1.442695, %v9017_v27  ;;  %v9020_v28 = vpop.f32.mrb[9].mxu1  ;;  %v9039_v15 = vpop.f32.mrb[7].mxu0 }
 0x208   : > { %7242 = vrcp.f32 %v3158_v11  ;;  %v6308_v18 = vmul.f32 -1.442695, %v9020_v28  ;;  %v9023_v19 = vpop.f32.mrb[10].mxu1  ;;  %2324 = vmatpush1.bf16.msra.mxu1 %v7153_v2  ;;  %v7162_v11 = vld [vmem:[%s8621_s27 + $0x188] ss:$16 sps:$4 sm:$0xff]  }
 0x209   : > { %7244 = vrcp.f32 %v3159_v12  ;;  %v6311_v23 = vmul.f32 -1.442695, %v9023_v19  ;;  %v9027_v24 = vpop.f32.mrb[11].mxu1  ;;  %2325 = vmatprep.subr.bf16.mxu1 %v7158_v7 }
 0x20a   : > { %7246 = vpow2.f32 %v6307_v17  ;;  %v6312_v25 = vmul.f32 -1.442695, %v9027_v24 }
 0x20b   : > { %v7231_v29 = vpop.eup %7230  ;;  %7248 = vpow2.f32 %v6308_v18  ;;  %1458 = vmatmul.mubr.bf16.gmra.mrb[116].mxu1 %v8851_v33  ;;  %v9054_v2 = vpop.f32.mrb[8].mxu0 }
 0x20c   : > { %v7233_v10 = vpop.eup %7232  ;;  %v3162_v32 = vadd.f32 1.0, %v7231_v29  ;;  %7250 = vpow2.f32 %v6311_v23  ;;  %1467 = vmatprep.mubr.bf16.mxu1 %v8853_v34  ;;  %2326 = vmatpush1.bf16.msra.mxu1 %v7156_v21  ;;  %v9058_v9 = vpop.f32.mrb[9].mxu0  ;;  %v7164_v21 = vld [vmem:[%s8621_s27 + $0x18c] ss:$16 sps:$4 sm:$0xff]  }
 0x20d   : > { %v7235_v37 = vpop.eup %7234  ;;  %v3163_v38 = vadd.f32 1.0, %v7233_v10  ;;  %7252 = vpow2.f32 %v6312_v25  ;;  %2327 = vmatprep.subr.bf16.mxu1 %v7161_v1 }
 0x20e   : > { %v7237_v41 = vpop.eup %7236  ;;  %7254 = vrcp.f32 %v3162_v32  ;;  %v3166_v42 = vadd.f32 1.0, %v7235_v37  ;;  %v9042_v44 = vpop.f32.mrb[12].mxu1 }
 0x20f   : > { %7256 = vrcp.f32 %v3163_v38  ;;  %v3167_v33 = vadd.f32 1.0, %v7237_v41  ;;  %v6315_v48 = vmul.f32 -1.442695, %v9042_v44  ;;  %v9045_v20 = vpop.f32.mrb[13].mxu1 }
 0x210   : > { %v7239_v34 = vpop.eup %7238  ;;  %7258 = vrcp.f32 %v3166_v42  ;;  %v6316_v22 = vmul.f32 -1.442695, %v9045_v20  ;;  %v9048_v52 = vpop.f32.mrb[14].mxu1  ;;  %2328 = vmatpush1.bf16.msra.mxu1 %v7159_v16 }
 0x211   : > { %v7241_v53 = vpop.eup %7240  ;;  %7260 = vrcp.f32 %v3167_v33  ;;  %v6319_v57 = vmul.f32 -1.442695, %v9048_v52  ;;  %v9051_v59 = vpop.f32.mrb[15].mxu1  ;;  %v3730_v60 = vmul.f32 %v7239_v34, %v8973_v30  ;;  %2329 = vmatprep.subr.bf16.mxu1 %v7164_v21 }
 0x212   : > { %v7243_v3 = vpop.eup %7242  ;;  %7262 = vpow2.f32 %v6315_v48  ;;  %v6320_v4 = vmul.f32 -1.442695, %v9051_v59  ;;  %v3731_v7 = vmul.f32 %v7241_v53, %v8976_v31  ;;  %v9064_v30 = vpop.f32.mrb[10].mxu0 }
 0x213   : > { %v7245_v12 = vpop.eup %7244  ;;  %7264 = vpow2.f32 %v6316_v22  ;;  %v3922_v17 = vmul.f32 %v3730_v60, %v9003_v51  ;;  %1468 = vmatmul.mubr.bf16.gmra.mrb[120].mxu1 %v8863_v39  ;;  %v3734_v18 = vmul.f32 %v7243_v3, %v8979_v35  ;;  %v9070_v25 = vpop.f32.mrb[11].mxu0 }
 0x214   : > { %v7247_v23 = vpop.eup %7246  ;;  %7266 = vpow2.f32 %v6319_v57  ;;  %v3923_v1 = vmul.f32 %v3731_v7, %v9007_v56  ;;  %v3735_v31 = vmul.f32 %v7245_v12, %v8983_v36  ;;  %1477 = vmatprep.mubr.bf16.mxu1 %v8865_v40  ;;  %2330 = vmatpush1.bf16.msra.mxu1 %v7162_v11  ;;  %v9086_v57 = vpop.f32.mrb[12].mxu0 }
 0x215   : > { %v7249_v29 = vpop.eup %7248  ;;  %v3170_v10 = vadd.f32 1.0, %v7247_v23  ;;  %7268 = vpow2.f32 %v6320_v4  ;;  %v3926_v39 = vmul.f32 %v3734_v18, %v9010_v58  ;;  %v9090_v7 = vpop.f32.mrb[13].mxu0  ;;  %v7167_v18 = vld [vmem:[%s8621_s27 + $0x1ac] ss:$16 sps:$4 sm:$0xff]  }
 0x216   : > { %v7251_v35 = vpop.eup %7250  ;;  %v3171_v51 = vadd.f32 1.0, %v7249_v29  ;;  %v3927_v32 = vmul.f32 %v3735_v31, %v9013_v0  ;;  %v9074_v16 = vpop.f32.mrb[16].mxu1  ;;  %v7165_v31 = vld [vmem:[%s8621_s27 + $0x1a8] ss:$16 sps:$4 sm:$0xff]   ;;  %2331 = vmatprep.subr.bf16.mxu1 %v7167_v18 }
 0x217   : > { %v7253_v56 = vpop.eup %7252  ;;  %7270 = vrcp.f32 %v3170_v10  ;;  %v3174_v36 = vadd.f32 1.0, %v7251_v35  ;;  %v4114_v37 = vpack.c.bf16 %v3926_v39, %v3922_v17  ;;  %v6323_v40 = vmul.f32 -1.442695, %v9074_v16  ;;  %v9077_v38 = vpop.f32.mrb[17].mxu1 }
 0x218   : > { %v7255_v41 = vpop.eup %7254  ;;  %7272 = vrcp.f32 %v3171_v51  ;;  %v3175_v42 = vadd.f32 1.0, %v7253_v56  ;;  %v4115_v58 = vpack.c.bf16 %v3927_v32, %v3923_v1  ;;  %v6324_v33 = vmul.f32 -1.442695, %v9077_v38  ;;  %v9080_v48 = vpop.f32.mrb[18].mxu1  ;;  %2332 = vmatpush1.bf16.msra.mxu1 %v7165_v31 }
 0x219   : > { %v7257_v0 = vpop.eup %7256  ;;  %7274 = vrcp.f32 %v3174_v36  ;;  %v6327_v34 = vmul.f32 -1.442695, %v9080_v48  ;;  %v9083_v22 = vpop.f32.mrb[19].mxu1  ;;  %v3738_v53 = vmul.f32 %v7255_v41, %v8991_v43 }
 0x21a   : > { %v7259_v60 = vpop.eup %7258  ;;  %7276 = vrcp.f32 %v3175_v42  ;;  %v6328_v3 = vmul.f32 -1.442695, %v9083_v22  ;;  %4626 = vmatprep.mubr.bf16.mxu0 %v4115_v58  ;;  %v3739_v4 = vmul.f32 %v7257_v0, %v8994_v47  ;;  %v9095_v17 = vpop.f32.mrb[14].mxu0 }
 0x21b   : > { %v7261_v11 = vpop.eup %7260  ;;  %7278 = vpow2.f32 %v6323_v40  ;;  %v3930_v12 = vmul.f32 %v3738_v53, %v9029_v62  ;;  %1478 = vmatmul.mubr.bf16.gmra.mrb[124].mxu1 %v8875_v45  ;;  %4627 = vmatmul.mubr.bf16.vlgmr.msra.gmra.mrb[96].mxu0 %v4114_v37  ;;  %v3742_v43 = vmul.f32 %v7259_v60, %v8997_v49  ;;  %v9101_v1 = vpop.f32.mrb[15].mxu0 }
 0x21c   : > { %v7263_v21 = vpop.eup %7262  ;;  %7280 = vpow2.f32 %v6324_v33  ;;  %v3931_v23 = vmul.f32 %v3739_v4, %v9033_v26  ;;  %v3743_v47 = vmul.f32 %v7261_v11, %v9001_v50  ;;  %1487 = vmatprep.mubr.bf16.mxu1 %v8877_v46  ;;  %v9118_v58 = vpop.f32.mrb[16].mxu0  ;;  %v7168_v33 = vld [vmem:[%s8621_s27 + $0x1c8] ss:$16 sps:$4 sm:$0xff]  }
 0x21d   : > { %v7265_v62 = vpop.eup %7264  ;;  %v3178_v29 = vadd.f32 1.0, %v7263_v21  ;;  %7282 = vpow2.f32 %v6327_v34  ;;  %v3934_v45 = vmul.f32 %v3742_v43, %v9036_v8  ;;  %v9123_v60 = vpop.f32.mrb[17].mxu0  ;;  %v7173_v21 = vld [vmem:[%s8621_s27 + $0x1ec] ss:$16 sps:$4 sm:$0xff]  }
 0x21e   : > { %v7267_v49 = vpop.eup %7266  ;;  %v3179_v10 = vadd.f32 1.0, %v7265_v62  ;;  %7284 = vpow2.f32 %v6328_v3  ;;  %v3935_v39 = vmul.f32 %v3743_v47, %v9039_v15  ;;  %v9106_v26 = vpop.f32.mrb[20].mxu1  ;;  %v7170_v15 = vld [vmem:[%s8621_s27 + $0x1cc] ss:$16 sps:$4 sm:$0xff]   ;;  %v7171_v47 = vld [vmem:[%s8621_s27 + $0x1e8] ss:$16 sps:$4 sm:$0xff]  }
 0x21f   : > { %v7269_v50 = vpop.eup %7268  ;;  %7286 = vrcp.f32 %v3178_v29  ;;  %v3182_v46 = vadd.f32 1.0, %v7267_v49  ;;  %v4118_v35 = vpack.c.bf16 %v3934_v45, %v3930_v12  ;;  %v6331_v51 = vmul.f32 -1.442695, %v9106_v26  ;;  %v9109_v32 = vpop.f32.mrb[21].mxu1  ;;  %2333 = vmatprep.subr.bf16.mxu1 %v7170_v15 }
 0x220   : > { %7288 = vrcp.f32 %v3179_v10  ;;  %v3183_v8 = vadd.f32 1.0, %v7269_v50  ;;  %v4119_v56 = vpack.c.bf16 %v3935_v39, %v3931_v23  ;;  %v6332_v36 = vmul.f32 -1.442695, %v9109_v32  ;;  %v9112_v37 = vpop.f32.mrb[22].mxu1  ;;  %v9127_v11 = vpop.f32.mrb[18].mxu0  ;;  %2334 = vmatpush1.bf16.msra.mxu1 %v7168_v33 }
 0x221   : > { %v7271_v40 = vpop.eup %7270  ;;  %7290 = vrcp.f32 %v3182_v46  ;;  %v6335_v41 = vmul.f32 -1.442695, %v9112_v37  ;;  %v9116_v42 = vpop.f32.mrb[23].mxu1  ;;  %2335 = vmatprep.subr.bf16.mxu1 %v7173_v21 }
 0x222   : > { %v7273_v0 = vpop.eup %7272  ;;  %7292 = vrcp.f32 %v3183_v8  ;;  %v6336_v34 = vmul.f32 -1.442695, %v9116_v42  ;;  %v3746_v53 = vmul.f32 %v7271_v40, %v9017_v27  ;;  %4636 = vmatprep.mubr.bf16.mxu0 %v4119_v56  ;;  %v9132_v18 = vpop.f32.mrb[19].mxu0 }
 0x223   : > { %v7275_v3 = vpop.eup %7274  ;;  %7294 = vpow2.f32 %v6331_v51  ;;  %1488 = vmatmul.mubr.bf16.gmra.mrb[128].mxu1 %v8890_v54  ;;  %v3747_v4 = vmul.f32 %v7273_v0, %v9020_v28  ;;  %4637 = vmatmul.mubr.bf16.gmra.mrb[100].mxu0 %v4118_v35 }
 0x224   : > { %v7277_v12 = vpop.eup %7276  ;;  %7296 = vpow2.f32 %v6332_v36  ;;  %v3938_v43 = vmul.f32 %v3746_v53, %v9054_v2  ;;  %v3750_v27 = vmul.f32 %v7275_v3, %v9023_v19  ;;  %1497 = vmatprep.mubr.bf16.mxu1 %v8892_v55  ;;  %2336 = vmatpush1.bf16.msra.mxu1 %v7171_v47 }
 0x225   : > { %v7279_v23 = vpop.eup %7278  ;;  %7298 = vpow2.f32 %v6335_v41  ;;  %v3939_v54 = vmul.f32 %v3747_v4, %v9058_v9  ;;  %v3751_v28 = vmul.f32 %v7277_v12, %v9027_v24 }
 0x226   : > { %v7281_v31 = vpop.eup %7280  ;;  %v3186_v62 = vadd.f32 1.0, %v7279_v23  ;;  %7300 = vpow2.f32 %v6336_v34  ;;  %v3942_v2 = vmul.f32 %v3750_v27, %v9064_v30  ;;  %v9139_v29 = vpop.f32.mrb[24].mxu1 }
 0x227   : > { %v7283_v55 = vpop.eup %7282  ;;  %v3187_v19 = vadd.f32 1.0, %v7281_v31  ;;  %v3943_v45 = vmul.f32 %v3751_v28, %v9070_v25  ;;  %v9142_v49 = vpop.f32.mrb[25].mxu1  ;;  %v6339_v24 = vmul.f32 -1.442695, %v9139_v29 }
 0x228   : > { %v7285_v10 = vpop.eup %7284  ;;  %7302 = vrcp.f32 %v3186_v62  ;;  %v3190_v9 = vadd.f32 1.0, %v7283_v55  ;;  %v4122_v39 = vpack.c.bf16 %v3942_v2, %v3938_v43  ;;  %v9145_v50 = vpop.f32.mrb[26].mxu1  ;;  %v6340_v51 = vmul.f32 -1.442695, %v9142_v49 }
 0x229   : > { %v7287_v46 = vpop.eup %7286  ;;  %7304 = vrcp.f32 %v3187_v19  ;;  %v3191_v30 = vadd.f32 1.0, %v7285_v10  ;;  %v4123_v35 = vpack.c.bf16 %v3943_v45, %v3939_v54  ;;  %v9148_v8 = vpop.f32.mrb[27].mxu1  ;;  %v6343_v36 = vmul.f32 -1.442695, %v9145_v50 }
 0x22a   : > { %v9150_v25 = vpop.f32.mrb[20].mxu0  ;;  %v7289_v56 = vpop.eup %7288  ;;  %7306 = vrcp.f32 %v3190_v9  ;;  %v3754_v15 = vmul.f32 %v7287_v46, %v9042_v44  ;;  %v6344_v33 = vmul.f32 -1.442695, %v9148_v8 }
 0x22b   : > { %v9154_v40 = vpop.f32.mrb[21].mxu0  ;;  %v7291_v41 = vpop.eup %7290  ;;  %7308 = vrcp.f32 %v3191_v30  ;;  %4646 = vmatprep.mubr.bf16.mxu0 %v4123_v35  ;;  %1498 = vmatmul.mubr.bf16.gmra.mrb[132].mxu1 %v8904_v61  ;;  %v3755_v0 = vmul.f32 %v7289_v56, %v9045_v20 }
 0x22c   : > { %v9159_v34 = vpop.f32.mrb[22].mxu0  ;;  %v7293_v53 = vpop.eup %7292  ;;  %7310 = vpow2.f32 %v6339_v24  ;;  %v3946_v3 = vmul.f32 %v3754_v15, %v9086_v57  ;;  %4647 = vmatmul.mubr.bf16.gmra.mrb[104].mxu0 %v4122_v39  ;;  %v3758_v44 = vmul.f32 %v7291_v41, %v9048_v52  ;;  %1507 = vmatprep.mubr.bf16.mxu1 %v8907_v63 }
 0x22d   : > { %v9164_v4 = vpop.f32.mrb[23].mxu0  ;;  %v7295_v12 = vpop.eup %7294  ;;  %7312 = vpow2.f32 %v6340_v51  ;;  %v3947_v43 = vmul.f32 %v3755_v0, %v9090_v7  ;;  %v3759_v61 = vmul.f32 %v7293_v53, %v9051_v59 }
 0x22e   : > { %v7297_v20 = vpop.eup %7296  ;;  %v3194_v27 = vadd.f32 1.0, %v7295_v12  ;;  %7314 = vpow2.f32 %v6343_v36  ;;  %v3950_v21 = vmul.f32 %v3758_v44, %v9095_v17  ;;  %v9169_v23 = vpop.f32.mrb[28].mxu1 }
 0x22f   : > { %v7299_v57 = vpop.eup %7298  ;;  %v3195_v54 = vadd.f32 1.0, %v7297_v20  ;;  %7316 = vpow2.f32 %v6344_v33  ;;  %v3951_v63 = vmul.f32 %v3759_v61, %v9101_v1  ;;  %v9172_v52 = vpop.f32.mrb[29].mxu1  ;;  %v6347_v59 = vmul.f32 -1.442695, %v9169_v23 }
 0x230   : > { %v7301_v28 = vpop.eup %7300  ;;  %7318 = vrcp.f32 %v3194_v27  ;;  %v3198_v47 = vadd.f32 1.0, %v7299_v57  ;;  %v4126_v7 = vpack.c.bf16 %v3950_v21, %v3946_v3  ;;  %v9175_v31 = vpop.f32.mrb[30].mxu1  ;;  %v6348_v2 = vmul.f32 -1.442695, %v9172_v52 }
 0x231   : > { %7320 = vrcp.f32 %v3195_v54  ;;  %v3199_v62 = vadd.f32 1.0, %v7301_v28  ;;  %v4127_v17 = vpack.c.bf16 %v3951_v63, %v3947_v43  ;;  %v9178_v55 = vpop.f32.mrb[31].mxu1  ;;  %v9180_v19 = vpop.f32.mrb[24].mxu0  ;;  %v6351_v45 = vmul.f32 -1.442695, %v9175_v31 }
 0x232   : > { %v7303_v1 = vpop.eup %7302  ;;  %7322 = vrcp.f32 %v3198_v47  ;;  %v9183_v10 = vpop.f32.mrb[25].mxu0  ;;  %v6352_v39 = vmul.f32 -1.442695, %v9178_v55 }
 0x233   : > { %v7305_v9 = vpop.eup %7304  ;;  %7324 = vrcp.f32 %v3199_v62  ;;  %v3762_v24 = vmul.f32 %v7303_v1, %v9074_v16  ;;  %4656 = vmatprep.mubr.bf16.mxu0 %v4127_v17  ;;  %1508 = vmatmul.mubr.bf16.gmra.mrb[136].mxu1 %v8916_v5  ;;  %v9188_v46 = vpop.f32.mrb[26].mxu0 }
 0x234   : > { %v7307_v30 = vpop.eup %7306  ;;  %7326 = vpow2.f32 %v6347_v59  ;;  %v3763_v35 = vmul.f32 %v7305_v9, %v9077_v38  ;;  %4657 = vmatmul.mubr.bf16.gmra.mrb[108].mxu0 %v4126_v7  ;;  %1517 = vmatprep.mubr.bf16.mxu1 %v8919_v6  ;;  %v9192_v51 = vpop.f32.mrb[27].mxu0 }
 0x235   : > { %v7309_v56 = vpop.eup %7308  ;;  %7328 = vpow2.f32 %v6348_v2  ;;  %v3954_v36 = vmul.f32 %v3762_v24, %v9118_v58  ;;  %v3766_v16 = vmul.f32 %v7307_v30, %v9080_v48  ;;  %v9209_v20 = vpop.f32.mrb[28].mxu0 }
 0x236   : > { %v7311_v15 = vpop.eup %7310  ;;  %7330 = vpow2.f32 %v6351_v45  ;;  %v3955_v5 = vmul.f32 %v3763_v35, %v9123_v60  ;;  %v3767_v41 = vmul.f32 %v7309_v56, %v9083_v22  ;;  %v9198_v33 = vpop.f32.mrb[32].mxu1 }
 0x237   : > { %v7313_v38 = vpop.eup %7312  ;;  %v3202_v0 = vadd.f32 1.0, %v7311_v15  ;;  %7332 = vpow2.f32 %v6352_v39  ;;  %v3958_v6 = vmul.f32 %v3766_v16, %v9127_v11  ;;  %v9201_v53 = vpop.f32.mrb[33].mxu1  ;;  %v6355_v22 = vmul.f32 -1.442695, %v9198_v33 }
 0x238   : > { %v7315_v3 = vpop.eup %7314  ;;  %v3203_v44 = vadd.f32 1.0, %v7313_v38  ;;  %v3959_v58 = vmul.f32 %v3767_v41, %v9132_v18  ;;  %v9204_v48 = vpop.f32.mrb[34].mxu1  ;;  %v6356_v57 = vmul.f32 -1.442695, %v9201_v53 }
 0x239   : > { %v7317_v12 = vpop.eup %7316  ;;  %7334 = vrcp.f32 %v3202_v0  ;;  %v3206_v60 = vadd.f32 1.0, %v7315_v3  ;;  %v4130_v43 = vpack.c.bf16 %v3958_v6, %v3954_v36  ;;  %v9207_v61 = vpop.f32.mrb[35].mxu1  ;;  %v6359_v63 = vmul.f32 -1.442695, %v9204_v48  ;;  %v7991_v3 = vld [vmem:[#allocation3 + $0xc0] ss:$8 sps:$4 sm:$0xff]  }
 0x23a   : > { %v7319_v27 = vpop.eup %7318  ;;  %7336 = vrcp.f32 %v3203_v44  ;;  %v3207_v11 = vadd.f32 1.0, %v7317_v12  ;;  %v4131_v21 = vpack.c.bf16 %v3959_v58, %v3955_v5  ;;  %v9212_v54 = vpop.f32.mrb[29].mxu0  ;;  %v6360_v59 = vmul.f32 -1.442695, %v9207_v61 }
 0x23b   : > { %v7321_v18 = vpop.eup %7320  ;;  %7338 = vrcp.f32 %v3206_v60  ;;  %v3770_v28 = vmul.f32 %v7319_v27, %v9106_v26  ;;  %1518 = vmatmul.mubr.bf16.gmra.mrb[140].mxu1 %v8928_v13  ;;  %v9217_v47 = vpop.f32.mrb[30].mxu0 }
 0x23c   : > { %v7323_v7 = vpop.eup %7322  ;;  %7340 = vrcp.f32 %v3207_v11  ;;  %4666 = vmatprep.mubr.bf16.mxu0 %v4131_v21  ;;  %v3771_v62 = vmul.f32 %v7321_v18, %v9109_v32  ;;  %1527 = vmatprep.mubr.bf16.mxu1 %v8931_v14  ;;  %v9222_v17 = vpop.f32.mrb[31].mxu0 }
 0x23d   : > { %v7325_v2 = vpop.eup %7324  ;;  %7342 = vpow2.f32 %v6355_v22  ;;  %v3962_v1 = vmul.f32 %v3770_v28, %v9150_v25  ;;  %4667 = vmatmul.mubr.bf16.gmra.mrb[112].mxu0 %v4130_v43  ;;  %v3774_v13 = vmul.f32 %v7323_v7, %v9112_v37  ;;  %v9239_v5 = vpop.f32.mrb[32].mxu0  ;;  %v7992_v43 = vld [vmem:[#allocation3 + $0xd4] ss:$8 sps:$4 sm:$0xff]  }
 0x23e   : > { %v7327_v26 = vpop.eup %7326  ;;  %7344 = vpow2.f32 %v6356_v57  ;;  %v3963_v45 = vmul.f32 %v3771_v62, %v9154_v40  ;;  %v3775_v9 = vmul.f32 %v7325_v2, %v9116_v42  ;;  %v9228_v39 = vpop.f32.mrb[36].mxu1 }
 0x23f   : > { %v7329_v32 = vpop.eup %7328  ;;  %v3210_v24 = vadd.f32 1.0, %v7327_v26  ;;  %7346 = vpow2.f32 %v6359_v63  ;;  %v3966_v14 = vmul.f32 %v3774_v13, %v9159_v34  ;;  %v9231_v30 = vpop.f32.mrb[37].mxu1  ;;  %v6363_v16 = vmul.f32 -1.442695, %v9228_v39 }
 0x240   : > { %v7331_v35 = vpop.eup %7330  ;;  %v3211_v25 = vadd.f32 1.0, %v7329_v32  ;;  %7348 = vpow2.f32 %v6360_v59  ;;  %v3967_v37 = vmul.f32 %v3775_v9, %v9164_v4  ;;  %v9234_v56 = vpop.f32.mrb[38].mxu1  ;;  %v6364_v38 = vmul.f32 -1.442695, %v9231_v30 }
 0x241   : > { %v7333_v36 = vpop.eup %7332  ;;  %7350 = vrcp.f32 %v3210_v24  ;;  %v3214_v40 = vadd.f32 1.0, %v7331_v35  ;;  %v4134_v42 = vpack.c.bf16 %v3966_v14, %v3962_v1  ;;  %v9237_v15 = vpop.f32.mrb[39].mxu1  ;;  %v6367_v6 = vmul.f32 -1.442695, %v9234_v56 }
 0x242   : > { %7352 = vrcp.f32 %v3211_v25  ;;  %v3215_v34 = vadd.f32 1.0, %v7333_v36  ;;  %v4135_v41 = vpack.c.bf16 %v3967_v37, %v3963_v45  ;;  %v9242_v0 = vpop.f32.mrb[33].mxu0  ;;  %v6368_v12 = vmul.f32 -1.442695, %v9237_v15 }
 0x243   : > { %v7335_v4 = vpop.eup %7334  ;;  %7354 = vrcp.f32 %v3214_v40  ;;  %1528 = vmatmul.mubr.bf16.gmra.mrb[144].mxu1 %v7991_v3  ;;  %v9245_v44 = vpop.f32.mrb[34].mxu0 }
 0x244   : > { %v7337_v58 = vpop.eup %7336  ;;  %7356 = vrcp.f32 %v3215_v34  ;;  %v3778_v60 = vmul.f32 %v7335_v4, %v9139_v29  ;;  %4676 = vmatprep.mubr.bf16.mxu0 %v4135_v41  ;;  %1537 = vmatprep.mubr.bf16.mxu1 %v7992_v43  ;;  %v9249_v22 = vpop.f32.mrb[35].mxu0  ;;  %v7994_v34 = vld [vmem:[#allocation3 + $0xe4] ss:$8 sps:$4 sm:$0xff]  }
 0x245   : > { %v7339_v27 = vpop.eup %7338  ;;  %7358 = vpow2.f32 %v6363_v16  ;;  %v3779_v11 = vmul.f32 %v7337_v58, %v9142_v49  ;;  %4677 = vmatmul.mubr.bf16.gmra.mrb[116].mxu0 %v4134_v42 }
 0x246   : > { %v7341_v21 = vpop.eup %7340  ;;  %7360 = vpow2.f32 %v6364_v38  ;;  %v3970_v57 = vmul.f32 %v3778_v60, %v9180_v19  ;;  %v3782_v18 = vmul.f32 %v7339_v27, %v9145_v50  ;;  %v9254_v63 = vpop.f32.mrb[40].mxu1 }
 0x247   : > { %v7343_v28 = vpop.eup %7342  ;;  %7362 = vpow2.f32 %v6367_v6  ;;  %v3971_v29 = vmul.f32 %v3779_v11, %v9183_v10  ;;  %v3783_v7 = vmul.f32 %v7341_v21, %v9148_v8  ;;  %v6371_v59 = vmul.f32 -1.442695, %v9254_v63  ;;  %v9259_v62 = vpop.f32.mrb[41].mxu1 }
 0x248   : > { %v7345_v49 = vpop.eup %7344  ;;  %v3218_v2 = vadd.f32 1.0, %v7343_v28  ;;  %7364 = vpow2.f32 %v6368_v12  ;;  %v3974_v1 = vmul.f32 %v3782_v18, %v9188_v46  ;;  %v9262_v19 = vpop.f32.mrb[42].mxu1  ;;  %v6372_v24 = vmul.f32 -1.442695, %v9259_v62 }
 0x249   : > { %v7347_v50 = vpop.eup %7346  ;;  %v3219_v13 = vadd.f32 1.0, %v7345_v49  ;;  %v3975_v26 = vmul.f32 %v3783_v7, %v9192_v51  ;;  %7366 = vpow2.f32 %v6371_v59  ;;  %v9265_v45 = vpop.f32.mrb[43].mxu1  ;;  %v6375_v37 = vmul.f32 -1.442695, %v9262_v19  ;;  %v7993_v51 = vld [vmem:[#allocation3 + $0xd0] ss:$8 sps:$4 sm:$0xff]  }
 0x24a   : > { %v9267_v10 = vpop.f32.mrb[36].mxu0  ;;  %v7349_v8 = vpop.eup %7348  ;;  %7368 = vrcp.f32 %v3218_v2  ;;  %v3222_v9 = vadd.f32 1.0, %v7347_v50  ;;  %v4138_v32 = vpack.c.bf16 %v3974_v1, %v3970_v57  ;;  %v6376_v42 = vmul.f32 -1.442695, %v9265_v45 }
 0x24b   : > { %v9270_v14 = vpop.f32.mrb[37].mxu0  ;;  %v7351_v46 = vpop.eup %7350  ;;  %7370 = vrcp.f32 %v3219_v13  ;;  %v3223_v35 = vadd.f32 1.0, %v7349_v8  ;;  %v4139_v25 = vpack.c.bf16 %v3975_v26, %v3971_v29  ;;  %1538 = vmatmul.mubr.bf16.gmra.mrb[148].mxu1 %v7993_v51  ;;  %v7995_v13 = vld [vmem:[#allocation3 + $0xe0] ss:$8 sps:$4 sm:$0xff]  }
 0x24c   : > { %v9273_v36 = vpop.f32.mrb[38].mxu0  ;;  %v7353_v40 = vpop.eup %7352  ;;  %7372 = vrcp.f32 %v3222_v9  ;;  %v3786_v16 = vmul.f32 %v7351_v46, %v9169_v23  ;;  %1547 = vmatprep.mubr.bf16.mxu1 %v7994_v34 }
 0x24d   : > { %v9277_v41 = vpop.f32.mrb[39].mxu0  ;;  %v7355_v38 = vpop.eup %7354  ;;  %7374 = vrcp.f32 %v3223_v35  ;;  %4686 = vmatprep.mubr.bf16.mxu0 %v4139_v25  ;;  %v3787_v4 = vmul.f32 %v7353_v40, %v9172_v52 }
 0x24e   : > { %v7357_v6 = vpop.eup %7356  ;;  %7376 = vpow2.f32 %v6372_v24  ;;  %v3978_v3 = vmul.f32 %v3786_v16, %v9209_v20  ;;  %4687 = vmatmul.mubr.bf16.gmra.mrb[120].mxu0 %v4138_v32  ;;  %v3790_v58 = vmul.f32 %v7355_v38, %v9175_v31  ;;  %v9282_v12 = vpop.f32.mrb[44].mxu1  ;;  %v7996_v32 = vld [vmem:[#allocation3 + $0xf4] ss:$8 sps:$4 sm:$0xff]  }
 0x24f   : > { %v7359_v60 = vpop.eup %7358  ;;  %7378 = vpow2.f32 %v6375_v37  ;;  %v3979_v23 = vmul.f32 %v3787_v4, %v9212_v54  ;;  %v3791_v43 = vmul.f32 %v7357_v6, %v9178_v55  ;;  %v6379_v27 = vmul.f32 -1.442695, %v9282_v12  ;;  %v9287_v11 = vpop.f32.mrb[45].mxu1 }
 0x250   : > { %v7361_v52 = vpop.eup %7360  ;;  %v3226_v21 = vadd.f32 1.0, %v7359_v60  ;;  %7380 = vpow2.f32 %v6376_v42  ;;  %v3982_v20 = vmul.f32 %v3790_v58, %v9217_v47  ;;  %v9290_v57 = vpop.f32.mrb[46].mxu1  ;;  %v6380_v50 = vmul.f32 -1.442695, %v9287_v11 }
 0x251   : > { %v7363_v31 = vpop.eup %7362  ;;  %v3227_v18 = vadd.f32 1.0, %v7361_v52  ;;  %v3983_v28 = vmul.f32 %v3791_v43, %v9222_v17  ;;  %7382 = vpow2.f32 %v6379_v27  ;;  %v9293_v29 = vpop.f32.mrb[47].mxu1  ;;  %v6383_v9 = vmul.f32 -1.442695, %v9290_v57 }
 0x252   : > { %v9295_v54 = vpop.f32.mrb[40].mxu0  ;;  %v7365_v55 = vpop.eup %7364  ;;  %7384 = vrcp.f32 %v3226_v21  ;;  %v3230_v7 = vadd.f32 1.0, %v7363_v31  ;;  %v4142_v59 = vpack.c.bf16 %v3982_v20, %v3978_v3  ;;  %v6384_v25 = vmul.f32 -1.442695, %v9293_v29 }
 0x253   : > { %v9297_v49 = vpop.f32.mrb[41].mxu0  ;;  %v7367_v2 = vpop.eup %7366  ;;  %7386 = vrcp.f32 %v3227_v18  ;;  %v3231_v47 = vadd.f32 1.0, %v7365_v55  ;;  %v4143_v1 = vpack.c.bf16 %v3983_v28, %v3979_v23  ;;  %1548 = vmatmul.mubr.bf16.gmra.mrb[152].mxu1 %v7995_v13  ;;  %v7997_v18 = vld [vmem:[#allocation3 + $0xf0] ss:$8 sps:$4 sm:$0xff]  }
 0x254   : > { %v9300_v17 = vpop.f32.mrb[42].mxu0  ;;  %v7369_v26 = vpop.eup %7368  ;;  %7388 = vrcp.f32 %v3230_v7  ;;  %v3234_v8 = vadd.f32 1.0, %v7367_v2  ;;  %1557 = vmatprep.mubr.bf16.mxu1 %v7996_v32 }
 0x255   : > { %v9303_v24 = vpop.f32.mrb[43].mxu0  ;;  %v7371_v46 = vpop.eup %7370  ;;  %v3794_v35 = vmul.f32 %v7369_v26, %v9198_v33  ;;  %7390 = vrcp.f32 %v3231_v47  ;;  %4696 = vmatprep.mubr.bf16.mxu0 %v4143_v1 }
 0x256   : > { %v7373_v37 = vpop.eup %7372  ;;  %v3795_v51 = vmul.f32 %v7371_v46, %v9201_v53  ;;  %7392 = vrcp.f32 %v3234_v8  ;;  %4697 = vmatmul.mubr.bf16.gmra.mrb[124].mxu0 %v4142_v59  ;;  %v9308_v40 = vpop.f32.mrb[48].mxu1 }
 0x257   : > { %v7375_v42 = vpop.eup %7374  ;;  %v3798_v16 = vmul.f32 %v7373_v37, %v9204_v48  ;;  %7394 = vpow2.f32 %v6380_v50  ;;  %v3986_v34 = vmul.f32 %v3794_v35, %v9239_v5  ;;  %v6387_v38 = vmul.f32 -1.442695, %v9308_v40  ;;  %v9313_v33 = vpop.f32.mrb[49].mxu1 }
 0x258   : > { %v7377_v4 = vpop.eup %7376  ;;  %v3799_v6 = vmul.f32 %v7375_v42, %v9207_v61  ;;  %7396 = vpow2.f32 %v6383_v9  ;;  %v3987_v53 = vmul.f32 %v3795_v51, %v9242_v0  ;;  %v9317_v3 = vpop.f32.mrb[50].mxu1  ;;  %v6388_v31 = vmul.f32 -1.442695, %v9313_v33 }
 0x259   : > { %v7379_v58 = vpop.eup %7378  ;;  %v3235_v60 = vadd.f32 1.0, %v7377_v4  ;;  %7398 = vpow2.f32 %v6384_v25  ;;  %v3990_v48 = vmul.f32 %v3798_v16, %v9245_v44  ;;  %v9320_v23 = vpop.f32.mrb[51].mxu1  ;;  %v6391_v59 = vmul.f32 -1.442695, %v9317_v3  ;;  %v7174_v25 = vld [vmem:[%s8627_s15 + $0x100] ss:$8 sps:$4 sm:$0xff]  }
 0x25a   : > { %v9322_v5 = vpop.f32.mrb[44].mxu0  ;;  %v7381_v43 = vpop.eup %7380  ;;  %v3238_v27 = vadd.f32 1.0, %v7379_v58  ;;  %v3991_v52 = vmul.f32 %v3799_v6, %v9249_v22  ;;  %7400 = vpow2.f32 %v6387_v38  ;;  %v7998_v22 = vld [vmem:[#allocation3 + $0x104] ss:$8 sps:$4 sm:$0xff]   ;;  %v6392_v50 = vmul.f32 -1.442695, %v9320_v23 }
 0x25b   : > { %v9325_v61 = vpop.f32.mrb[45].mxu0  ;;  %v7383_v21 = vpop.eup %7382  ;;  %7402 = vrcp.f32 %v3235_v60  ;;  %v3239_v0 = vadd.f32 1.0, %v7381_v43  ;;  %v4146_v20 = vpack.c.bf16 %v3990_v48, %v3986_v34  ;;  %1558 = vmatmul.mubr.bf16.gmra.mrb[156].mxu1 %v7997_v18 }
 0x25c   : > { %v9328_v44 = vpop.f32.mrb[46].mxu0  ;;  %v7385_v28 = vpop.eup %7384  ;;  %7404 = vrcp.f32 %v3238_v27  ;;  %v3242_v55 = vadd.f32 1.0, %v7383_v21  ;;  %v4147_v7 = vpack.c.bf16 %v3991_v52, %v3987_v53  ;;  %1567 = vmatprep.mubr.bf16.mxu1 %v7998_v22 }
 0x25d   : > { %v9331_v2 = vpop.f32.mrb[47].mxu0  ;;  %v7387_v47 = vpop.eup %7386  ;;  %v3802_v1 = vmul.f32 %v7385_v28, %v9228_v39  ;;  %7406 = vrcp.f32 %v3239_v0 }
 0x25e   : > { %v7389_v13 = vpop.eup %7388  ;;  %v3803_v26 = vmul.f32 %v7387_v47, %v9231_v30  ;;  %7408 = vrcp.f32 %v3242_v55  ;;  %4706 = vmatprep.mubr.bf16.mxu0 %v4147_v7  ;;  %v9336_v8 = vpop.f32.mrb[52].mxu1 }
 0x25f   : > { %v7391_v9 = vpop.eup %7390  ;;  %v3806_v32 = vmul.f32 %v7389_v13, %v9234_v56  ;;  %7410 = vpow2.f32 %v6388_v31  ;;  %v3994_v46 = vmul.f32 %v3802_v1, %v9267_v10  ;;  %4707 = vmatmul.mubr.bf16.gmra.mrb[128].mxu0 %v4146_v20  ;;  %v6395_v39 = vmul.f32 -1.442695, %v9336_v8  ;;  %v9341_v35 = vpop.f32.mrb[53].mxu1  ;;  %v7176_v56 = vld [vmem:[%s8627_s15 + $0x104] ss:$8 sps:$4 sm:$0xff]  }
 0x260   : > { %v7393_v37 = vpop.eup %7392  ;;  %v3807_v30 = vmul.f32 %v7391_v9, %v9237_v15  ;;  %7412 = vpow2.f32 %v6391_v59  ;;  %v3995_v51 = vmul.f32 %v3803_v26, %v9270_v14  ;;  %v6396_v42 = vmul.f32 -1.442695, %v9341_v35  ;;  %v9347_v16 = vpop.f32.mrb[54].mxu1  ;;  %4867 = vmatprep.subr.bf16.mxu0 %v7176_v56  ;;  %v8000_v20 = vld [vmem:[#allocation3 + $0x114] ss:$8 sps:$4 sm:$0xff]  }
 0x261   : > { %v7395_v34 = vpop.eup %7394  ;;  %v3810_v10 = vmul.f32 %v7393_v37, %v9254_v63  ;;  %7414 = vpow2.f32 %v6392_v50  ;;  %v3998_v38 = vmul.f32 %v3806_v32, %v9273_v36  ;;  %v9352_v4 = vpop.f32.mrb[55].mxu1  ;;  %v7999_v36 = vld [vmem:[#allocation3 + $0x100] ss:$8 sps:$4 sm:$0xff]   ;;  %4868 = vmatpush1.bf16.msra.mxu0 %v7174_v25  ;;  %v6399_v0 = vmul.f32 -1.442695, %v9347_v16 }
 0x262   : > { %v9354_v6 = vpop.f32.mrb[48].mxu0  ;;  %v7397_v53 = vpop.eup %7396  ;;  %v3243_v15 = vadd.f32 1.0, %v7395_v34  ;;  %v3999_v58 = vmul.f32 %v3807_v30, %v9277_v41  ;;  %7416 = vpow2.f32 %v6395_v39 }
 0x263   : > { %v9357_v14 = vpop.f32.mrb[49].mxu0  ;;  %v7399_v60 = vpop.eup %7398  ;;  %v3246_v48 = vadd.f32 1.0, %v7397_v53  ;;  %v4150_v43 = vpack.c.bf16 %v3998_v38, %v3994_v46  ;;  %7418 = vpow2.f32 %v6396_v42  ;;  %v9360_v63 = vmul.f32 %v3810_v10, %v9295_v54  ;;  %1568 = vmatmul.mubr.bf16.gmra.mrb[160].mxu1 %v7999_v36  ;;  %v7177_v42 = vld [vmem:[%s8627_s15 + $0x110] ss:$8 sps:$4 sm:$0xff]   ;;  %v7179_v53 = vld [vmem:[%s8627_s15 + $0x114] ss:$8 sps:$4 sm:$0xff]  }
 0x264   : > { %v9362_v27 = vpop.f32.mrb[50].mxu0  ;;  %v7401_v52 = vpop.eup %7400  ;;  %7420 = vrcp.f32 %v3243_v15  ;;  %v3247_v21 = vadd.f32 1.0, %v7399_v60  ;;  %v4151_v41 = vpack.c.bf16 %v3999_v58, %v3995_v51  ;;  %1577 = vmatprep.mubr.bf16.mxu1 %v8000_v20  ;;  %v6400_v54 = vmul.f32 -1.442695, %v9352_v4  ;;  %v8001_v10 = vld [vmem:[#allocation3 + $0x110] ss:$8 sps:$4 sm:$0xff]   ;;  %4869 = vmatprep.subr.bf16.mxu0 %v7179_v53 }
 0x265   : > { %v9365_v31 = vpop.f32.mrb[51].mxu0  ;;  %v7403_v18 = vpop.eup %7402  ;;  %7422 = vrcp.f32 %v3246_v48  ;;  %v3250_v28 = vadd.f32 1.0, %v7401_v52  ;;  %v8002_v60 = vld [vmem:[#allocation3 + $0x124] ss:$8 sps:$4 sm:$0xff]   ;;  %4870 = vmatpush1.bf16.msra.mxu0 %v7177_v42  ;;  %v8004_v42 = vld [vmem:[#allocation3 + $0x134] ss:$8 sps:$4 sm:$0xff]  }
 0x266   : > { %v7405_v55 = vpop.eup %7404  ;;  %v3811_v7 = vmul.f32 %v7403_v18, %v9259_v62  ;;  %7424 = vrcp.f32 %v3247_v21  ;;  %4716 = vmatprep.mubr.bf16.mxu0 %v4151_v41  ;;  %v9369_v59 = vpop.f32.mrb[56].mxu1 }
 0x267   : > { %v7407_v22 = vpop.eup %7406  ;;  %v3814_v47 = vmul.f32 %v7405_v55, %v9262_v19  ;;  %7426 = vrcp.f32 %v3250_v28  ;;  %4717 = vmatmul.mubr.bf16.gmra.mrb[132].mxu0 %v4150_v43  ;;  %v6403_v1 = vmul.f32 -1.442695, %v9369_v59  ;;  %v9373_v50 = vpop.f32.mrb[57].mxu1 }
 0x268   : > { %v7409_v13 = vpop.eup %7408  ;;  %v3815_v26 = vmul.f32 %v7407_v22, %v9265_v45  ;;  %7428 = vpow2.f32 %v6399_v0  ;;  %v4003_v62 = vmul.f32 %v3811_v7, %v9297_v49  ;;  %v6404_v9 = vmul.f32 -1.442695, %v9373_v50  ;;  %v9378_v32 = vpop.f32.mrb[58].mxu1 }
 0x269   : > { %v7411_v46 = vpop.eup %7410  ;;  %v3818_v19 = vmul.f32 %v7409_v13, %v9282_v12  ;;  %7430 = vpow2.f32 %v6400_v54  ;;  %v4006_v39 = vmul.f32 %v3814_v47, %v9300_v17  ;;  %v9382_v25 = vpop.f32.mrb[59].mxu1  ;;  %v6407_v36 = vmul.f32 -1.442695, %v9378_v32 }
 0x26a   : > { %v9384_v37 = vpop.f32.mrb[52].mxu0  ;;  %v7413_v45 = vpop.eup %7412  ;;  %v3251_v30 = vadd.f32 1.0, %v7411_v46  ;;  %v4007_v51 = vmul.f32 %v3815_v26, %v9303_v24  ;;  %7432 = vpow2.f32 %v6403_v1  ;;  %v6408_v21 = vmul.f32 -1.442695, %v9382_v25 }
 0x26b   : > { %v9387_v49 = vpop.f32.mrb[53].mxu0  ;;  %v7415_v56 = vpop.eup %7414  ;;  %v3254_v34 = vadd.f32 1.0, %v7413_v45  ;;  %v4154_v12 = vpack.c.bf16 %v4006_v39, %v9360_v63  ;;  %7434 = vpow2.f32 %v6404_v9  ;;  %v9392_v17 = vmul.f32 %v3818_v19, %v9322_v5  ;;  %1578 = vmatmul.mubr.bf16.gmra.mrb[164].mxu1 %v8001_v10 }
 0x26c   : > { %v9394_v38 = vpop.f32.mrb[54].mxu0  ;;  %v7417_v15 = vpop.eup %7416  ;;  %7436 = vrcp.f32 %v3251_v30  ;;  %v3255_v24 = vadd.f32 1.0, %v7415_v56  ;;  %v4155_v58 = vpack.c.bf16 %v4007_v51, %v4003_v62  ;;  %1587 = vmatprep.mubr.bf16.mxu1 %v8002_v60 }
 0x26d   : > { %v9397_v48 = vpop.f32.mrb[55].mxu0  ;;  %v7419_v43 = vpop.eup %7418  ;;  %7438 = vrcp.f32 %v3254_v34  ;;  %v3258_v63 = vadd.f32 1.0, %v7417_v15  ;;  %v7180_v34 = vld [vmem:[%s8627_s15 + $0x120] ss:$8 sps:$4 sm:$0xff]  }
 0x26e   : > { %v7421_v5 = vpop.eup %7420  ;;  %7440 = vrcp.f32 %v3255_v24  ;;  %v3259_v52 = vadd.f32 1.0, %v7419_v43  ;;  %4726 = vmatprep.mubr.bf16.mxu0 %v4155_v58  ;;  %v9401_v41 = vpop.f32.mrb[60].mxu1 }
 0x26f   : > { %v7423_v0 = vpop.eup %7422  ;;  %v3819_v20 = vmul.f32 %v7421_v5, %v9287_v11  ;;  %7442 = vrcp.f32 %v3258_v63  ;;  %4727 = vmatmul.mubr.bf16.gmra.mrb[136].mxu0 %v4154_v12  ;;  %v6411_v18 = vmul.f32 -1.442695, %v9401_v41  ;;  %v9405_v28 = vpop.f32.mrb[61].mxu1  ;;  %v7182_v12 = vld [vmem:[%s8627_s15 + $0x124] ss:$8 sps:$4 sm:$0xff]  }
 0x270   : > { %v7425_v54 = vpop.eup %7424  ;;  %v3822_v55 = vmul.f32 %v7423_v0, %v9290_v57  ;;  %7444 = vrcp.f32 %v3259_v52  ;;  %v6412_v7 = vmul.f32 -1.442695, %v9405_v28  ;;  %v9409_v22 = vpop.f32.mrb[62].mxu1  ;;  %4871 = vmatprep.subr.bf16.mxu0 %v7182_v12 }
 0x271   : > { %v7427_v47 = vpop.eup %7426  ;;  %v3823_v1 = vmul.f32 %v7425_v54, %v9293_v29  ;;  %7446 = vpow2.f32 %v6407_v36  ;;  %v4011_v11 = vmul.f32 %v3819_v20, %v9325_v61  ;;  %v9413_v13 = vpop.f32.mrb[63].mxu1  ;;  %v8003_v61 = vld [vmem:[#allocation3 + $0x120] ss:$8 sps:$4 sm:$0xff]   ;;  %v6415_v15 = vmul.f32 -1.442695, %v9409_v22  ;;  %4872 = vmatpush1.bf16.msra.mxu0 %v7180_v34 }
 0x272   : > { %v9415_v26 = vpop.f32.mrb[56].mxu0  ;;  %v7429_v62 = vpop.eup %7428  ;;  %v3826_v9 = vmul.f32 %v7427_v47, %v9308_v40  ;;  %7448 = vpow2.f32 %v6408_v21  ;;  %v4014_v57 = vmul.f32 %v3822_v55, %v9328_v44 }
 0x273   : > { %v9419_v46 = vpop.f32.mrb[57].mxu0  ;;  %v7431_v19 = vpop.eup %7430  ;;  %v3262_v39 = vadd.f32 1.0, %v7429_v62  ;;  %v4015_v29 = vmul.f32 %v3823_v1, %v9331_v2  ;;  %7450 = vpow2.f32 %v6411_v18  ;;  %1588 = vmatmul.mubr.bf16.gmra.mrb[168].mxu1 %v8003_v61 }
 0x274   : > { %v9422_v45 = vpop.f32.mrb[58].mxu0  ;;  %v7433_v30 = vpop.eup %7432  ;;  %v3263_v51 = vadd.f32 1.0, %v7431_v19  ;;  %v4158_v40 = vpack.c.bf16 %v4014_v57, %v9392_v17  ;;  %7452 = vpow2.f32 %v6412_v7  ;;  %v9426_v44 = vmul.f32 %v3826_v9, %v9354_v6  ;;  %1597 = vmatprep.mubr.bf16.mxu1 %v8004_v42 }
 0x275   : > { %v9428_v56 = vpop.f32.mrb[59].mxu0  ;;  %v7435_v2 = vpop.eup %7434  ;;  %7454 = vrcp.f32 %v3262_v39  ;;  %v3266_v10 = vadd.f32 1.0, %v7433_v30  ;;  %v4159_v53 = vpack.c.bf16 %v4015_v29, %v4011_v11  ;;  %v6416_v17 = vmul.f32 -1.442695, %v9413_v13 }
 0x276   : > { %v7437_v24 = vpop.eup %7436  ;;  %7456 = vrcp.f32 %v3263_v51  ;;  %v3267_v58 = vadd.f32 1.0, %v7435_v2  ;;  %v9434_v60 = vpop.f32.mrb[64].mxu1 }
 0x277   : > { %v7439_v6 = vpop.eup %7438  ;;  %v3827_v43 = vmul.f32 %v7437_v24, %v9313_v33  ;;  %7458 = vrcp.f32 %v3266_v10  ;;  %4736 = vmatprep.mubr.bf16.mxu0 %v4159_v53  ;;  %v6419_v63 = vmul.f32 -1.442695, %v9434_v60  ;;  %v9438_v36 = vpop.f32.mrb[65].mxu1 }
 0x278   : > { %v7441_v5 = vpop.eup %7440  ;;  %v3830_v52 = vmul.f32 %v7439_v6, %v9317_v3  ;;  %7460 = vrcp.f32 %v3267_v58  ;;  %4737 = vmatmul.mubr.bf16.gmra.mrb[140].mxu0 %v4158_v40  ;;  %v6420_v21 = vmul.f32 -1.442695, %v9438_v36  ;;  %v9442_v0 = vpop.f32.mrb[66].mxu1 }
 0x279   : > { %v7443_v20 = vpop.eup %7442  ;;  %v3831_v18 = vmul.f32 %v7441_v5, %v9320_v23  ;;  %7462 = vpow2.f32 %v6415_v15  ;;  %v4019_v33 = vmul.f32 %v3827_v43, %v9357_v14  ;;  %v6423_v54 = vmul.f32 -1.442695, %v9442_v0  ;;  %v9447_v55 = vpop.f32.mrb[67].mxu1  ;;  %v8005_v14 = vld [vmem:[#allocation3 + $0x130] ss:$8 sps:$4 sm:$0xff]  }
 0x27a   : > { %v9449_v7 = vpop.f32.mrb[60].mxu0  ;;  %v7445_v47 = vpop.eup %7444  ;;  %v3834_v3 = vmul.f32 %v7443_v20, %v9336_v8  ;;  %7464 = vpow2.f32 %v6416_v17  ;;  %v4022_v1 = vmul.f32 %v3830_v52, %v9362_v27  ;;  %v8006_v27 = vld [vmem:[#allocation3 + $0x144] ss:$8 sps:$4 sm:$0xff]   ;;  %v6424_v34 = vmul.f32 -1.442695, %v9447_v55 }
 0x27b   : > { %v9453_v11 = vpop.f32.mrb[61].mxu0  ;;  %v7447_v62 = vpop.eup %7446  ;;  %v3835_v23 = vmul.f32 %v7445_v47, %v9341_v35  ;;  %v4023_v9 = vmul.f32 %v3831_v18, %v9365_v31  ;;  %7466 = vpow2.f32 %v6419_v63  ;;  %1598 = vmatmul.mubr.bf16.gmra.mrb[172].mxu1 %v8005_v14  ;;  %v7183_v47 = vld [vmem:[%s8627_s15 + $0x130] ss:$8 sps:$4 sm:$0xff]  }
 0x27c   : > { %v9457_v57 = vpop.f32.mrb[62].mxu0  ;;  %v7449_v19 = vpop.eup %7448  ;;  %v3270_v39 = vadd.f32 1.0, %v7447_v62  ;;  %v4162_v29 = vpack.c.bf16 %v4022_v1, %v9426_v44  ;;  %7468 = vpow2.f32 %v6420_v21  ;;  %v9461_v8 = vmul.f32 %v3834_v3, %v9384_v37  ;;  %1607 = vmatprep.mubr.bf16.mxu1 %v8006_v27  ;;  %v7185_v3 = vld [vmem:[%s8627_s15 + $0x134] ss:$8 sps:$4 sm:$0xff]  }
 0x27d   : > { %v9463_v61 = vpop.f32.mrb[63].mxu0  ;;  %v7451_v35 = vpop.eup %7450  ;;  %v3271_v30 = vadd.f32 1.0, %v7449_v19  ;;  %v4163_v31 = vpack.c.bf16 %v4023_v9, %v4019_v33  ;;  %7470 = vpow2.f32 %v6423_v54  ;;  %v4027_v51 = vmul.f32 %v3835_v23, %v9387_v49  ;;  %v8007_v33 = vld [vmem:[#allocation3 + $0x140] ss:$8 sps:$4 sm:$0xff]   ;;  %v8008_v23 = vld [vmem:[#allocation3 + $0x154] ss:$8 sps:$4 sm:$0xff]   ;;  %4873 = vmatprep.subr.bf16.mxu0 %v7185_v3 }
 0x27e   : > { %v7453_v40 = vpop.eup %7452  ;;  %7472 = vrcp.f32 %v3270_v39  ;;  %v3274_v42 = vadd.f32 1.0, %v7451_v35  ;;  %v9467_v44 = vpop.f32.mrb[68].mxu1  ;;  %4874 = vmatpush1.bf16.msra.mxu0 %v7183_v47  ;;  %v7186_v3 = vld [vmem:[%s8627_s15 + $0x140] ss:$8 sps:$4 sm:$0xff]  }
 0x27f   : > { %v7455_v12 = vpop.eup %7454  ;;  %7474 = vrcp.f32 %v3271_v30  ;;  %v3275_v37 = vadd.f32 1.0, %v7453_v40  ;;  %4746 = vmatprep.mubr.bf16.mxu0 %v4163_v31  ;;  %v6427_v2 = vmul.f32 -1.442695, %v9467_v44  ;;  %v9470_v10 = vpop.f32.mrb[69].mxu1 }
 0x280   : > { %v7457_v53 = vpop.eup %7456  ;;  %v3838_v15 = vmul.f32 %v7455_v12, %v9347_v16  ;;  %7476 = vrcp.f32 %v3274_v42  ;;  %4747 = vmatmul.mubr.bf16.gmra.mrb[144].mxu0 %v4162_v29  ;;  %v6428_v49 = vmul.f32 -1.442695, %v9470_v10  ;;  %v9474_v24 = vpop.f32.mrb[70].mxu1 }
 0x281   : > { %v7459_v58 = vpop.eup %7458  ;;  %v3839_v17 = vmul.f32 %v7457_v53, %v9352_v4  ;;  %7478 = vrcp.f32 %v3275_v37  ;;  %v6431_v6 = vmul.f32 -1.442695, %v9474_v24  ;;  %v9478_v43 = vpop.f32.mrb[71].mxu1 }
 0x282   : > { %v9480_v63 = vpop.f32.mrb[64].mxu0  ;;  %v7461_v5 = vpop.eup %7460  ;;  %v3842_v16 = vmul.f32 %v7459_v58, %v9369_v59  ;;  %7480 = vpow2.f32 %v6424_v34  ;;  %v4030_v52 = vmul.f32 %v3838_v15, %v9394_v38  ;;  %v6432_v35 = vmul.f32 -1.442695, %v9478_v43 }
 0x283   : > { %v9484_v21 = vpop.f32.mrb[65].mxu0  ;;  %v7463_v20 = vpop.eup %7462  ;;  %v3843_v4 = vmul.f32 %v7461_v5, %v9373_v50  ;;  %v4031_v18 = vmul.f32 %v3839_v17, %v9397_v48  ;;  %7482 = vpow2.f32 %v6427_v2  ;;  %1608 = vmatmul.mubr.bf16.gmra.mrb[176].mxu1 %v8007_v33  ;;  %v9521_v5 = vld [vmem:[#allocation3 + $0x150] ss:$8 sps:$4 sm:$0xff]  }
 0x284   : > { %v9488_v54 = vpop.f32.mrb[66].mxu0  ;;  %v7465_v1 = vpop.eup %7464  ;;  %v3278_v62 = vadd.f32 1.0, %v7463_v20  ;;  %v4166_v59 = vpack.c.bf16 %v4030_v52, %v9461_v8  ;;  %7484 = vpow2.f32 %v6428_v49  ;;  %v9494_v38 = vmul.f32 %v3842_v16, %v9415_v26  ;;  %1617 = vmatprep.mubr.bf16.mxu1 %v8008_v23 }
 0x285   : > { %v9496_v50 = vpop.f32.mrb[67].mxu0  ;;  %v7467_v48 = vpop.eup %7466  ;;  %v3279_v9 = vadd.f32 1.0, %v7465_v1  ;;  %v4167_v14 = vpack.c.bf16 %v4031_v18, %v4027_v51  ;;  %7486 = vpow2.f32 %v6431_v6  ;;  %v9499_v19 = vmul.f32 %v3843_v4, %v9419_v46  ;;  %v9528_v4 = vld [vmem:[#allocation3 + $0x164] ss:$8 sps:$4 sm:$0xff]  }
 0x286   : > { %v7469_v39 = vpop.eup %7468  ;;  %7488 = vrcp.f32 %v3278_v62  ;;  %v3282_v29 = vadd.f32 1.0, %v7467_v48  ;;  %v9501_v8 = vpop.f32.mrb[72].mxu1  ;;  %v7188_v1 = vld [vmem:[%s8627_s15 + $0x144] ss:$8 sps:$4 sm:$0xff]  }
 0x287   : > { %v7471_v26 = vpop.eup %7470  ;;  %7490 = vrcp.f32 %v3279_v9  ;;  %v3283_v27 = vadd.f32 1.0, %v7469_v39  ;;  %4756 = vmatprep.mubr.bf16.mxu0 %v4167_v14  ;;  %v9504_v30 = vpop.f32.mrb[73].mxu1  ;;  %v6435_v46 = vmul.f32 -1.442695, %v9501_v8  ;;  %4875 = vmatprep.subr.bf16.mxu0 %v7188_v1 }
 0x288   : > { %v7473_v31 = vpop.eup %7472  ;;  %7492 = vrcp.f32 %v3282_v29  ;;  %v3286_v51 = vadd.f32 1.0, %v7471_v26  ;;  %4757 = vmatmul.mubr.bf16.gmra.mrb[148].mxu0 %v4166_v59  ;;  %v9507_v40 = vpop.f32.mrb[74].mxu1  ;;  %v6436_v12 = vmul.f32 -1.442695, %v9504_v30 }
 0x289   : > { %v7475_v42 = vpop.eup %7474  ;;  %v3846_v34 = vmul.f32 %v7473_v31, %v9378_v32  ;;  %7494 = vrcp.f32 %v3283_v27  ;;  %v9511_v37 = vpop.f32.mrb[75].mxu1  ;;  %v6439_v49 = vmul.f32 -1.442695, %v9507_v40  ;;  %4876 = vmatpush1.bf16.msra.mxu0 %v7186_v3 }
 0x28a   : > { %v9513_v2 = vpop.f32.mrb[68].mxu0  ;;  %v7477_v53 = vpop.eup %7476  ;;  %v3847_v15 = vmul.f32 %v7475_v42, %v9382_v25  ;;  %7496 = vrcp.f32 %v3286_v51 }
 0x28b   : > { %v9517_v58 = vpop.f32.mrb[69].mxu0  ;;  %v7479_v17 = vpop.eup %7478  ;;  %v3850_v6 = vmul.f32 %v7477_v53, %v9401_v41  ;;  %7498 = vpow2.f32 %v6432_v35  ;;  %v4038_v32 = vmul.f32 %v3846_v34, %v9422_v45  ;;  %1618 = vmatmul.mubr.bf16.gmra.mrb[180].mxu1 %v9521_v5 }
 0x28c   : > { %v9524_v16 = vpop.f32.mrb[70].mxu0  ;;  %v7481_v25 = vpop.eup %7480  ;;  %v3851_v52 = vmul.f32 %v7479_v17, %v9405_v28  ;;  %v4039_v20 = vmul.f32 %v3847_v15, %v9428_v56  ;;  %7500 = vpow2.f32 %v6435_v46  ;;  %1627 = vmatprep.mubr.bf16.mxu1 %v9528_v4 }
 0x28d   : > { %v9531_v41 = vpop.f32.mrb[71].mxu0  ;;  %v7483_v45 = vpop.eup %7482  ;;  %v3287_v18 = vadd.f32 1.0, %v7481_v25  ;;  %v4170_v33 = vpack.c.bf16 %v4038_v32, %v9494_v38  ;;  %7502 = vpow2.f32 %v6436_v12  ;;  %v9535_v47 = vmul.f32 %v3850_v6, %v9449_v7  ;;  %v9569_v25 = vld [vmem:[#allocation3 + $0x174] ss:$8 sps:$4 sm:$0xff]  }
 0x28e   : > { %v7485_v28 = vpop.eup %7484  ;;  %v3290_v62 = vadd.f32 1.0, %v7483_v45  ;;  %v4171_v56 = vpack.c.bf16 %v4039_v20, %v9499_v19  ;;  %7504 = vpow2.f32 %v6439_v49  ;;  %v4043_v59 = vmul.f32 %v3851_v52, %v9453_v11  ;;  %v9541_v23 = vpop.f32.mrb[76].mxu1  ;;  %v9562_v49 = vld [vmem:[#allocation3 + $0x160] ss:$8 sps:$4 sm:$0xff]  }
 0x28f   : > { %v7487_v48 = vpop.eup %7486  ;;  %7506 = vrcp.f32 %v3287_v18  ;;  %v3291_v9 = vadd.f32 1.0, %v7485_v28  ;;  %v6440_v38 = vmul.f32 -1.442695, %v9511_v37  ;;  %v9544_v14 = vpop.f32.mrb[77].mxu1  ;;  %v6443_v29 = vmul.f32 -1.442695, %v9541_v23 }
 0x290   : > { %v7489_v7 = vpop.eup %7488  ;;  %7508 = vrcp.f32 %v3290_v62  ;;  %v3294_v39 = vadd.f32 1.0, %v7487_v48  ;;  %4766 = vmatprep.mubr.bf16.mxu0 %v4171_v56  ;;  %v9547_v19 = vpop.f32.mrb[78].mxu1  ;;  %v6444_v27 = vmul.f32 -1.442695, %v9544_v14 }
 0x291   : > { %v7491_v11 = vpop.eup %7490  ;;  %v3854_v26 = vmul.f32 %v7489_v7, %v9409_v22  ;;  %7510 = vrcp.f32 %v3291_v9  ;;  %4767 = vmatmul.mubr.bf16.gmra.mrb[152].mxu0 %v4170_v33  ;;  %v9551_v35 = vpop.f32.mrb[79].mxu1  ;;  %v6447_v42 = vmul.f32 -1.442695, %v9547_v19 }
 0x292   : > { %v9553_v31 = vpop.f32.mrb[72].mxu0  ;;  %v7493_v51 = vpop.eup %7492  ;;  %v3855_v46 = vmul.f32 %v7491_v11, %v9413_v13  ;;  %7512 = vrcp.f32 %v3294_v39  ;;  %v6448_v15 = vmul.f32 -1.442695, %v9551_v35 }
 0x293   : > { %v9557_v34 = vpop.f32.mrb[73].mxu0  ;;  %v7495_v12 = vpop.eup %7494  ;;  %v3858_v53 = vmul.f32 %v7493_v51, %v9434_v60  ;;  %7514 = vpow2.f32 %v6440_v38  ;;  %v4046_v22 = vmul.f32 %v3854_v26, %v9457_v57  ;;  %1628 = vmatmul.mubr.bf16.gmra.mrb[184].mxu1 %v9562_v49 }
 0x294   : > { %v9565_v17 = vpop.f32.mrb[74].mxu0  ;;  %v7497_v13 = vpop.eup %7496  ;;  %v3859_v6 = vmul.f32 %v7495_v12, %v9438_v36  ;;  %v4047_v32 = vmul.f32 %v3855_v46, %v9463_v61  ;;  %7516 = vpow2.f32 %v6443_v29  ;;  %1637 = vmatprep.mubr.bf16.mxu1 %v9569_v25 }
 0x295   : > { %v9572_v60 = vpop.f32.mrb[75].mxu0  ;;  %v7499_v57 = vpop.eup %7498  ;;  %v3862_v52 = vmul.f32 %v7497_v13, %v9442_v0  ;;  %v4174_v20 = vpack.c.bf16 %v4046_v22, %v9535_v47  ;;  %7518 = vpow2.f32 %v6444_v27  ;;  %v9577_v45 = vmul.f32 %v3858_v53, %v9480_v63 }
 0x296   : > { %v7501_v18 = vpop.eup %7500  ;;  %v3295_v36 = vadd.f32 1.0, %v7499_v57  ;;  %v4175_v33 = vpack.c.bf16 %v4047_v32, %v4043_v59  ;;  %7520 = vpow2.f32 %v6447_v42  ;;  %v4051_v61 = vmul.f32 %v3859_v6, %v9484_v21  ;;  %v9580_v3 = vpop.f32.mrb[80].mxu1  ;;  %v9600_v42 = vld [vmem:[#allocation3 + $0x170] ss:$8 sps:$4 sm:$0xff]   ;;  %v7191_v6 = vld [vmem:[%s8627_s15 + $0x154] ss:$8 sps:$4 sm:$0xff]  }
 0x297   : > { %v7503_v1 = vpop.eup %7502  ;;  %v3298_v28 = vadd.f32 1.0, %v7501_v18  ;;  %7522 = vpow2.f32 %v6448_v15  ;;  %v4054_v62 = vmul.f32 %v3862_v52, %v9488_v54  ;;  %v9583_v0 = vpop.f32.mrb[81].mxu1  ;;  %v6451_v63 = vmul.f32 -1.442695, %v9580_v3  ;;  %v8014_v15 = vld [vmem:[#allocation3 + $0x4] ss:$8 sps:$4 sm:$0xff]   ;;  %4877 = vmatprep.subr.bf16.mxu0 %v7191_v6 }
 0x298   : > { %v7505_v47 = vpop.eup %7504  ;;  %7524 = vrcp.f32 %v3295_v36  ;;  %v3299_v56 = vadd.f32 1.0, %v7503_v1  ;;  %4776 = vmatprep.mubr.bf16.mxu0 %v4175_v33  ;;  %v9586_v48 = vpop.f32.mrb[82].mxu1  ;;  %v6452_v38 = vmul.f32 -1.442695, %v9583_v0 }
 0x299   : > { %v7507_v59 = vpop.eup %7506  ;;  %7526 = vrcp.f32 %v3298_v28  ;;  %v3302_v21 = vadd.f32 1.0, %v7505_v47  ;;  %4777 = vmatmul.mubr.bf16.gmra.mrb[156].mxu0 %v4174_v20  ;;  %v4178_v9 = vpack.c.bf16 %v4054_v62, %v9577_v45  ;;  %v9590_v7 = vpop.f32.mrb[83].mxu1  ;;  %v6455_v11 = vmul.f32 -1.442695, %v9586_v48 }
 0x29a   : > { %v9592_v54 = vpop.f32.mrb[76].mxu0  ;;  %v7509_v39 = vpop.eup %7508  ;;  %v3863_v29 = vmul.f32 %v7507_v59, %v9447_v55  ;;  %7528 = vrcp.f32 %v3299_v56  ;;  %v6456_v46 = vmul.f32 -1.442695, %v9590_v7 }
 0x29b   : > { %v9596_v26 = vpop.f32.mrb[77].mxu0  ;;  %v7511_v27 = vpop.eup %7510  ;;  %v3866_v51 = vmul.f32 %v7509_v39, %v9467_v44  ;;  %7530 = vrcp.f32 %v3302_v21  ;;  %1638 = vmatmul.mubr.bf16.gmra.mrb[188].mxu1 %v9600_v42  ;;  %v7189_v44 = vld [vmem:[%s8627_s15 + $0x150] ss:$8 sps:$4 sm:$0xff]  }
 0x29c   : > { %v9603_v12 = vpop.f32.mrb[78].mxu0  ;;  %v7513_v55 = vpop.eup %7512  ;;  %v3867_v53 = vmul.f32 %v7511_v27, %v9470_v10  ;;  %v4055_v22 = vmul.f32 %v3863_v29, %v9496_v50  ;;  %7532 = vpow2.f32 %v6451_v63  ;;  %2337 = vmatprep.mubr.bf16.mxu1 %v8014_v15  ;;  %4878 = vmatpush1.bf16.msra.mxu0 %v7189_v44  ;;  %v8015_v27 = vld [vmem:[#allocation3] ss:$8 sps:$4 sm:$0xff]  }
 0x29d   : > { %v9607_v13 = vpop.f32.mrb[79].mxu0  ;;  %v7515_v32 = vpop.eup %7514  ;;  %v3870_v57 = vmul.f32 %v7513_v55, %v9474_v24  ;;  %7534 = vpow2.f32 %v6452_v38  ;;  %v9613_v52 = vmul.f32 %v3866_v51, %v9513_v2 }
 0x29e   : > { %v7517_v20 = vpop.eup %7516  ;;  %v3303_v45 = vadd.f32 1.0, %v7515_v32  ;;  %v4179_v18 = vpack.c.bf16 %v4055_v22, %v4051_v61  ;;  %7536 = vpow2.f32 %v6455_v11  ;;  %v9616_v10 = vmul.f32 %v3867_v53, %v9517_v58  ;;  %v9618_v50 = vpop.f32.mrb[84].mxu1  ;;  %v8016_v22 = vld [vmem:[#allocation3 + $0x14] ss:$8 sps:$4 sm:$0xff]  }
 0x29f   : > { %v7519_v36 = vpop.eup %7518  ;;  %v3306_v33 = vadd.f32 1.0, %v7517_v20  ;;  %7538 = vpow2.f32 %v6456_v46  ;;  %v9621_v1 = vmul.f32 %v3870_v57, %v9524_v16  ;;  %v9623_v24 = vpop.f32.mrb[85].mxu1  ;;  %v6459_v56 = vmul.f32 -1.442695, %v9618_v50  ;;  %v7192_v20 = vld [vmem:[%s8627_s15 + $0x160] ss:$8 sps:$4 sm:$0xff]  }
 0x2a0   : > { %v7521_v2 = vpop.eup %7520  ;;  %7540 = vrcp.f32 %v3303_v45  ;;  %v3307_v28 = vadd.f32 1.0, %v7519_v36  ;;  %4786 = vmatprep.mubr.bf16.mxu0 %v4179_v18  ;;  %v9625_v61 = vpop.f32.mrb[86].mxu1  ;;  %v6460_v38 = vmul.f32 -1.442695, %v9623_v24  ;;  %v7194_v45 = vld [vmem:[%s8627_s15 + $0x164] ss:$8 sps:$4 sm:$0xff]  }
 0x2a1   : > { %v7523_v58 = vpop.eup %7522  ;;  %7542 = vrcp.f32 %v3306_v33  ;;  %v3310_v62 = vadd.f32 1.0, %v7521_v2  ;;  %4787 = vmatmul.mubr.bf16.gmra.mrb[160].mxu0 %v4178_v9  ;;  %v4182_v47 = vpack.c.bf16 %v9621_v1, %v9613_v52  ;;  %v9630_v16 = vpop.f32.mrb[87].mxu1  ;;  %v6463_v9 = vmul.f32 -1.442695, %v9625_v61  ;;  %4879 = vmatprep.subr.bf16.mxu0 %v7194_v45 }
 0x2a2   : > { %v9632_v63 = vpop.f32.mrb[80].mxu0  ;;  %v7525_v59 = vpop.eup %7524  ;;  %7544 = vrcp.f32 %v3307_v28  ;;  %v3311_v21 = vadd.f32 1.0, %v7523_v58  ;;  %v6464_v53 = vmul.f32 -1.442695, %v9630_v16  ;;  %4880 = vmatpush1.bf16.msra.mxu0 %v7192_v20 }
 0x2a3   : > { %v9635_v39 = vpop.f32.mrb[81].mxu0  ;;  %v7527_v29 = vpop.eup %7526  ;;  %v3871_v11 = vmul.f32 %v7525_v59, %v9478_v43  ;;  %7546 = vrcp.f32 %v3310_v62  ;;  %2338 = vmatmul.mubr.bf16.vlgmr.msra.gmra.mrb[192].mxu1 %v8015_v27 }
 0x2a4   : > { %v9639_v51 = vpop.f32.mrb[82].mxu0  ;;  %v7529_v46 = vpop.eup %7528  ;;  %v3874_v55 = vmul.f32 %v7527_v29, %v9501_v8  ;;  %7548 = vrcp.f32 %v3311_v21  ;;  %2347 = vmatprep.mubr.bf16.mxu1 %v8016_v22 }
 0x2a5   : > { %v9643_v15 = vpop.f32.mrb[83].mxu0  ;;  %v7531_v43 = vpop.eup %7530  ;;  %v3875_v44 = vmul.f32 %v7529_v46, %v9504_v30  ;;  %v4063_v6 = vmul.f32 %v3871_v11, %v9531_v41  ;;  %7550 = vpow2.f32 %v6459_v56 }
 0x2a6   : > { %v7533_v32 = vpop.eup %7532  ;;  %v3878_v57 = vmul.f32 %v7531_v43, %v9507_v40  ;;  %7552 = vpow2.f32 %v6460_v38  ;;  %v9649_v8 = vmul.f32 %v3874_v55, %v9553_v31  ;;  %v9651_v52 = vpop.f32.mrb[88].mxu1 }
 0x2a7   : > { %v7535_v18 = vpop.eup %7534  ;;  %v3314_v36 = vadd.f32 1.0, %v7533_v32  ;;  %v4183_v33 = vpack.c.bf16 %v4063_v6, %v9616_v10  ;;  %7554 = vpow2.f32 %v6463_v9  ;;  %v4067_v30 = vmul.f32 %v3875_v44, %v9557_v34  ;;  %v9657_v41 = vpop.f32.mrb[89].mxu1  ;;  %v8017_v9 = vld [vmem:[#allocation3 + $0x10] ss:$8 sps:$4 sm:$0xff]  }
 0x2a8   : > { %v7537_v1 = vpop.eup %7536  ;;  %v3315_v2 = vadd.f32 1.0, %v7535_v18  ;;  %7556 = vpow2.f32 %v6464_v53  ;;  %v4070_v40 = vmul.f32 %v3878_v57, %v9565_v17  ;;  %v9660_v31 = vpop.f32.mrb[90].mxu1  ;;  %v6467_v62 = vmul.f32 -1.442695, %v9651_v52  ;;  %v8018_v53 = vld [vmem:[#allocation3 + $0x24] ss:$8 sps:$4 sm:$0xff]  }
 0x2a9   : > { %v7539_v28 = vpop.eup %7538  ;;  %7558 = vrcp.f32 %v3314_v36  ;;  %v3318_v58 = vadd.f32 1.0, %v7537_v1  ;;  %4796 = vmatprep.mubr.bf16.mxu0 %v4183_v33  ;;  %v9663_v10 = vpop.f32.mrb[91].mxu1  ;;  %v6468_v17 = vmul.f32 -1.442695, %v9657_v41  ;;  %v6471_v11 = vmul.f32 -1.442695, %v9660_v31 }
 0x2aa   : > { %v7541_v34 = vpop.eup %7540  ;;  %7560 = vrcp.f32 %v3315_v2  ;;  %v3319_v56 = vadd.f32 1.0, %v7539_v28  ;;  %4797 = vmatmul.mubr.bf16.gmra.mrb[164].mxu0 %v4182_v47  ;;  %v4186_v59 = vpack.c.bf16 %v4070_v40, %v9649_v8  ;;  %v9667_v21 = vpop.f32.mrb[84].mxu0  ;;  %v6472_v47 = vmul.f32 -1.442695, %v9663_v10  ;;  %v7195_v40 = vld [vmem:[%s8627_s15 + $0x170] ss:$8 sps:$4 sm:$0xff]  }
 0x2ab   : > { %v7543_v38 = vpop.eup %7542  ;;  %v3879_v29 = vmul.f32 %v7541_v34, %v9511_v37  ;;  %7562 = vrcp.f32 %v3318_v58  ;;  %2348 = vmatmul.mubr.bf16.gmra.mrb[196].mxu1 %v8017_v9  ;;  %v9671_v27 = vpop.f32.mrb[85].mxu0  ;;  %v7197_v34 = vld [vmem:[%s8627_s15 + $0x174] ss:$8 sps:$4 sm:$0xff]  }
 0x2ac   : > { %v7545_v46 = vpop.eup %7544  ;;  %v3882_v55 = vmul.f32 %v7543_v38, %v9541_v23  ;;  %7564 = vrcp.f32 %v3319_v56  ;;  %2357 = vmatprep.mubr.bf16.mxu1 %v8018_v53  ;;  %v9675_v22 = vpop.f32.mrb[86].mxu0  ;;  %4881 = vmatprep.subr.bf16.mxu0 %v7197_v34 }
 0x2ad   : > { %v7547_v43 = vpop.eup %7546  ;;  %v3883_v37 = vmul.f32 %v7545_v46, %v9544_v14  ;;  %v4071_v44 = vmul.f32 %v3879_v29, %v9572_v60  ;;  %7566 = vpow2.f32 %v6467_v62  ;;  %v9679_v6 = vpop.f32.mrb[87].mxu0  ;;  %v8019_v29 = vld [vmem:[#allocation3 + $0x20] ss:$8 sps:$4 sm:$0xff]   ;;  %4882 = vmatpush1.bf16.msra.mxu0 %v7195_v40 }
 0x2ae   : > { %v7549_v32 = vpop.eup %7548  ;;  %v3886_v57 = vmul.f32 %v7547_v43, %v9547_v19  ;;  %7568 = vpow2.f32 %v6468_v17  ;;  %v9683_v23 = vmul.f32 %v3882_v55, %v9592_v54  ;;  %v9685_v8 = vpop.f32.mrb[92].mxu1  ;;  %v8020_v55 = vld [vmem:[#allocation3 + $0x34] ss:$8 sps:$4 sm:$0xff]  }
 0x2af   : > { %v7551_v20 = vpop.eup %7550  ;;  %v3887_v45 = vmul.f32 %v7549_v32, %v9551_v35  ;;  %v4187_v18 = vpack.c.bf16 %v4071_v44, %v4067_v30  ;;  %7570 = vpow2.f32 %v6471_v11  ;;  %v4075_v14 = vmul.f32 %v3883_v37, %v9596_v26  ;;  %v9689_v60 = vpop.f32.mrb[93].mxu1 }
 0x2b0   : > { %v7553_v36 = vpop.eup %7552  ;;  %v3322_v33 = vadd.f32 1.0, %v7551_v20  ;;  %7572 = vpow2.f32 %v6472_v47  ;;  %v9692_v19 = vmul.f32 %v3886_v57, %v9603_v12  ;;  %v9694_v54 = vpop.f32.mrb[94].mxu1  ;;  %v6475_v12 = vmul.f32 -1.442695, %v9685_v8 }
 0x2b1   : > { %v7555_v1 = vpop.eup %7554  ;;  %v3323_v2 = vadd.f32 1.0, %v7553_v36  ;;  %4806 = vmatprep.mubr.bf16.mxu0 %v4187_v18  ;;  %v4079_v35 = vmul.f32 %v3887_v45, %v9607_v13  ;;  %v9697_v30 = vpop.f32.mrb[95].mxu1  ;;  %v6476_v13 = vmul.f32 -1.442695, %v9689_v60  ;;  %v6479_v46 = vmul.f32 -1.442695, %v9694_v54 }
 0x2b2   : > { %v7557_v26 = vpop.eup %7556  ;;  %7574 = vrcp.f32 %v3322_v33  ;;  %v3326_v28 = vadd.f32 1.0, %v7555_v1  ;;  %4807 = vmatmul.mubr.bf16.gmra.mrb[168].mxu0 %v4186_v59  ;;  %v4190_v58 = vpack.c.bf16 %v9692_v19, %v9683_v23  ;;  %v9703_v62 = vpop.f32.mrb[88].mxu0  ;;  %v6480_v37 = vmul.f32 -1.442695, %v9697_v30 }
 0x2b3   : > { %v7559_v56 = vpop.eup %7558  ;;  %7576 = vrcp.f32 %v3323_v2  ;;  %v3327_v17 = vadd.f32 1.0, %v7557_v26  ;;  %v4191_v38 = vpack.c.bf16 %v4079_v35, %v4075_v14  ;;  %2358 = vmatmul.mubr.bf16.gmra.mrb[200].mxu1 %v8019_v29  ;;  %v9707_v11 = vpop.f32.mrb[89].mxu0 }
 0x2b4   : > { %v7561_v9 = vpop.eup %7560  ;;  %v3890_v59 = vmul.f32 %v7559_v56, %v9580_v3  ;;  %7578 = vrcp.f32 %v3326_v28  ;;  %2367 = vmatprep.mubr.bf16.mxu1 %v8020_v55  ;;  %v9711_v47 = vpop.f32.mrb[90].mxu0 }
 0x2b5   : > { %v7563_v53 = vpop.eup %7562  ;;  %v3891_v43 = vmul.f32 %v7561_v9, %v9583_v0  ;;  %7580 = vrcp.f32 %v3327_v17  ;;  %4816 = vmatprep.mubr.bf16.mxu0 %v4191_v38  ;;  %v9715_v44 = vpop.f32.mrb[91].mxu0 }
 0x2b6   : > { %v7565_v32 = vpop.eup %7564  ;;  %v3894_v3 = vmul.f32 %v7563_v53, %v9586_v48  ;;  %7582 = vpow2.f32 %v6475_v12  ;;  %v4082_v57 = vmul.f32 %v3890_v59, %v9632_v63  ;;  %v9719_v23 = vpop.f32.mrb[96].mxu1  ;;  %v8021_v12 = vld [vmem:[#allocation3 + $0x30] ss:$8 sps:$4 sm:$0xff]  }
 0x2b7   : > { %v7567_v20 = vpop.eup %7566  ;;  %v3895_v45 = vmul.f32 %v7565_v32, %v9590_v7  ;;  %7584 = vpow2.f32 %v6476_v13  ;;  %v4083_v0 = vmul.f32 %v3891_v43, %v9635_v39  ;;  %v9723_v18 = vpop.f32.mrb[97].mxu1  ;;  %v7198_v43 = vld [vmem:[%s8627_s15 + $0x180] ss:$8 sps:$4 sm:$0xff]  }
 0x2b8   : > { %v7569_v14 = vpop.eup %7568  ;;  %v3330_v36 = vadd.f32 1.0, %v7567_v20  ;;  %7586 = vpow2.f32 %v6479_v46  ;;  %v4086_v33 = vmul.f32 %v3894_v3, %v9639_v51  ;;  %v9726_v19 = vpop.f32.mrb[98].mxu1 }
 0x2b9   : > { %v7571_v48 = vpop.eup %7570  ;;  %v3331_v1 = vadd.f32 1.0, %v7569_v14  ;;  %7588 = vpow2.f32 %v6480_v37  ;;  %v4087_v63 = vmul.f32 %v3895_v45, %v9643_v15  ;;  %v9729_v2 = vpop.f32.mrb[99].mxu1  ;;  %v8022_v15 = vld [vmem:[#allocation3 + $0x44] ss:$8 sps:$4 sm:$0xff]  }
 0x2ba   : > { %v9731_v7 = vpop.f32.mrb[92].mxu0  ;;  %v7573_v35 = vpop.eup %7572  ;;  %7590 = vrcp.f32 %v3330_v36  ;;  %v3334_v39 = vadd.f32 1.0, %v7571_v48  ;;  %4817 = vmatmul.mubr.bf16.gmra.mrb[172].mxu0 %v4190_v58  ;;  %v4194_v40 = vpack.c.bf16 %v4086_v33, %v4082_v57  ;;  %v7200_v57 = vld [vmem:[%s8627_s15 + $0x184] ss:$8 sps:$4 sm:$0xff]  }
 0x2bb   : > { %v9733_v26 = vpop.f32.mrb[93].mxu0  ;;  %7592 = vrcp.f32 %v3331_v1  ;;  %v3335_v51 = vadd.f32 1.0, %v7573_v35  ;;  %v4195_v28 = vpack.c.bf16 %v4087_v63, %v4083_v0  ;;  %2368 = vmatmul.mubr.bf16.gmra.mrb[204].mxu1 %v8021_v12  ;;  %4883 = vmatprep.subr.bf16.mxu0 %v7200_v57 }
 0x2bc   : > { %v9735_v34 = vpop.f32.mrb[94].mxu0  ;;  %v7575_v56 = vpop.eup %7574  ;;  %7594 = vrcp.f32 %v3334_v39  ;;  %2377 = vmatprep.mubr.bf16.mxu1 %v8022_v15  ;;  %4884 = vmatpush1.bf16.msra.mxu0 %v7198_v43  ;;  %v8026_v43 = vld [vmem:[#allocation3 + $0x64] ss:$8 sps:$4 sm:$0xff]  }
 0x2bd   : > { %v9737_v17 = vpop.f32.mrb[95].mxu0  ;;  %v7577_v38 = vpop.eup %7576  ;;  %v3898_v58 = vmul.f32 %v7575_v56, %v9618_v50  ;;  %7596 = vrcp.f32 %v3335_v51  ;;  %4826 = vmatprep.mubr.bf16.mxu0 %v4195_v28 }
 0x2be   : > { %v7579_v13 = vpop.eup %7578  ;;  %v3899_v29 = vmul.f32 %v7577_v38, %v9623_v24  ;;  %v9741_v9 = vpop.f32.mrb[100].mxu1 }
 0x2bf   : > { %v7581_v59 = vpop.eup %7580  ;;  %v3902_v46 = vmul.f32 %v7579_v13, %v9625_v61  ;;  %v4090_v55 = vmul.f32 %v3898_v58, %v9667_v21  ;;  %v9745_v53 = vpop.f32.mrb[101].mxu1 }
 0x2c0   : > { %v7583_v37 = vpop.eup %7582  ;;  %v3903_v32 = vmul.f32 %v7581_v59, %v9630_v16  ;;  %v4091_v50 = vmul.f32 %v3899_v29, %v9671_v27  ;;  %v9750_v3 = vpop.f32.mrb[102].mxu1  ;;  %v8023_v27 = vld [vmem:[#allocation3 + $0x40] ss:$8 sps:$4 sm:$0xff]   ;;  %v7201_v29 = vld [vmem:[%s8627_s15 + $0x190] ss:$8 sps:$4 sm:$0xff]  }
 0x2c1   : > { %v7585_v20 = vpop.eup %7584  ;;  %v3338_v24 = vadd.f32 1.0, %v7583_v37  ;;  %v4094_v45 = vmul.f32 %v3902_v46, %v9675_v22  ;;  %v9754_v0 = vpop.f32.mrb[103].mxu1  ;;  %v8024_v22 = vld [vmem:[#allocation3 + $0x54] ss:$8 sps:$4 sm:$0xff]  }
 0x2c2   : > { %v7587_v61 = vpop.eup %7586  ;;  %v3339_v14 = vadd.f32 1.0, %v7585_v20  ;;  %4827 = vmatmul.mubr.bf16.gmra.mrb[176].mxu0 %v4194_v40  ;;  %v4095_v21 = vmul.f32 %v3903_v32, %v9679_v6  ;;  %v7203_v46 = vld [vmem:[%s8627_s15 + $0x194] ss:$8 sps:$4 sm:$0xff]  }
 0x2c3   : > { %v7589_v36 = vpop.eup %7588  ;;  %7598 = vrcp.f32 %v3338_v24  ;;  %v3342_v16 = vadd.f32 1.0, %v7587_v61  ;;  %v4198_v33 = vpack.c.bf16 %v4094_v45, %v4090_v55  ;;  %2378 = vmatmul.mubr.bf16.gmra.mrb[208].mxu1 %v8023_v27  ;;  %v8025_v55 = vld [vmem:[#allocation3 + $0x50] ss:$8 sps:$4 sm:$0xff]   ;;  %4885 = vmatprep.subr.bf16.mxu0 %v7203_v46  ;;  %v7204_v27 = vld [vmem:[%s8627_s15 + $0x1a0] ss:$8 sps:$4 sm:$0xff]  }
 0x2c4   : > { %v7591_v48 = vpop.eup %7590  ;;  %7600 = vrcp.f32 %v3339_v14  ;;  %v3343_v1 = vadd.f32 1.0, %v7589_v36  ;;  %v4199_v63 = vpack.c.bf16 %v4095_v21, %v4091_v50  ;;  %2387 = vmatprep.mubr.bf16.mxu1 %v8024_v22  ;;  %4886 = vmatpush1.bf16.msra.mxu0 %v7201_v29  ;;  %v8027_v36 = vld [vmem:[#allocation3 + $0x60] ss:$8 sps:$4 sm:$0xff]   ;;  %v8033_v29 = vld [vmem:[#allocation3 + $0x90] ss:$8 sps:$4 sm:$0xff]  }
 0x2c5   : > { %v7593_v35 = vpop.eup %7592  ;;  %v3906_v39 = vmul.f32 %v7591_v48, %v9651_v52  ;;  %7602 = vrcp.f32 %v3342_v16  ;;  %v8028_v16 = vld [vmem:[#allocation3 + $0x74] ss:$8 sps:$4 sm:$0xff]   ;;  %v7210_v46 = vld [vmem:[%s8627_s15 + $0x1c0] ss:$8 sps:$4 sm:$0xff]  }
 0x2c6   : > { %v7595_v6 = vpop.eup %7594  ;;  %v3907_v40 = vmul.f32 %v7593_v35, %v9657_v41  ;;  %7604 = vrcp.f32 %v3343_v1  ;;  %4836 = vmatprep.mubr.bf16.mxu0 %v4199_v63  ;;  %v9759_v51 = vpop.f32.mrb[104].mxu1  ;;  %v8030_v1 = vld [vmem:[#allocation3 + $0x84] ss:$8 sps:$4 sm:$0xff]  }
 0x2c7   : > { %v7597_v28 = vpop.eup %7596  ;;  %v3910_v12 = vmul.f32 %v7595_v6, %v9660_v31  ;;  %v4098_v56 = vmul.f32 %v3906_v39, %v9703_v62  ;;  %v9763_v15 = vpop.f32.mrb[105].mxu1  ;;  %v7207_v6 = vld [vmem:[%s8627_s15 + $0x1b0] ss:$8 sps:$4 sm:$0xff]  }
 0x2c8   : > { %v3911_v38 = vmul.f32 %v7597_v28, %v9663_v10  ;;  %v4099_v52 = vmul.f32 %v3907_v40, %v9707_v11  ;;  %v9767_v58 = vpop.f32.mrb[106].mxu1  ;;  %v7209_v40 = vld [vmem:[%s8627_s15 + $0x1b4] ss:$8 sps:$4 sm:$0xff]   ;;  %v8031_v28 = vld [vmem:[#allocation3 + $0x80] ss:$8 sps:$4 sm:$0xff]  }
 0x2c9   : > { %v4102_v41 = vmul.f32 %v3910_v12, %v9711_v47  ;;  %v9770_v13 = vpop.f32.mrb[107].mxu1  ;;  %v8032_v12 = vld [vmem:[#allocation3 + $0x94] ss:$8 sps:$4 sm:$0xff]  }
 0x2ca   : > { %4837 = vmatmul.mubr.bf16.gmra.mrb[180].mxu0 %v4198_v33  ;;  %v4103_v59 = vmul.f32 %v3911_v38, %v9715_v44 }
 0x2cb   : > { %v4202_v31 = vpack.c.bf16 %v4102_v41, %v4098_v56  ;;  %2388 = vmatmul.mubr.bf16.gmra.mrb[212].mxu1 %v8025_v55 }
 0x2cc   : > { %v4203_v62 = vpack.c.bf16 %v4103_v59, %v4099_v52  ;;  %2397 = vmatprep.mubr.bf16.mxu1 %v8026_v43  ;;  %v8034_v59 = vld [vmem:[#allocation3 + $0xa4] ss:$8 sps:$4 sm:$0xff]  }
 0x2cd   : > { %v7599_v10 = vpop.eup %7598 }
 0x2ce   : > { %v7601_v11 = vpop.eup %7600  ;;  %v3914_v37 = vmul.f32 %v7599_v10, %v9685_v8  ;;  %4846 = vmatprep.mubr.bf16.mxu0 %v4203_v62  ;;  %v9776_v47 = vpop.f32.mrb[108].mxu1 }
 0x2cf   : > { %v7603_v32 = vpop.eup %7602  ;;  %v3915_v50 = vmul.f32 %v7601_v11, %v9689_v60  ;;  %v9779_v44 = vpop.f32.mrb[109].mxu1  ;;  %v8035_v11 = vld [vmem:[#allocation3 + $0xa0] ss:$8 sps:$4 sm:$0xff]  }
 0x2d0   : > { %v7605_v57 = vpop.eup %7604  ;;  %v3918_v20 = vmul.f32 %v7603_v32, %v9694_v54  ;;  %v4106_v24 = vmul.f32 %v3914_v37, %v9731_v7  ;;  %v9783_v45 = vpop.f32.mrb[110].mxu1  ;;  %v8036_v37 = vld [vmem:[#allocation3 + $0xb4] ss:$8 sps:$4 sm:$0xff]  }
 0x2d1   : > { %v3919_v61 = vmul.f32 %v7605_v57, %v9697_v30  ;;  %v4107_v8 = vmul.f32 %v3915_v50, %v9733_v26  ;;  %v9787_v14 = vpop.f32.mrb[111].mxu1 }
 0x2d2   : > { %4847 = vmatmul.mubr.bf16.gmra.mrb[184].mxu0 %v4202_v31  ;;  %v4110_v60 = vmul.f32 %v3918_v20, %v9735_v34  ;;  %v7206_v34 = vld [vmem:[%s8627_s15 + $0x1a4] ss:$8 sps:$4 sm:$0xff]  }
 0x2d3   : > { %v4111_v21 = vmul.f32 %v3919_v61, %v9737_v17  ;;  %2398 = vmatmul.mubr.bf16.gmra.mrb[216].mxu1 %v8027_v36  ;;  %v8029_v17 = vld [vmem:[#allocation3 + $0x70] ss:$8 sps:$4 sm:$0xff]   ;;  %4887 = vmatprep.subr.bf16.mxu0 %v7206_v34  ;;  %v7212_v31 = vld [vmem:[%s8627_s15 + $0x1c4] ss:$8 sps:$4 sm:$0xff]   ;;  %v7221_v34 = vld [vmem:[%s8627_s15 + $0x1f4] ss:$8 sps:$4 sm:$0xff]  }
 0x2d4   : > { %v4206_v54 = vpack.c.bf16 %v4110_v60, %v4106_v24  ;;  %2407 = vmatprep.mubr.bf16.mxu1 %v8028_v16  ;;  %4888 = vmatpush1.bf16.msra.mxu0 %v7204_v27  ;;  %v7215_v24 = vld [vmem:[%s8627_s15 + $0x1d4] ss:$8 sps:$4 sm:$0xff]   ;;  %v7213_v61 = vld [vmem:[%s8627_s15 + $0x1d0] ss:$8 sps:$4 sm:$0xff]   ;;  %v8038_v60 = vld [vmem:[#allocation3 + $0xc4] ss:$8 sps:$4 sm:$0xff]  }
 0x2d5   : > { %v4207_v7 = vpack.c.bf16 %v4111_v21, %v4107_v8  ;;  %4889 = vmatprep.subr.bf16.mxu0 %v7209_v40  ;;  %v8037_v8 = vld [vmem:[#allocation3 + $0xb0] ss:$8 sps:$4 sm:$0xff]   ;;  %v7218_v21 = vld [vmem:[%s8627_s15 + $0x1e4] ss:$8 sps:$4 sm:$0xff]  }
 0x2d6   : > { %v9791_v33 = vpop.f32.mrb[112].mxu1 }
 0x2d7   : > { %4856 = vmatprep.mubr.bf16.mxu0 %v4207_v7  ;;  %v9793_v30 = vpop.f32.mrb[113].mxu1 }
 0x2d8   : > { %v9795_v26 = vpop.f32.mrb[114].mxu1  ;;  %4890 = vmatpush1.bf16.msra.mxu0 %v7207_v6  ;;  %v8040_v6 = vld [vmem:[#allocation3 + $0xd4] ss:$8 sps:$4 sm:$0xff]  }
 0x2d9   : > { %v9798_v48 = vpop.f32.mrb[115].mxu1  ;;  %4891 = vmatprep.subr.bf16.mxu0 %v7212_v31 }
 0x2da   : > { %4857 = vmatmul.mubr.bf16.gmra.mrb[188].mxu0 %v4206_v54  ;;  %v7216_v54 = vld [vmem:[%s8627_s15 + $0x1e0] ss:$8 sps:$4 sm:$0xff]  }
 0x2db   : > { %2408 = vmatmul.mubr.bf16.gmra.mrb[220].mxu1 %v8029_v17  ;;  %v7219_v17 = vld [vmem:[%s8627_s15 + $0x1f0] ss:$8 sps:$4 sm:$0xff]  }
 0x2dc   : > { %2417 = vmatprep.mubr.bf16.mxu1 %v8030_v1  ;;  %4892 = vmatpush1.bf16.msra.mxu0 %v7210_v46  ;;  %v8039_v1 = vld [vmem:[#allocation3 + $0xc0] ss:$8 sps:$4 sm:$0xff]   ;;  %v8042_v46 = vld [vmem:[#allocation3 + $0xe4] ss:$8 sps:$4 sm:$0xff]  }
 0x2dd   : > { %4893 = vmatprep.subr.bf16.mxu0 %v7215_v24 }
 0x2de   : > { %v9801_v63 = vpop.f32.mrb[116].mxu1 }
 0x2df   : > { %10719 = vst [vmem:[#allocation22_spill] sm:$0xff] %v9801_v63  ;;  %v9803_v22 = vpop.f32.mrb[117].mxu1 }
 0x2e0   : > { %10720 = vst [vmem:[#allocation23_spill] sm:$0xff] %v9803_v22  ;;  %v9805_v35 = vpop.f32.mrb[118].mxu1  ;;  %4894 = vmatpush1.bf16.msra.mxu0 %v7213_v61  ;;  %v8043_v61 = vld [vmem:[#allocation3 + $0xe0] ss:$8 sps:$4 sm:$0xff]  }
 0x2e1   : > { %v9807_v39 = vpop.f32.mrb[119].mxu1  ;;  %4895 = vmatprep.subr.bf16.mxu0 %v7218_v21 }
 0x2e3   : > { %2418 = vmatmul.mubr.bf16.gmra.mrb[224].mxu1 %v8031_v28 }
 0x2e4   : > { %2427 = vmatprep.mubr.bf16.mxu1 %v8032_v12  ;;  %4896 = vmatpush1.bf16.msra.mxu0 %v7216_v54 }
 0x2e5   : > { %4897 = vmatprep.subr.bf16.mxu0 %v7221_v34 }
 0x2e6   : > { %v9811_v56 = vpop.f32.mrb[120].mxu1 }
 0x2e7   : > { %v9813_v38 = vpop.f32.mrb[121].mxu1 }
 0x2e8   : > { %v9815_v52 = vpop.f32.mrb[122].mxu1  ;;  %4898 = vmatpush1.bf16.msra.mxu0 %v7219_v17  ;;  %v8045_v17 = vld [vmem:[#allocation3 + $0xf0] ss:$8 sps:$4 sm:$0xff]  }
 0x2e9   : > { %v9817_v41 = vpop.f32.mrb[123].mxu1 }
 0x2eb   : > { %2428 = vmatmul.mubr.bf16.gmra.mrb[228].mxu1 %v8033_v29 }
 0x2ec   : > { %2437 = vmatprep.mubr.bf16.mxu1 %v8034_v59  ;;  %v8041_v59 = vld [vmem:[#allocation3 + $0xd0] ss:$8 sps:$4 sm:$0xff]  }
 0x2ee   : > { %v9821_v55 = vpop.f32.mrb[124].mxu1 }
 0x2ef   : > { %v9823_v62 = vpop.f32.mrb[125].mxu1 }
 0x2f0   : > { %v9825_v43 = vpop.f32.mrb[126].mxu1 }
 0x2f1   : > { %v9827_v10 = vpop.f32.mrb[127].mxu1 }
 0x2f3   : > { %2438 = vmatmul.mubr.bf16.gmra.mrb[232].mxu1 %v8035_v11 }
 0x2f4   : > { %2447 = vmatprep.mubr.bf16.mxu1 %v8036_v37 }
 0x2f6   : > { %v9829_v32 = vpop.f32.mrb[128].mxu1 }
 0x2f7   : > { %v9831_v50 = vpop.f32.mrb[129].mxu1 }
 0x2f8   : > { %v9833_v57 = vpop.f32.mrb[130].mxu1 }
 0x2f9   : > { %v9835_v20 = vpop.f32.mrb[131].mxu1 }
 0x2fb   : > { %2448 = vmatmul.mubr.bf16.gmra.mrb[236].mxu1 %v8037_v8  ;;  %v8044_v8 = vld [vmem:[#allocation3 + $0xf4] ss:$8 sps:$4 sm:$0xff]  }
 0x2fc   : > { %2457 = vmatprep.mubr.bf16.mxu1 %v8038_v60 }
 0x2fe   : > { %v9840_v36 = vpop.f32.mrb[132].mxu1 }
 0x2ff   : > { %v9843_v16 = vpop.f32.mrb[133].mxu1 }
 0x300   : > { %v9845_v7 = vpop.f32.mrb[134].mxu1 }
 0x301   : > { %v9847_v27 = vpop.f32.mrb[135].mxu1 }
 0x303   : > { %2458 = vmatmul.mubr.bf16.gmra.mrb[240].mxu1 %v8039_v1  ;;  %v8046_v1 = vld [vmem:[#allocation3 + $0x104] ss:$8 sps:$4 sm:$0xff]  }
 0x304   : > { %2467 = vmatprep.mubr.bf16.mxu1 %v8040_v6 }
 0x306   : > { %v9851_v40 = vpop.f32.mrb[136].mxu1 }
 0x307   : > { %10721 = vst [vmem:[#allocation24_spill] sm:$0xff] %v9851_v40  ;;  %v9853_v28 = vpop.f32.mrb[137].mxu1 }
 0x308   : > { %10722 = vst [vmem:[#allocation25_spill] sm:$0xff] %v9853_v28  ;;  %v9855_v12 = vpop.f32.mrb[138].mxu1 }
 0x309   : > { %10723 = vst [vmem:[#allocation26_spill] sm:$0xff] %v9855_v12  ;;  %v9857_v29 = vpop.f32.mrb[139].mxu1 }
 0x30a   : > { %10724 = vst [vmem:[#allocation27_spill] sm:$0xff] %v9857_v29 }
 0x30b   : > { %2468 = vmatmul.mubr.bf16.gmra.mrb[244].mxu1 %v8041_v59 }
 0x30c   : > { %2477 = vmatprep.mubr.bf16.mxu1 %v8042_v46 }
 0x30e   : > { %v9859_v31 = vpop.f32.mrb[140].mxu1 }
 0x30f   : > { %10725 = vst [vmem:[#allocation28_spill] sm:$0xff] %v9859_v31  ;;  %v9861_v11 = vpop.f32.mrb[141].mxu1 }
 0x310   : > { %10726 = vst [vmem:[#allocation29_spill] sm:$0xff] %v9861_v11  ;;  %v9863_v37 = vpop.f32.mrb[142].mxu1 }
 0x311   : > { %10727 = vst [vmem:[#allocation30_spill] sm:$0xff] %v9863_v37  ;;  %v9865_v24 = vpop.f32.mrb[143].mxu1 }
 0x312   : > { %10728 = vst [vmem:[#allocation31_spill] sm:$0xff] %v9865_v24 }
 0x313   : > { %2478 = vmatmul.mubr.bf16.gmra.mrb[248].mxu1 %v8043_v61 }
 0x314   : > { %2487 = vmatprep.mubr.bf16.mxu1 %v8044_v8  ;;  %v8047_v8 = vld [vmem:[#allocation3 + $0x100] ss:$8 sps:$4 sm:$0xff]  }
 0x316   : > { %v9867_v60 = vpop.f32.mrb[144].mxu1 }
 0x317   : > { %10729 = vst [vmem:[#allocation32_spill] sm:$0xff] %v9867_v60  ;;  %v9869_v21 = vpop.f32.mrb[145].mxu1  ;;  %v8048_v60 = vld [vmem:[#allocation3 + $0x114] ss:$8 sps:$4 sm:$0xff]  }
 0x318   : > { %10730 = vst [vmem:[#allocation33_spill] sm:$0xff] %v9869_v21  ;;  %v9871_v54 = vpop.f32.mrb[146].mxu1 }
 0x319   : > { %10731 = vst [vmem:[#allocation34_spill] sm:$0xff] %v9871_v54  ;;  %v9873_v34 = vpop.f32.mrb[147].mxu1 }
 0x31a   : > { %10732 = vst [vmem:[#allocation35_spill] sm:$0xff] %v9873_v34 }
 0x31b   : > { %2488 = vmatmul.mubr.bf16.gmra.mrb[252].mxu1 %v8045_v17 }
 0x31c   : > { %2497 = vmatprep.mubr.bf16.mxu1 %v8046_v1  ;;  %v8049_v1 = vld [vmem:[#allocation3 + $0x110] ss:$8 sps:$4 sm:$0xff]  }
 0x31e   : > { %v9875_v6 = vpop.f32.mrb[148].mxu1 }
 0x31f   : > { %10733 = vst [vmem:[#allocation36_spill] sm:$0xff] %v9875_v6  ;;  %v9877_v59 = vpop.f32.mrb[149].mxu1  ;;  %v8050_v6 = vld [vmem:[#allocation3 + $0x124] ss:$8 sps:$4 sm:$0xff]  }
 0x320   : > { %10734 = vst [vmem:[#allocation37_spill] sm:$0xff] %v9877_v59  ;;  %v9879_v46 = vpop.f32.mrb[150].mxu1 }
 0x321   : > { %10735 = vst [vmem:[#allocation38_spill] sm:$0xff] %v9879_v46  ;;  %v9881_v61 = vpop.f32.mrb[151].mxu1 }
 0x322   : > { %10736 = vst [vmem:[#allocation39_spill] sm:$0xff] %v9881_v61 }
 0x323   : > { %2498 = vmatmul.mubr.bf16.gmra.mrb[0].mxu1 %v8047_v8 }
 0x324   : > { %2507 = vmatprep.mubr.bf16.mxu1 %v8048_v60  ;;  %v8051_v60 = vld [vmem:[#allocation3 + $0x120] ss:$8 sps:$4 sm:$0xff]  }
 0x326   : > { %v9883_v21 = vpop.f32.mrb[152].mxu1 }
 0x327   : > { %10737 = vst [vmem:[#allocation40_spill] sm:$0xff] %v9883_v21  ;;  %v9885_v54 = vpop.f32.mrb[153].mxu1  ;;  %v8052_v21 = vld [vmem:[#allocation3 + $0x134] ss:$8 sps:$4 sm:$0xff]  }
 0x328   : > { %10738 = vst [vmem:[#allocation41_spill] sm:$0xff] %v9885_v54  ;;  %v9887_v34 = vpop.f32.mrb[154].mxu1 }
 0x329   : > { %10739 = vst [vmem:[#allocation42_spill] sm:$0xff] %v9887_v34  ;;  %v9889_v17 = vpop.f32.mrb[155].mxu1 }
 0x32a   : > { %10740 = vst [vmem:[#allocation43_spill] sm:$0xff] %v9889_v17 }
 0x32b   : > { %2508 = vmatmul.mubr.bf16.gmra.mrb[4].mxu1 %v8049_v1 }
 0x32c   : > { %2517 = vmatprep.mubr.bf16.mxu1 %v8050_v6  ;;  %v8053_v6 = vld [vmem:[#allocation3 + $0x130] ss:$8 sps:$4 sm:$0xff]  }
 0x32e   : > { %v9891_v59 = vpop.f32.mrb[156].mxu1 }
 0x32f   : > { %10741 = vst [vmem:[#allocation44_spill] sm:$0xff] %v9891_v59  ;;  %v9893_v46 = vpop.f32.mrb[157].mxu1  ;;  %v8054_v59 = vld [vmem:[#allocation3 + $0x144] ss:$8 sps:$4 sm:$0xff]  }
 0x330   : > { %10742 = vst [vmem:[#allocation45_spill] sm:$0xff] %v9893_v46  ;;  %v9895_v61 = vpop.f32.mrb[158].mxu1 }
 0x331   : > { %10743 = vst [vmem:[#allocation46_spill] sm:$0xff] %v9895_v61  ;;  %v9897_v8 = vpop.f32.mrb[159].mxu1 }
 0x332   : > { %10744 = vst [vmem:[#allocation47_spill] sm:$0xff] %v9897_v8 }
 0x333   : > { %2518 = vmatmul.mubr.bf16.gmra.mrb[8].mxu1 %v8051_v60 }
 0x334   : > { %2527 = vmatprep.mubr.bf16.mxu1 %v8052_v21  ;;  %v8055_v21 = vld [vmem:[#allocation3 + $0x140] ss:$8 sps:$4 sm:$0xff]  }
 0x336   : > { %v9899_v54 = vpop.f32.mrb[160].mxu1 }
 0x337   : > { %10745 = vst [vmem:[#allocation48_spill] sm:$0xff] %v9899_v54  ;;  %v9901_v34 = vpop.f32.mrb[161].mxu1  ;;  %v8056_v54 = vld [vmem:[#allocation3 + $0x154] ss:$8 sps:$4 sm:$0xff]  }
 0x338   : > { %10746 = vst [vmem:[#allocation49_spill] sm:$0xff] %v9901_v34  ;;  %v9903_v17 = vpop.f32.mrb[162].mxu1 }
 0x339   : > { %10747 = vst [vmem:[#allocation50_spill] sm:$0xff] %v9903_v17  ;;  %v9905_v1 = vpop.f32.mrb[163].mxu1 }
 0x33a   : > { %10748 = vst [vmem:[#allocation51_spill] sm:$0xff] %v9905_v1 }
 0x33b   : > { %2528 = vmatmul.mubr.bf16.gmra.mrb[12].mxu1 %v8053_v6 }
 0x33c   : > { %2537 = vmatprep.mubr.bf16.mxu1 %v8054_v59  ;;  %v6293_v59 = vmul.f32 -1.442695, %v9719_v23 }
 0x33e   : > { %v9907_v46 = vpop.f32.mrb[164].mxu1  ;;  %7606 = vpow2.f32 %v6293_v59  ;;  %v6305_v59 = vmul.f32 -1.442695, %v9750_v3 }
 0x33f   : > { %10749 = vst [vmem:[#allocation52_spill] sm:$0xff] %v9907_v46  ;;  %v9909_v61 = vpop.f32.mrb[165].mxu1 }
 0x340   : > { %10750 = vst [vmem:[#allocation53_spill] sm:$0xff] %v9909_v61  ;;  %v9911_v8 = vpop.f32.mrb[166].mxu1 }
 0x341   : > { %10751 = vst [vmem:[#allocation54_spill] sm:$0xff] %v9911_v8  ;;  %v9913_v60 = vpop.f32.mrb[167].mxu1 }
 0x342   : > { %10752 = vst [vmem:[#allocation55_spill] sm:$0xff] %v9913_v60 }
 0x343   : > { %2538 = vmatmul.mubr.bf16.gmra.mrb[16].mxu1 %v8055_v21 }
 0x344   : > { %2547 = vmatprep.mubr.bf16.mxu1 %v8056_v54  ;;  %v6294_v54 = vmul.f32 -1.442695, %v9723_v18 }
 0x346   : > { %v9915_v34 = vpop.f32.mrb[168].mxu1  ;;  %7608 = vpow2.f32 %v6294_v54 }
 0x347   : > { %10753 = vst [vmem:[#allocation56_spill] sm:$0xff] %v9915_v34  ;;  %v9917_v17 = vpop.f32.mrb[169].mxu1 }
 0x348   : > { %10754 = vst [vmem:[#allocation57_spill] sm:$0xff] %v9917_v17  ;;  %v9919_v1 = vpop.f32.mrb[170].mxu1  ;;  %v6297_v17 = vmul.f32 -1.442695, %v9726_v19 }
 0x349   : > { %10755 = vst [vmem:[#allocation58_spill] sm:$0xff] %v9919_v1  ;;  %v9921_v6 = vpop.f32.mrb[171].mxu1 }
 0x34a   : > { %10756 = vst [vmem:[#allocation59_spill] sm:$0xff] %v9921_v6  ;;  %v6298_v6 = vmul.f32 -1.442695, %v9729_v2  ;;  %7610 = vpow2.f32 %v6297_v17  ;;  %v6309_v17 = vmul.f32 -1.442695, %v9759_v51 }
 0x34b   : > { %2548 = vmatmul.mubr.bf16.gmra.mrb[20].mxu1 %v9521_v5  ;;  %v6301_v5 = vmul.f32 -1.442695, %v9741_v9 }
 0x34c   : > { %2557 = vmatprep.mubr.bf16.mxu1 %v9528_v4  ;;  %7612 = vpow2.f32 %v6298_v6 }
 0x34d   : > { %7614 = vpow2.f32 %v6301_v5 }
 0x34e   : > { %v9926_v8 = vpop.f32.mrb[172].mxu1 }
 0x34f   : > { %10757 = vst [vmem:[#allocation60_spill] sm:$0xff] %v9926_v8  ;;  %v9928_v60 = vpop.f32.mrb[173].mxu1 }
 0x350   : > { %10758 = vst [vmem:[#allocation61_spill] sm:$0xff] %v9928_v60  ;;  %v9931_v21 = vpop.f32.mrb[174].mxu1 }
 0x351   : > { %10759 = vst [vmem:[#allocation62_spill] sm:$0xff] %v9931_v21  ;;  %v9934_v34 = vpop.f32.mrb[175].mxu1  ;;  %v6302_v21 = vmul.f32 -1.442695, %v9745_v53 }
 0x352   : > { %10760 = vst [vmem:[#allocation63_spill] sm:$0xff] %v9934_v34 }
 0x353   : > { %2558 = vmatmul.mubr.bf16.gmra.mrb[24].mxu1 %v9562_v49  ;;  %v6306_v49 = vmul.f32 -1.442695, %v9754_v0  ;;  %7616 = vpow2.f32 %v6302_v21 }
 0x354   : > { %2567 = vmatprep.mubr.bf16.mxu1 %v9569_v25  ;;  %v7607_v25 = vpop.eup %7606  ;;  %7618 = vpow2.f32 %v6305_v59 }
 0x355   : > { %v7609_v6 = vpop.eup %7608  ;;  %7620 = vpow2.f32 %v6306_v49 }
 0x356   : > { %v9940_v4 = vpop.f32.mrb[176].mxu1  ;;  %v7611_v5 = vpop.eup %7610  ;;  %7622 = vpow2.f32 %v6309_v17  ;;  %v6314_v17 = vmul.f32 -1.442695, %v9770_v13 }
 0x357   : > { %10761 = vst [vmem:[#allocation64_spill] sm:$0xff] %v9940_v4  ;;  %v9942_v60 = vpop.f32.mrb[177].mxu1  ;;  %v7613_v4 = vpop.eup %7612  ;;  %v3160_v46 = vadd.f32 1.0, %v7611_v5 }
 0x358   : > { %10762 = vst [vmem:[#allocation65_spill] sm:$0xff] %v9942_v60  ;;  %v9945_v34 = vpop.f32.mrb[178].mxu1  ;;  %v3156_v60 = vadd.f32 1.0, %v7607_v25  ;;  %v7615_v21 = vpop.eup %7614  ;;  %v3161_v59 = vadd.f32 1.0, %v7613_v4 }
 0x359   : > { %10763 = vst [vmem:[#allocation66_spill] sm:$0xff] %v9945_v34  ;;  %v9948_v8 = vpop.f32.mrb[179].mxu1  ;;  %v3164_v49 = vadd.f32 1.0, %v7615_v21 }
 0x35a   : > { %10764 = vst [vmem:[#allocation67_spill] sm:$0xff] %v9948_v8  ;;  %v6310_v8 = vmul.f32 -1.442695, %v9763_v15  ;;  %7624 = vrcp.f32 %v3156_v60  ;;  %v6318_v60 = vmul.f32 -1.442695, %v9779_v44 }
 0x35b   : > { %2568 = vmatmul.mubr.bf16.gmra.mrb[28].mxu1 %v9600_v42  ;;  %v3157_v42 = vadd.f32 1.0, %v7609_v6  ;;  %v6317_v6 = vmul.f32 -1.442695, %v9776_v47 }
 0x35c   : > { %7626 = vpow2.f32 %v6310_v8 }
 0x35d   : > { %7628 = vrcp.f32 %v3157_v42  ;;  %v7617_v25 = vpop.eup %7616 }
 0x35e   : > { %v9953_v54 = vpop.f32.mrb[180].mxu1  ;;  %7630 = vrcp.f32 %v3160_v46  ;;  %v7619_v24 = vpop.eup %7618  ;;  %v3165_v5 = vadd.f32 1.0, %v7617_v25  ;;  %v6325_v25 = vmul.f32 -1.442695, %v9791_v33 }
 0x35f   : > { %10765 = vst [vmem:[#allocation68_spill] sm:$0xff] %v9953_v54  ;;  %v9955_v34 = vpop.f32.mrb[181].mxu1  ;;  %v6313_v54 = vmul.f32 -1.442695, %v9767_v58  ;;  %7632 = vrcp.f32 %v3161_v59  ;;  %v7621_v4 = vpop.eup %7620  ;;  %v3168_v21 = vadd.f32 1.0, %v7619_v24 }
 0x360   : > { %10766 = vst [vmem:[#allocation69_spill] sm:$0xff] %v9955_v34  ;;  %v9958_v1 = vpop.f32.mrb[182].mxu1  ;;  %v7623_v46 = vpop.eup %7622  ;;  %v6321_v59 = vmul.f32 -1.442695, %v9783_v45 }
 0x361   : > { %10767 = vst [vmem:[#allocation70_spill] sm:$0xff] %v9958_v1  ;;  %v9960_v61 = vpop.f32.mrb[183].mxu1  ;;  %7634 = vpow2.f32 %v6313_v54  ;;  %v3172_v54 = vadd.f32 1.0, %v7623_v46 }
 0x362   : > { %10768 = vst [vmem:[#allocation71_spill] sm:$0xff] %v9960_v61  ;;  %7636 = vrcp.f32 %v3164_v49 }
 0x363   : > { %7638 = vpow2.f32 %v6314_v17 }
 0x364   : > { %7640 = vpow2.f32 %v6317_v6  ;;  %v7625_v1 = vpop.eup %7624  ;;  %v6326_v6 = vmul.f32 -1.442695, %v9793_v30 }
 0x365   : > { %7642 = vpow2.f32 %v6318_v60 }
 0x366   : > { %v9964_v34 = vpop.f32.mrb[184].mxu1  ;;  %7644 = vrcp.f32 %v3165_v5 }
 0x367   : > { %10769 = vst [vmem:[#allocation72_spill] sm:$0xff] %v9964_v34  ;;  %v9967_v61 = vpop.f32.mrb[185].mxu1  ;;  %v3169_v34 = vadd.f32 1.0, %v7621_v4  ;;  %7646 = vrcp.f32 %v3168_v21 }
 0x368   : > { %10770 = vst [vmem:[#allocation73_spill] sm:$0xff] %v9967_v61  ;;  %v9970_v8 = vpop.f32.mrb[186].mxu1  ;;  %v7627_v61 = vpop.eup %7626  ;;  %7648 = vpow2.f32 %v6321_v59 }
 0x369   : > { %10771 = vst [vmem:[#allocation74_spill] sm:$0xff] %v9970_v8  ;;  %v9972_v42 = vpop.f32.mrb[187].mxu1  ;;  %v6322_v8 = vmul.f32 -1.442695, %v9787_v14  ;;  %v7629_v49 = vpop.eup %7628  ;;  %7650 = vrcp.f32 %v3169_v34  ;;  %v3173_v5 = vadd.f32 1.0, %v7627_v61 }
 0x36a   : > { %10772 = vst [vmem:[#allocation75_spill] sm:$0xff] %v9972_v42  ;;  %v7631_v17 = vpop.eup %7630  ;;  %7652 = vrcp.f32 %v3172_v54  ;;  %v6330_v42 = vmul.f32 -1.442695, %v9798_v48  ;;  %v6333_v34 = vmul.f32 -1.442695, %v9801_v63 }
 0x36b   : > { %v7633_v4 = vpop.eup %7632  ;;  %7654 = vpow2.f32 %v6322_v8  ;;  %v6334_v8 = vmul.f32 -1.442695, %v9803_v22 }
 0x36c   : > { %v7635_v21 = vpop.eup %7634  ;;  %7656 = vpow2.f32 %v6325_v25  ;;  %v3736_v25 = vmul.f32 %v7631_v17, %v9726_v19  ;;  %v3737_v63 = vmul.f32 %v7633_v4, %v9729_v2  ;;  %v6337_v19 = vmul.f32 -1.442695, %v9805_v35 }
 0x36d   : > { %v7637_v59 = vpop.eup %7636  ;;  %7658 = vpow2.f32 %v6326_v6  ;;  %v3176_v54 = vadd.f32 1.0, %v7635_v21 }
 0x36e   : > { %v9976_v37 = vpop.f32.mrb[188].mxu1  ;;  %7660 = vrcp.f32 %v3173_v5  ;;  %v3740_v4 = vmul.f32 %v7637_v59, %v9741_v9 }
 0x36f   : > { %10773 = vst [vmem:[#allocation76_spill] sm:$0xff] %v9976_v37  ;;  %v9979_v24 = vpop.f32.mrb[189].mxu1  ;;  %v6329_v37 = vmul.f32 -1.442695, %v9795_v26 }
 0x370   : > { %10774 = vst [vmem:[#allocation77_spill] sm:$0xff] %v9979_v24  ;;  %v9982_v60 = vpop.f32.mrb[190].mxu1  ;;  %v7639_v24 = vpop.eup %7638 }
 0x371   : > { %10775 = vst [vmem:[#allocation78_spill] sm:$0xff] %v9982_v60  ;;  %v9984_v46 = vpop.f32.mrb[191].mxu1  ;;  %v7641_v11 = vpop.eup %7640  ;;  %v3732_v60 = vmul.f32 %v7625_v1, %v9719_v23  ;;  %7662 = vpow2.f32 %v6329_v37  ;;  %v3177_v12 = vadd.f32 1.0, %v7639_v24 }
 0x372   : > { %10776 = vst [vmem:[#allocation79_spill] sm:$0xff] %v9984_v46  ;;  %v7643_v61 = vpop.eup %7642  ;;  %v3733_v46 = vmul.f32 %v7629_v49, %v9723_v18  ;;  %7664 = vpow2.f32 %v6330_v42  ;;  %v3180_v23 = vadd.f32 1.0, %v7641_v11 }
 0x373   : > { %v7645_v29 = vpop.eup %7644  ;;  %7666 = vpow2.f32 %v6333_v34  ;;  %v3181_v18 = vadd.f32 1.0, %v7643_v61 }
 0x374   : > { %v7647_v40 = vpop.eup %7646  ;;  %7668 = vrcp.f32 %v3176_v54  ;;  %v3741_v54 = vmul.f32 %v7645_v29, %v9745_v53 }
 0x375   : > { %v7649_v21 = vpop.eup %7648  ;;  %7670 = vpow2.f32 %v6334_v8  ;;  %v3744_v8 = vmul.f32 %v7647_v40, %v9750_v3  ;;  %v6345_v3 = vmul.f32 -1.442695, %v9815_v52 }
 0x376   : > { %v2339_v31 = vpop.f32.mrb[192].mxu1  ;;  %v7651_v22 = vpop.eup %7650  ;;  %7672 = vrcp.f32 %v3177_v12  ;;  %v3184_v11 = vadd.f32 1.0, %v7649_v21 }
 0x377   : > { %v3924_v6 = vmul.f32 %v3732_v60, %v2339_v31  ;;  %v2341_v28 = vpop.f32.mrb[193].mxu1  ;;  %v7653_v42 = vpop.eup %7652  ;;  %v6338_v31 = vmul.f32 -1.442695, %v9807_v39  ;;  %7674 = vrcp.f32 %v3180_v23  ;;  %v3745_v59 = vmul.f32 %v7651_v22, %v9754_v0 }
 0x378   : > { %v3925_v1 = vmul.f32 %v3733_v46, %v2341_v28  ;;  %v2343_v5 = vpop.f32.mrb[194].mxu1  ;;  %v7655_v2 = vpop.eup %7654  ;;  %7676 = vrcp.f32 %v3181_v18  ;;  %v6341_v46 = vmul.f32 -1.442695, %v9811_v56 }
 0x379   : > { %v3928_v37 = vmul.f32 %v3736_v25, %v2343_v5  ;;  %v2345_v49 = vpop.f32.mrb[195].mxu1  ;;  %v7657_v60 = vpop.eup %7656  ;;  %7678 = vpow2.f32 %v6337_v19  ;;  %v3185_v25 = vadd.f32 1.0, %v7655_v2 }
 0x37a   : > { %v3929_v24 = vmul.f32 %v3737_v63, %v2345_v49  ;;  %v7659_v34 = vpop.eup %7658  ;;  %v6342_v63 = vmul.f32 -1.442695, %v9813_v38  ;;  %7680 = vpow2.f32 %v6338_v31 }
 0x37b   : > { %v4116_v17 = vpack.c.bf16 %v3928_v37, %v3924_v6  ;;  %v7661_v61 = vpop.eup %7660  ;;  %7682 = vrcp.f32 %v3184_v11  ;;  %v3189_v21 = vadd.f32 1.0, %v7659_v34  ;;  %v3748_v11 = vmul.f32 %v7653_v42, %v9759_v51 }
 0x37c   : > { %v4117_v28 = vpack.c.bf16 %v3929_v24, %v3925_v1  ;;  %v7663_v9 = vpop.eup %7662  ;;  %v3188_v1 = vadd.f32 1.0, %v7657_v60  ;;  %7684 = vpow2.f32 %v6341_v46  ;;  %v6346_v46 = vmul.f32 -1.442695, %v9817_v41 }
 0x37d   : > { %v7665_v29 = vpop.eup %7664  ;;  %7686 = vpow2.f32 %v6342_v63  ;;  %v3192_v24 = vadd.f32 1.0, %v7663_v9  ;;  %v6349_v42 = vmul.f32 -1.442695, %v9821_v55  ;;  %v6350_v9 = vmul.f32 -1.442695, %v9823_v62 }
 0x37e   : > { %v2349_v12 = vpop.f32.mrb[196].mxu1  ;;  %4899 = vmatprep.mubr.bf16.mxu0 %v4117_v28  ;;  %v7667_v49 = vpop.eup %7666  ;;  %7688 = vrcp.f32 %v3185_v25  ;;  %v3193_v0 = vadd.f32 1.0, %v7665_v29 }
 0x37f   : > { %v3932_v6 = vmul.f32 %v3740_v4, %v2349_v12  ;;  %v2351_v23 = vpop.f32.mrb[197].mxu1  ;;  %4900 = vmatmul.mubr.bf16.vlgmr.msra.gmra.mrb[96].mxu0 %v4116_v17  ;;  %v7669_v19 = vpop.eup %7668  ;;  %7690 = vrcp.f32 %v3188_v1  ;;  %v3196_v28 = vadd.f32 1.0, %v7667_v49  ;;  %v3749_v4 = vmul.f32 %v7661_v61, %v9763_v15 }
 0x380   : > { %v3933_v5 = vmul.f32 %v3741_v54, %v2351_v23  ;;  %v2353_v53 = vpop.f32.mrb[198].mxu1  ;;  %v7671_v17 = vpop.eup %7670  ;;  %7692 = vrcp.f32 %v3189_v21  ;;  %v3752_v63 = vmul.f32 %v7669_v19, %v9767_v58  ;;  %v6354_v19 = vmul.f32 -1.442695, %v9827_v10 }
 0x381   : > { %v3936_v18 = vmul.f32 %v3744_v8, %v2353_v53  ;;  %v2355_v37 = vpop.f32.mrb[199].mxu1  ;;  %v7673_v2 = vpop.eup %7672  ;;  %7694 = vpow2.f32 %v6345_v3  ;;  %v3197_v12 = vadd.f32 1.0, %v7671_v17 }
 0x382   : > { %v3937_v40 = vmul.f32 %v3745_v59, %v2355_v37  ;;  %v7675_v60 = vpop.eup %7674  ;;  %7696 = vrcp.f32 %v3192_v24  ;;  %v3753_v51 = vmul.f32 %v7673_v2, %v9770_v13 }
 0x383   : > { %v4120_v31 = vpack.c.bf16 %v3936_v18, %v3932_v6  ;;  %v7677_v54 = vpop.eup %7676  ;;  %7698 = vrcp.f32 %v3193_v0 }
 0x384   : > { %v4121_v22 = vpack.c.bf16 %v3937_v40, %v3933_v5  ;;  %v7679_v6 = vpop.eup %7678  ;;  %7700 = vrcp.f32 %v3196_v28  ;;  %v6353_v5 = vmul.f32 -1.442695, %v9825_v43  ;;  %v3756_v40 = vmul.f32 %v7675_v60, %v9776_v47 }
 0x385   : > { %v7681_v23 = vpop.eup %7680  ;;  %7702 = vpow2.f32 %v6346_v46  ;;  %v3200_v21 = vadd.f32 1.0, %v7679_v6  ;;  %v6357_v60 = vmul.f32 -1.442695, %v9829_v32 }
 0x386   : > { %v2359_v34 = vpop.f32.mrb[200].mxu1  ;;  %4909 = vmatprep.mubr.bf16.mxu0 %v4121_v22  ;;  %v7683_v58 = vpop.eup %7682  ;;  %7704 = vrcp.f32 %v3197_v12  ;;  %v3201_v37 = vadd.f32 1.0, %v7681_v23 }
 0x387   : > { %v3940_v8 = vmul.f32 %v3748_v11, %v2359_v34  ;;  %v2361_v25 = vpop.f32.mrb[201].mxu1  ;;  %4910 = vmatmul.mubr.bf16.gmra.mrb[100].mxu0 %v4120_v31  ;;  %v7685_v29 = vpop.eup %7684  ;;  %7706 = vpow2.f32 %v6349_v42  ;;  %v3757_v31 = vmul.f32 %v7677_v54, %v9779_v44  ;;  %v3760_v2 = vmul.f32 %v7683_v58, %v9783_v45 }
 0x388   : > { %v3941_v15 = vmul.f32 %v3749_v4, %v2361_v25  ;;  %v2363_v61 = vpop.f32.mrb[202].mxu1  ;;  %v7687_v18 = vpop.eup %7686  ;;  %7708 = vpow2.f32 %v6350_v9  ;;  %v3204_v17 = vadd.f32 1.0, %v7685_v29  ;;  %v6361_v25 = vmul.f32 -1.442695, %v9833_v57 }
 0x389   : > { %v3944_v59 = vmul.f32 %v3752_v63, %v2363_v61  ;;  %v2365_v1 = vpop.f32.mrb[203].mxu1  ;;  %v7689_v3 = vpop.eup %7688  ;;  %7710 = vpow2.f32 %v6353_v5  ;;  %v3205_v11 = vadd.f32 1.0, %v7687_v18  ;;  %v6358_v63 = vmul.f32 -1.442695, %v9831_v50 }
 0x38a   : > { %v3945_v53 = vmul.f32 %v3753_v51, %v2365_v1  ;;  %v7691_v24 = vpop.eup %7690  ;;  %7712 = vrcp.f32 %v3200_v21  ;;  %v3761_v47 = vmul.f32 %v7689_v3, %v9787_v14  ;;  %v6362_v61 = vmul.f32 -1.442695, %v9835_v20 }
 0x38b   : > { %v4124_v13 = vpack.c.bf16 %v3944_v59, %v3940_v8  ;;  %v7693_v22 = vpop.eup %7692  ;;  %7714 = vrcp.f32 %v3201_v37  ;;  %v3764_v59 = vmul.f32 %v7691_v24, %v9791_v33  ;;  %v6365_v1 = vmul.f32 -1.442695, %v9840_v36 }
 0x38c   : > { %v4125_v49 = vpack.c.bf16 %v3945_v53, %v3941_v15  ;;  %v7695_v46 = vpop.eup %7694  ;;  %7716 = vpow2.f32 %v6354_v19  ;;  %v3765_v5 = vmul.f32 %v7693_v22, %v9793_v30  ;;  %v6366_v53 = vmul.f32 -1.442695, %v9843_v16 }
 0x38d   : > { %v7697_v54 = vpop.eup %7696  ;;  %7718 = vrcp.f32 %v3204_v17  ;;  %v3208_v42 = vadd.f32 1.0, %v7695_v46 }
 0x38e   : > { %v2369_v0 = vpop.f32.mrb[204].mxu1  ;;  %4919 = vmatprep.mubr.bf16.mxu0 %v4125_v49  ;;  %v7699_v45 = vpop.eup %7698  ;;  %7720 = vrcp.f32 %v3205_v11 }
 0x38f   : > { %v3948_v28 = vmul.f32 %v3756_v40, %v2369_v0  ;;  %v2371_v4 = vpop.f32.mrb[205].mxu1  ;;  %4920 = vmatmul.mubr.bf16.gmra.mrb[104].mxu0 %v4124_v13  ;;  %v7701_v51 = vpop.eup %7700  ;;  %7722 = vpow2.f32 %v6357_v60  ;;  %v3768_v13 = vmul.f32 %v7697_v54, %v9795_v26  ;;  %v3769_v3 = vmul.f32 %v7699_v45, %v9798_v48  ;;  %v10778_v54 = vld [vmem:[#allocation24_spill] sm:$0xff] }
 0x390   : > { %v3949_v34 = vmul.f32 %v3757_v31, %v2371_v4  ;;  %v2373_v44 = vpop.f32.mrb[206].mxu1  ;;  %v7703_v15 = vpop.eup %7702  ;;  %7724 = vpow2.f32 %v6358_v63  ;;  %v6369_v40 = vmul.f32 -1.442695, %v9845_v7  ;;  %v6370_v48 = vmul.f32 -1.442695, %v9847_v27 }
 0x391   : > { %v3952_v12 = vmul.f32 %v3760_v2, %v2373_v44  ;;  %v2375_v8 = vpop.f32.mrb[207].mxu1  ;;  %v7705_v9 = vpop.eup %7704  ;;  %7726 = vpow2.f32 %v6361_v25  ;;  %v3209_v18 = vadd.f32 1.0, %v7703_v15  ;;  %v6373_v63 = vmul.f32 -1.442695, %v10778_v54  ;;  %v10780_v15 = vld [vmem:[#allocation25_spill] sm:$0xff] }
 0x392   : > { %v3953_v6 = vmul.f32 %v3761_v47, %v2375_v8  ;;  %v7707_v58 = vpop.eup %7706  ;;  %7728 = vrcp.f32 %v3208_v42  ;;  %v10779_v8 = vld [vmem:[#allocation23_spill] sm:$0xff] }
 0x393   : > { %v4128_v14 = vpack.c.bf16 %v3952_v12, %v3948_v28  ;;  %v7709_v21 = vpop.eup %7708  ;;  %7730 = vpow2.f32 %v6362_v61  ;;  %v3212_v31 = vadd.f32 1.0, %v7707_v58  ;;  %v3773_v45 = vmul.f32 %v7705_v9, %v10779_v8  ;;  %v10781_v58 = vld [vmem:[#allocation26_spill] sm:$0xff] }
 0x394   : > { %v4129_v23 = vpack.c.bf16 %v3953_v6, %v3949_v34  ;;  %v7711_v33 = vpop.eup %7710  ;;  %7732 = vpow2.f32 %v6365_v1  ;;  %v3213_v26 = vadd.f32 1.0, %v7709_v21  ;;  %v10777_v34 = vld [vmem:[#allocation22_spill] sm:$0xff]  ;;  %v6374_v61 = vmul.f32 -1.442695, %v10780_v15 }
 0x395   : > { %v7713_v24 = vpop.eup %7712  ;;  %7734 = vpow2.f32 %v6366_v53  ;;  %v3216_v28 = vadd.f32 1.0, %v7711_v33  ;;  %v3772_v44 = vmul.f32 %v7701_v51, %v10777_v34 }
 0x396   : > { %v2379_v29 = vpop.f32.mrb[208].mxu1  ;;  %4929 = vmatprep.mubr.bf16.mxu0 %v4129_v23  ;;  %v7715_v22 = vpop.eup %7714  ;;  %7736 = vrcp.f32 %v3209_v18 }
 0x397   : > { %v3956_v37 = vmul.f32 %v3764_v59, %v2379_v29  ;;  %v2381_v49 = vpop.f32.mrb[209].mxu1  ;;  %4930 = vmatmul.mubr.bf16.gmra.mrb[108].mxu0 %v4128_v14  ;;  %v7717_v11 = vpop.eup %7716  ;;  %7738 = vpow2.f32 %v6369_v40  ;;  %v3776_v14 = vmul.f32 %v7713_v24, %v9805_v35  ;;  %v3777_v1 = vmul.f32 %v7715_v22, %v9807_v39  ;;  %v10782_v39 = vld [vmem:[#allocation27_spill] sm:$0xff] }
 0x398   : > { %v3957_v30 = vmul.f32 %v3765_v5, %v2381_v49  ;;  %v2383_v19 = vpop.f32.mrb[210].mxu1  ;;  %v7719_v46 = vpop.eup %7718  ;;  %7740 = vrcp.f32 %v3212_v31  ;;  %v3217_v25 = vadd.f32 1.0, %v7717_v11  ;;  %v6377_v5 = vmul.f32 -1.442695, %v10781_v58 }
 0x399   : > { %v3960_v17 = vmul.f32 %v3768_v13, %v2383_v19  ;;  %v2385_v0 = vpop.f32.mrb[211].mxu1  ;;  %v7721_v60 = vpop.eup %7720  ;;  %7742 = vrcp.f32 %v3213_v26  ;;  %v6378_v19 = vmul.f32 -1.442695, %v10782_v39 }
 0x39a   : > { %v3961_v2 = vmul.f32 %v3769_v3, %v2385_v0  ;;  %v7723_v12 = vpop.eup %7722  ;;  %7744 = vrcp.f32 %v3216_v28  ;;  %v3781_v26 = vmul.f32 %v7721_v60, %v9813_v38 }
 0x39b   : > { %v4132_v4 = vpack.c.bf16 %v3960_v17, %v3956_v37  ;;  %v7725_v42 = vpop.eup %7724  ;;  %7746 = vpow2.f32 %v6370_v48  ;;  %v3220_v21 = vadd.f32 1.0, %v7723_v12  ;;  %v3780_v17 = vmul.f32 %v7719_v46, %v9811_v56  ;;  %v10783_v46 = vld [vmem:[#allocation28_spill] sm:$0xff] }
 0x39c   : > { %v4133_v47 = vpack.c.bf16 %v3961_v2, %v3957_v30  ;;  %v7727_v51 = vpop.eup %7726  ;;  %7748 = vpow2.f32 %v6373_v63  ;;  %v3221_v37 = vadd.f32 1.0, %v7725_v42  ;;  %v6381_v63 = vmul.f32 -1.442695, %v10783_v46 }
 0x39d   : > { %v7729_v29 = vpop.eup %7728  ;;  %7750 = vrcp.f32 %v3217_v25  ;;  %v3224_v3 = vadd.f32 1.0, %v7727_v51 }
 0x39e   : > { %v2389_v6 = vpop.f32.mrb[212].mxu1  ;;  %4939 = vmatprep.mubr.bf16.mxu0 %v4133_v47  ;;  %v7731_v35 = vpop.eup %7730  ;;  %7752 = vpow2.f32 %v6374_v61 }
 0x39f   : > { %v3964_v23 = vmul.f32 %v3772_v44, %v2389_v6  ;;  %v2391_v59 = vpop.f32.mrb[213].mxu1  ;;  %4940 = vmatmul.mubr.bf16.gmra.mrb[112].mxu0 %v4132_v4  ;;  %v7733_v33 = vpop.eup %7732  ;;  %7754 = vpow2.f32 %v6377_v5  ;;  %v3225_v0 = vadd.f32 1.0, %v7731_v35  ;;  %v3784_v4 = vmul.f32 %v7729_v29, %v9815_v52  ;;  %v10784_v52 = vld [vmem:[#allocation29_spill] sm:$0xff] }
 0x3a0   : > { %v3965_v9 = vmul.f32 %v3773_v45, %v2391_v59  ;;  %v2393_v53 = vpop.f32.mrb[214].mxu1  ;;  %v7735_v30 = vpop.eup %7734  ;;  %7756 = vrcp.f32 %v3220_v21  ;;  %v3228_v2 = vadd.f32 1.0, %v7733_v33  ;;  %v6382_v42 = vmul.f32 -1.442695, %v10784_v52 }
 0x3a1   : > { %v3968_v13 = vmul.f32 %v3776_v14, %v2393_v53  ;;  %v2395_v18 = vpop.f32.mrb[215].mxu1  ;;  %v7737_v31 = vpop.eup %7736  ;;  %7758 = vrcp.f32 %v3221_v37  ;;  %v3229_v48 = vadd.f32 1.0, %v7735_v30 }
 0x3a2   : > { %v3969_v49 = vmul.f32 %v3777_v1, %v2395_v18  ;;  %v7739_v22 = vpop.eup %7738  ;;  %7760 = vrcp.f32 %v3224_v3  ;;  %v3785_v56 = vmul.f32 %v7737_v31, %v9817_v41  ;;  %v10786_v1 = vld [vmem:[#allocation31_spill] sm:$0xff]  ;;  %v10787_v3 = vld [vmem:[#allocation32_spill] sm:$0xff] }
 0x3a3   : > { %v4136_v40 = vpack.c.bf16 %v3968_v13, %v3964_v23  ;;  %v7741_v28 = vpop.eup %7740  ;;  %7762 = vpow2.f32 %v6378_v19  ;;  %v3232_v8 = vadd.f32 1.0, %v7739_v22  ;;  %v10785_v23 = vld [vmem:[#allocation30_spill] sm:$0xff]  ;;  %v6386_v5 = vmul.f32 -1.442695, %v10786_v1 }
 0x3a4   : > { %v4137_v24 = vpack.c.bf16 %v3969_v49, %v3965_v9  ;;  %v7743_v44 = vpop.eup %7742  ;;  %7764 = vrcp.f32 %v3225_v0  ;;  %v6385_v59 = vmul.f32 -1.442695, %v10785_v23  ;;  %v3788_v29 = vmul.f32 %v7741_v28, %v9821_v55 }
 0x3a5   : > { %v7745_v60 = vpop.eup %7744  ;;  %7766 = vrcp.f32 %v3228_v2  ;;  %v3789_v18 = vmul.f32 %v7743_v44, %v9823_v62 }
 0x3a6   : > { %v2399_v11 = vpop.f32.mrb[216].mxu1  ;;  %4949 = vmatprep.mubr.bf16.mxu0 %v4137_v24  ;;  %v7747_v6 = vpop.eup %7746  ;;  %7768 = vrcp.f32 %v3229_v48  ;;  %v3792_v33 = vmul.f32 %v7745_v60, %v9825_v43  ;;  %v10788_v43 = vld [vmem:[#allocation33_spill] sm:$0xff] }
 0x3a7   : > { %v3972_v47 = vmul.f32 %v3780_v17, %v2399_v11  ;;  %v2401_v34 = vpop.f32.mrb[217].mxu1  ;;  %4950 = vmatmul.mubr.bf16.gmra.mrb[116].mxu0 %v4136_v40  ;;  %v7749_v61 = vpop.eup %7748  ;;  %7770 = vpow2.f32 %v6381_v63  ;;  %v3233_v21 = vadd.f32 1.0, %v7747_v6  ;;  %v6389_v40 = vmul.f32 -1.442695, %v10787_v3  ;;  %v10791_v6 = vld [vmem:[#allocation36_spill] sm:$0xff] }
 0x3a8   : > { %v3973_v12 = vmul.f32 %v3781_v26, %v2401_v34  ;;  %v2403_v38 = vpop.f32.mrb[218].mxu1  ;;  %v7751_v51 = vpop.eup %7750  ;;  %7772 = vrcp.f32 %v3232_v8  ;;  %v3236_v35 = vadd.f32 1.0, %v7749_v61  ;;  %v6390_v28 = vmul.f32 -1.442695, %v10788_v43 }
 0x3a9   : > { %v3976_v45 = vmul.f32 %v3784_v4, %v2403_v38  ;;  %v2405_v25 = vpop.f32.mrb[219].mxu1  ;;  %v7753_v53 = vpop.eup %7752  ;;  %7774 = vpow2.f32 %v6382_v42  ;;  %v3793_v55 = vmul.f32 %v7751_v51, %v9827_v10  ;;  %v6397_v42 = vmul.f32 -1.442695, %v10791_v6 }
 0x3aa   : > { %v3977_v14 = vmul.f32 %v3785_v56, %v2405_v25  ;;  %v7755_v13 = vpop.eup %7754  ;;  %7776 = vpow2.f32 %v6385_v59  ;;  %v3237_v31 = vadd.f32 1.0, %v7753_v53  ;;  %v10790_v56 = vld [vmem:[#allocation35_spill] sm:$0xff] }
 0x3ab   : > { %v4140_v41 = vpack.c.bf16 %v3976_v45, %v3972_v47  ;;  %v7757_v49 = vpop.eup %7756  ;;  %7778 = vpow2.f32 %v6386_v5  ;;  %v3240_v22 = vadd.f32 1.0, %v7755_v13  ;;  %v10789_v47 = vld [vmem:[#allocation34_spill] sm:$0xff]  ;;  %v6394_v63 = vmul.f32 -1.442695, %v10790_v56 }
 0x3ac   : > { %v4141_v9 = vpack.c.bf16 %v3977_v14, %v3973_v12  ;;  %v7759_v24 = vpop.eup %7758  ;;  %7780 = vrcp.f32 %v3233_v21  ;;  %v6393_v34 = vmul.f32 -1.442695, %v10789_v47  ;;  %v3796_v60 = vmul.f32 %v7757_v49, %v9829_v32 }
 0x3ad   : > { %v7761_v0 = vpop.eup %7760  ;;  %7782 = vrcp.f32 %v3236_v35  ;;  %v3797_v25 = vmul.f32 %v7759_v24, %v9831_v50 }
 0x3ae   : > { %v2409_v37 = vpop.f32.mrb[220].mxu1  ;;  %4959 = vmatprep.mubr.bf16.mxu0 %v4141_v9  ;;  %v7763_v11 = vpop.eup %7762  ;;  %7784 = vpow2.f32 %v6389_v40  ;;  %v3800_v59 = vmul.f32 %v7761_v0, %v9833_v57 }
 0x3af   : > { %v3980_v30 = vmul.f32 %v3788_v29, %v2409_v37  ;;  %v2411_v19 = vpop.f32.mrb[221].mxu1  ;;  %4960 = vmatmul.mubr.bf16.gmra.mrb[120].mxu0 %v4140_v41  ;;  %v7765_v48 = vpop.eup %7764  ;;  %7786 = vrcp.f32 %v3237_v31  ;;  %v3241_v8 = vadd.f32 1.0, %v7763_v11  ;;  %v10792_v41 = vld [vmem:[#allocation37_spill] sm:$0xff]  ;;  %v10793_v29 = vld [vmem:[#allocation38_spill] sm:$0xff]  ;;  %v10795_v11 = vld [vmem:[#allocation40_spill] sm:$0xff] }
 0x3b0   : > { %v3981_v17 = vmul.f32 %v3789_v18, %v2411_v19  ;;  %v2413_v62 = vpop.f32.mrb[222].mxu1  ;;  %v7767_v10 = vpop.eup %7766  ;;  %7788 = vrcp.f32 %v3240_v22  ;;  %v6398_v51 = vmul.f32 -1.442695, %v10792_v41  ;;  %v3801_v53 = vmul.f32 %v7765_v48, %v9835_v20 }
 0x3b1   : > { %v3984_v26 = vmul.f32 %v3792_v33, %v2413_v62  ;;  %v2415_v2 = vpop.f32.mrb[223].mxu1  ;;  %v7769_v38 = vpop.eup %7768  ;;  %7790 = vpow2.f32 %v6390_v28  ;;  %v6401_v50 = vmul.f32 -1.442695, %v10793_v29  ;;  %v10794_v33 = vld [vmem:[#allocation39_spill] sm:$0xff]  ;;  %v3804_v0 = vmul.f32 %v7767_v10, %v9840_v36 }
 0x3b2   : > { %v3985_v4 = vmul.f32 %v3793_v55, %v2415_v2  ;;  %v7771_v45 = vpop.eup %7770  ;;  %7792 = vpow2.f32 %v6393_v34  ;;  %v6402_v40 = vmul.f32 -1.442695, %v10794_v33  ;;  %v3805_v2 = vmul.f32 %v7769_v38, %v9843_v16 }
 0x3b3   : > { %v4144_v44 = vpack.c.bf16 %v3984_v26, %v3980_v30  ;;  %v7773_v61 = vpop.eup %7772  ;;  %7794 = vpow2.f32 %v6394_v63  ;;  %v3244_v35 = vadd.f32 1.0, %v7771_v45  ;;  %v6405_v28 = vmul.f32 -1.442695, %v10795_v11 }
 0x3b4   : > { %v4145_v12 = vpack.c.bf16 %v3985_v4, %v3981_v17  ;;  %v7775_v32 = vpop.eup %7774  ;;  %7796 = vrcp.f32 %v3241_v8  ;;  %v3808_v34 = vmul.f32 %v7773_v61, %v9845_v7  ;;  %v10798_v61 = vld [vmem:[#allocation43_spill] sm:$0xff] }
 0x3b5   : > { %v7777_v18 = vpop.eup %7776  ;;  %7798 = vpow2.f32 %v6397_v42  ;;  %v3245_v24 = vadd.f32 1.0, %v7775_v32 }
 0x3b6   : > { %v2419_v14 = vpop.f32.mrb[224].mxu1  ;;  %4969 = vmatprep.mubr.bf16.mxu0 %v4145_v12  ;;  %v7779_v57 = vpop.eup %7778  ;;  %7800 = vpow2.f32 %v6398_v51  ;;  %v3248_v31 = vadd.f32 1.0, %v7777_v18  ;;  %v6410_v51 = vmul.f32 -1.442695, %v10798_v61 }
 0x3b7   : > { %v3988_v5 = vmul.f32 %v3796_v60, %v2419_v14  ;;  %v2421_v9 = vpop.f32.mrb[225].mxu1  ;;  %4970 = vmatmul.mubr.bf16.gmra.mrb[124].mxu0 %v4144_v44  ;;  %v7781_v19 = vpop.eup %7780  ;;  %7802 = vpow2.f32 %v6401_v50  ;;  %v3249_v22 = vadd.f32 1.0, %v7779_v57  ;;  %v10796_v44 = vld [vmem:[#allocation41_spill] sm:$0xff]  ;;  %v10799_v57 = vld [vmem:[#allocation44_spill] sm:$0xff] }
 0x3b8   : > { %v3989_v21 = vmul.f32 %v3797_v25, %v2421_v9  ;;  %v2423_v13 = vpop.f32.mrb[226].mxu1  ;;  %v7783_v20 = vpop.eup %7782  ;;  %7804 = vrcp.f32 %v3244_v35  ;;  %v6406_v63 = vmul.f32 -1.442695, %v10796_v44  ;;  %v3809_v10 = vmul.f32 %v7781_v19, %v9847_v27  ;;  %v10797_v25 = vld [vmem:[#allocation42_spill] sm:$0xff] }
 0x3b9   : > { %v3992_v37 = vmul.f32 %v3800_v59, %v2423_v13  ;;  %v2425_v49 = vpop.f32.mrb[227].mxu1  ;;  %v7785_v62 = vpop.eup %7784  ;;  %7806 = vpow2.f32 %v6402_v40  ;;  %v6409_v42 = vmul.f32 -1.442695, %v10797_v25  ;;  %v3812_v18 = vmul.f32 %v7783_v20, %v10778_v54 }
 0x3ba   : > { %v3993_v30 = vmul.f32 %v3801_v53, %v2425_v49  ;;  %v7787_v26 = vpop.eup %7786  ;;  %7808 = vrcp.f32 %v3245_v24  ;;  %v3252_v8 = vadd.f32 1.0, %v7785_v62  ;;  %v6413_v40 = vmul.f32 -1.442695, %v10799_v57 }
 0x3bb   : > { %v4148_v55 = vpack.c.bf16 %v3992_v37, %v3988_v5  ;;  %v7789_v48 = vpop.eup %7788  ;;  %7810 = vrcp.f32 %v3248_v31  ;;  %v3813_v49 = vmul.f32 %v7787_v26, %v10780_v15 }
 0x3bc   : > { %v4149_v17 = vpack.c.bf16 %v3993_v30, %v3989_v21  ;;  %v7791_v36 = vpop.eup %7790  ;;  %7812 = vrcp.f32 %v3249_v22  ;;  %v3816_v24 = vmul.f32 %v7789_v48, %v10781_v58  ;;  %v10800_v58 = vld [vmem:[#allocation45_spill] sm:$0xff] }
 0x3bd   : > { %v7793_v45 = vpop.eup %7792  ;;  %7814 = vpow2.f32 %v6405_v28  ;;  %v3253_v32 = vadd.f32 1.0, %v7791_v36  ;;  %v6414_v48 = vmul.f32 -1.442695, %v10800_v58 }
 0x3be   : > { %v2429_v4 = vpop.f32.mrb[228].mxu1  ;;  %4979 = vmatprep.mubr.bf16.mxu0 %v4149_v17  ;;  %v7795_v7 = vpop.eup %7794  ;;  %7816 = vpow2.f32 %v6406_v63  ;;  %v3256_v50 = vadd.f32 1.0, %v7793_v45  ;;  %v10802_v45 = vld [vmem:[#allocation47_spill] sm:$0xff] }
 0x3bf   : > { %v3996_v12 = vmul.f32 %v3804_v0, %v2429_v4  ;;  %v2431_v60 = vpop.f32.mrb[229].mxu1  ;;  %4980 = vmatmul.mubr.bf16.gmra.mrb[128].mxu0 %v4148_v55  ;;  %v7797_v9 = vpop.eup %7796  ;;  %7818 = vrcp.f32 %v3252_v8  ;;  %v3257_v35 = vadd.f32 1.0, %v7795_v7  ;;  %v10803_v7 = vld [vmem:[#allocation48_spill] sm:$0xff] }
 0x3c0   : > { %v3997_v16 = vmul.f32 %v3805_v2, %v2431_v60  ;;  %v2433_v38 = vpop.f32.mrb[230].mxu1  ;;  %v7799_v27 = vpop.eup %7798  ;;  %7820 = vpow2.f32 %v6409_v42  ;;  %v3817_v54 = vmul.f32 %v7797_v9, %v10782_v39  ;;  %v10801_v39 = vld [vmem:[#allocation46_spill] sm:$0xff]  ;;  %v6418_v42 = vmul.f32 -1.442695, %v10802_v45 }
 0x3c1   : > { %v4000_v14 = vmul.f32 %v3808_v34, %v2433_v38  ;;  %v2435_v59 = vpop.f32.mrb[231].mxu1  ;;  %v7801_v13 = vpop.eup %7800  ;;  %7822 = vpow2.f32 %v6410_v51  ;;  %v3260_v55 = vadd.f32 1.0, %v7799_v27  ;;  %v6421_v51 = vmul.f32 -1.442695, %v10803_v7 }
 0x3c2   : > { %v4001_v5 = vmul.f32 %v3809_v10, %v2435_v59  ;;  %v7803_v37 = vpop.eup %7802  ;;  %7824 = vrcp.f32 %v3253_v32  ;;  %v3261_v20 = vadd.f32 1.0, %v7801_v13  ;;  %v6417_v10 = vmul.f32 -1.442695, %v10801_v39 }
 0x3c3   : > { %v4152_v53 = vpack.c.bf16 %v4000_v14, %v3996_v12  ;;  %v7805_v19 = vpop.eup %7804  ;;  %7826 = vrcp.f32 %v3256_v50  ;;  %v3264_v26 = vadd.f32 1.0, %v7803_v37  ;;  %v10804_v37 = vld [vmem:[#allocation49_spill] sm:$0xff] }
 0x3c4   : > { %v4153_v21 = vpack.c.bf16 %v4001_v5, %v3997_v16  ;;  %v7807_v62 = vpop.eup %7806  ;;  %7828 = vrcp.f32 %v3257_v35  ;;  %v3820_v38 = vmul.f32 %v7805_v19, %v10783_v46 }
 0x3c5   : > { %v7809_v22 = vpop.eup %7808  ;;  %7830 = vpow2.f32 %v6413_v40  ;;  %v3265_v12 = vadd.f32 1.0, %v7807_v62 }
 0x3c6   : > { %v2439_v30 = vpop.f32.mrb[232].mxu1  ;;  %4989 = vmatprep.mubr.bf16.mxu0 %v4153_v21  ;;  %v7811_v4 = vpop.eup %7810  ;;  %7832 = vrcp.f32 %v3260_v55  ;;  %v3821_v59 = vmul.f32 %v7809_v22, %v10784_v52  ;;  %v10806_v22 = vld [vmem:[#allocation51_spill] sm:$0xff] }
 0x3c7   : > { %v4004_v31 = vmul.f32 %v3812_v18, %v2439_v30  ;;  %v2441_v17 = vpop.f32.mrb[233].mxu1  ;;  %4990 = vmatmul.mubr.bf16.gmra.mrb[132].mxu0 %v4152_v53  ;;  %v7813_v63 = vpop.eup %7812  ;;  %7834 = vrcp.f32 %v3261_v20  ;;  %v3824_v32 = vmul.f32 %v7811_v4, %v10785_v23  ;;  %v10807_v4 = vld [vmem:[#allocation52_spill] sm:$0xff] }
 0x3c8   : > { %v4005_v0 = vmul.f32 %v3813_v49, %v2441_v17  ;;  %v2443_v15 = vpop.f32.mrb[234].mxu1  ;;  %v7815_v36 = vpop.eup %7814  ;;  %7836 = vrcp.f32 %v3264_v26  ;;  %v3825_v21 = vmul.f32 %v7813_v63, %v10786_v1  ;;  %v6422_v49 = vmul.f32 -1.442695, %v10804_v37  ;;  %v10805_v1 = vld [vmem:[#allocation50_spill] sm:$0xff] }
 0x3c9   : > { %v4008_v2 = vmul.f32 %v3816_v24, %v2443_v15  ;;  %v2445_v28 = vpop.f32.mrb[235].mxu1  ;;  %v7817_v16 = vpop.eup %7816  ;;  %7838 = vpow2.f32 %v6414_v48  ;;  %v3268_v53 = vadd.f32 1.0, %v7815_v36  ;;  %v6426_v26 = vmul.f32 -1.442695, %v10806_v22 }
 0x3ca   : > { %v4009_v34 = vmul.f32 %v3817_v54, %v2445_v28  ;;  %v7819_v14 = vpop.eup %7818  ;;  %7840 = vrcp.f32 %v3265_v12  ;;  %v3269_v13 = vadd.f32 1.0, %v7817_v16  ;;  %v6425_v54 = vmul.f32 -1.442695, %v10805_v1 }
 0x3cb   : > { %v4156_v60 = vpack.c.bf16 %v4008_v2, %v4004_v31  ;;  %v7821_v9 = vpop.eup %7820  ;;  %7842 = vpow2.f32 %v6417_v10  ;;  %v3828_v15 = vmul.f32 %v7819_v14, %v10787_v3  ;;  %v6429_v48 = vmul.f32 -1.442695, %v10807_v4 }
 0x3cc   : > { %v4157_v8 = vpack.c.bf16 %v4009_v34, %v4005_v0  ;;  %v7823_v46 = vpop.eup %7822  ;;  %7844 = vpow2.f32 %v6418_v42  ;;  %v3272_v23 = vadd.f32 1.0, %v7821_v9 }
 0x3cd   : > { %v7825_v35 = vpop.eup %7824  ;;  %7846 = vpow2.f32 %v6421_v51  ;;  %v3273_v31 = vadd.f32 1.0, %v7823_v46 }
 0x3ce   : > { %v2449_v5 = vpop.f32.mrb[236].mxu1  ;;  %4999 = vmatprep.mubr.bf16.mxu0 %v4157_v8  ;;  %v7827_v19 = vpop.eup %7826  ;;  %7848 = vrcp.f32 %v3268_v53  ;;  %v3829_v28 = vmul.f32 %v7825_v35, %v10788_v43 }
 0x3cf   : > { %v4012_v27 = vmul.f32 %v3820_v38, %v2449_v5  ;;  %v2451_v50 = vpop.f32.mrb[237].mxu1  ;;  %5000 = vmatmul.mubr.bf16.gmra.mrb[136].mxu0 %v4156_v60  ;;  %v7829_v55 = vpop.eup %7828  ;;  %7850 = vrcp.f32 %v3269_v13  ;;  %v3832_v12 = vmul.f32 %v7827_v19, %v10789_v47  ;;  %v10808_v60 = vld [vmem:[#allocation53_spill] sm:$0xff]  ;;  %v10809_v47 = vld [vmem:[#allocation54_spill] sm:$0xff] }
 0x3d0   : > { %v4013_v18 = vmul.f32 %v3821_v59, %v2451_v50  ;;  %v2453_v52 = vpop.f32.mrb[238].mxu1  ;;  %v7831_v62 = vpop.eup %7830  ;;  %7852 = vpow2.f32 %v6422_v49  ;;  %v6430_v36 = vmul.f32 -1.442695, %v10808_v60  ;;  %v3833_v16 = vmul.f32 %v7829_v55, %v10790_v56 }
 0x3d1   : > { %v4016_v40 = vmul.f32 %v3824_v32, %v2453_v52  ;;  %v2455_v30 = vpop.f32.mrb[239].mxu1  ;;  %v7833_v0 = vpop.eup %7832  ;;  %7854 = vrcp.f32 %v3272_v23  ;;  %v3276_v14 = vadd.f32 1.0, %v7831_v62  ;;  %v6433_v9 = vmul.f32 -1.442695, %v10809_v47 }
 0x3d2   : > { %v4017_v24 = vmul.f32 %v3825_v21, %v2455_v30  ;;  %v7835_v2 = vpop.eup %7834  ;;  %7856 = vrcp.f32 %v3273_v31  ;;  %v10810_v21 = vld [vmem:[#allocation55_spill] sm:$0xff]  ;;  %v3836_v52 = vmul.f32 %v7833_v0, %v10791_v6 }
 0x3d3   : > { %v4160_v17 = vpack.c.bf16 %v4016_v40, %v4012_v27  ;;  %v7837_v63 = vpop.eup %7836  ;;  %7858 = vpow2.f32 %v6425_v54  ;;  %v6434_v56 = vmul.f32 -1.442695, %v10810_v21  ;;  %v3837_v40 = vmul.f32 %v7835_v2, %v10792_v41  ;;  %v10811_v54 = vld [vmem:[#allocation56_spill] sm:$0xff] }
 0x3d4   : > { %v4161_v20 = vpack.c.bf16 %v4017_v24, %v4013_v18  ;;  %v7839_v3 = vpop.eup %7838  ;;  %7860 = vpow2.f32 %v6426_v26  ;;  %v3840_v24 = vmul.f32 %v7837_v63, %v10793_v29  ;;  %v10812_v26 = vld [vmem:[#allocation57_spill] sm:$0xff] }
 0x3d5   : > { %v7841_v42 = vpop.eup %7840  ;;  %7862 = vpow2.f32 %v6429_v48  ;;  %v3277_v27 = vadd.f32 1.0, %v7839_v3  ;;  %v6438_v2 = vmul.f32 -1.442695, %v10812_v26  ;;  %v10814_v3 = vld [vmem:[#allocation59_spill] sm:$0xff] }
 0x3d6   : > { %v2459_v34 = vpop.f32.mrb[240].mxu1  ;;  %5009 = vmatprep.mubr.bf16.mxu0 %v4161_v20  ;;  %v7843_v5 = vpop.eup %7842  ;;  %7864 = vpow2.f32 %v6430_v36  ;;  %v3841_v6 = vmul.f32 %v7841_v42, %v10794_v33  ;;  %v6437_v20 = vmul.f32 -1.442695, %v10811_v54  ;;  %v10813_v36 = vld [vmem:[#allocation58_spill] sm:$0xff] }
 0x3d7   : > { %v4020_v10 = vmul.f32 %v3828_v15, %v2459_v34  ;;  %v2461_v8 = vpop.f32.mrb[241].mxu1  ;;  %5010 = vmatmul.mubr.bf16.gmra.mrb[140].mxu0 %v4160_v17  ;;  %v7845_v53 = vpop.eup %7844  ;;  %7866 = vrcp.f32 %v3276_v14  ;;  %v3280_v35 = vadd.f32 1.0, %v7843_v5 }
 0x3d8   : > { %v4021_v38 = vmul.f32 %v3829_v28, %v2461_v8  ;;  %v2463_v43 = vpop.f32.mrb[242].mxu1  ;;  %v7847_v46 = vpop.eup %7846  ;;  %v3281_v30 = vadd.f32 1.0, %v7845_v53  ;;  %7868 = vpow2.f32 %v6433_v9 }
 0x3d9   : > { %v4024_v59 = vmul.f32 %v3832_v12, %v2463_v43  ;;  %v2465_v51 = vpop.f32.mrb[243].mxu1  ;;  %v7849_v18 = vpop.eup %7848  ;;  %7870 = vrcp.f32 %v3277_v27  ;;  %v3284_v55 = vadd.f32 1.0, %v7847_v46 }
 0x3da   : > { %v4025_v32 = vmul.f32 %v3833_v16, %v2465_v51  ;;  %v7851_v49 = vpop.eup %7850  ;;  %7872 = vpow2.f32 %v6434_v56  ;;  %v6442_v16 = vmul.f32 -1.442695, %v10814_v3  ;;  %v3844_v42 = vmul.f32 %v7849_v18, %v10795_v11 }
 0x3db   : > { %v4164_v50 = vpack.c.bf16 %v4024_v59, %v4020_v10  ;;  %v7853_v23 = vpop.eup %7852  ;;  %7874 = vrcp.f32 %v3280_v35  ;;  %v6441_v10 = vmul.f32 -1.442695, %v10813_v36  ;;  %v3845_v59 = vmul.f32 %v7851_v49, %v10796_v44 }
 0x3dc   : > { %v4165_v13 = vpack.c.bf16 %v4025_v32, %v4021_v38  ;;  %v7855_v62 = vpop.eup %7854  ;;  %7876 = vrcp.f32 %v3281_v30  ;;  %v3285_v34 = vadd.f32 1.0, %v7853_v23 }
 0x3dd   : > { %v7857_v15 = vpop.eup %7856  ;;  %7878 = vrcp.f32 %v3284_v55  ;;  %v3848_v32 = vmul.f32 %v7855_v62, %v10797_v25  ;;  %v10816_v25 = vld [vmem:[#allocation61_spill] sm:$0xff] }
 0x3de   : > { %v2469_v19 = vpop.f32.mrb[244].mxu1  ;;  %5019 = vmatprep.mubr.bf16.mxu0 %v4165_v13  ;;  %v7859_v29 = vpop.eup %7858  ;;  %7880 = vpow2.f32 %v6437_v20  ;;  %v3849_v56 = vmul.f32 %v7857_v15, %v10798_v61 }
 0x3df   : > { %v4028_v31 = vmul.f32 %v3836_v52, %v2469_v19  ;;  %v2471_v17 = vpop.f32.mrb[245].mxu1  ;;  %5020 = vmatmul.mubr.bf16.gmra.mrb[144].mxu0 %v4164_v50  ;;  %v7861_v12 = vpop.eup %7860  ;;  %v3288_v14 = vadd.f32 1.0, %v7859_v29  ;;  %7882 = vpow2.f32 %v6438_v2  ;;  %v10815_v52 = vld [vmem:[#allocation60_spill] sm:$0xff]  ;;  %v6446_v19 = vmul.f32 -1.442695, %v10816_v25 }
 0x3e0   : > { %v4029_v0 = vmul.f32 %v3837_v40, %v2471_v17  ;;  %v2473_v41 = vpop.f32.mrb[246].mxu1  ;;  %v7863_v8 = vpop.eup %7862  ;;  %7884 = vrcp.f32 %v3285_v34  ;;  %v3289_v51 = vadd.f32 1.0, %v7861_v12  ;;  %v6445_v35 = vmul.f32 -1.442695, %v10815_v52  ;;  %v10817_v17 = vld [vmem:[#allocation62_spill] sm:$0xff]  ;;  %v10819_v12 = vld [vmem:[#allocation64_spill] sm:$0xff] }
 0x3e1   : > { %v4032_v28 = vmul.f32 %v3840_v24, %v2473_v41  ;;  %v2475_v48 = vpop.f32.mrb[247].mxu1  ;;  %v7865_v43 = vpop.eup %7864  ;;  %v3292_v53 = vadd.f32 1.0, %v7863_v8  ;;  %7886 = vpow2.f32 %v6441_v10  ;;  %v6449_v62 = vmul.f32 -1.442695, %v10817_v17 }
 0x3e2   : > { %v4033_v63 = vmul.f32 %v3841_v6, %v2475_v48  ;;  %v7867_v9 = vpop.eup %7866  ;;  %v3293_v11 = vadd.f32 1.0, %v7865_v43  ;;  %7888 = vpow2.f32 %v6442_v16  ;;  %v6453_v10 = vmul.f32 -1.442695, %v10819_v12 }
 0x3e3   : > { %v4168_v33 = vpack.c.bf16 %v4032_v28, %v4028_v31  ;;  %v7869_v46 = vpop.eup %7868  ;;  %7890 = vrcp.f32 %v3288_v14  ;;  %v10818_v28 = vld [vmem:[#allocation63_spill] sm:$0xff] }
 0x3e4   : > { %v4169_v38 = vpack.c.bf16 %v4033_v63, %v4029_v0  ;;  %v7871_v44 = vpop.eup %7870  ;;  %7892 = vrcp.f32 %v3289_v51  ;;  %v3296_v55 = vadd.f32 1.0, %v7869_v46  ;;  %v3852_v0 = vmul.f32 %v7867_v9, %v10799_v57 }
 0x3e5   : > { %v7873_v30 = vpop.eup %7872  ;;  %7894 = vrcp.f32 %v3292_v53  ;;  %v3853_v2 = vmul.f32 %v7871_v44, %v10800_v58  ;;  %v6450_v48 = vmul.f32 -1.442695, %v10818_v28 }
 0x3e6   : > { %v2479_v5 = vpop.f32.mrb[248].mxu1  ;;  %5029 = vmatprep.mubr.bf16.mxu0 %v4169_v38  ;;  %v7875_v24 = vpop.eup %7874  ;;  %7896 = vrcp.f32 %v3293_v11  ;;  %v3297_v41 = vadd.f32 1.0, %v7873_v30  ;;  %v10820_v38 = vld [vmem:[#allocation65_spill] sm:$0xff] }
 0x3e7   : > { %v4036_v27 = vmul.f32 %v3844_v42, %v2479_v5  ;;  %v2481_v50 = vpop.f32.mrb[249].mxu1  ;;  %5030 = vmatmul.mubr.bf16.gmra.mrb[148].mxu0 %v4168_v33  ;;  %v7877_v61 = vpop.eup %7876  ;;  %7898 = vpow2.f32 %v6445_v35  ;;  %v3856_v63 = vmul.f32 %v7875_v24, %v10801_v39  ;;  %v6454_v58 = vmul.f32 -1.442695, %v10820_v38 }
 0x3e8   : > { %v4037_v13 = vmul.f32 %v3845_v59, %v2481_v50  ;;  %v2483_v18 = vpop.f32.mrb[250].mxu1  ;;  %v7879_v20 = vpop.eup %7878  ;;  %7900 = vpow2.f32 %v6446_v19  ;;  %v3857_v16 = vmul.f32 %v7877_v61, %v10802_v45  ;;  %v10821_v59 = vld [vmem:[#allocation66_spill] sm:$0xff] }
 0x3e9   : > { %v4040_v49 = vmul.f32 %v3848_v32, %v2483_v18  ;;  %v2485_v40 = vpop.f32.mrb[251].mxu1  ;;  %v7881_v15 = vpop.eup %7880  ;;  %7902 = vrcp.f32 %v3296_v55  ;;  %v6457_v51 = vmul.f32 -1.442695, %v10821_v59  ;;  %v3860_v18 = vmul.f32 %v7879_v20, %v10803_v7  ;;  %v10823_v55 = vld [vmem:[#allocation68_spill] sm:$0xff]  ;;  %v10824_v20 = vld [vmem:[#allocation69_spill] sm:$0xff] }
 0x3ea   : > { %v4041_v23 = vmul.f32 %v3849_v56, %v2485_v40  ;;  %v7883_v34 = vpop.eup %7882  ;;  %7904 = vpow2.f32 %v6449_v62  ;;  %v3300_v32 = vadd.f32 1.0, %v7881_v15  ;;  %v10822_v40 = vld [vmem:[#allocation67_spill] sm:$0xff] }
 0x3eb   : > { %v4172_v31 = vpack.c.bf16 %v4040_v49, %v4036_v27  ;;  %v7885_v57 = vpop.eup %7884  ;;  %7906 = vrcp.f32 %v3297_v41  ;;  %v3301_v50 = vadd.f32 1.0, %v7883_v34  ;;  %v6458_v30 = vmul.f32 -1.442695, %v10822_v40 }
 0x3ec   : > { %v4173_v6 = vpack.c.bf16 %v4041_v23, %v4037_v13  ;;  %v7887_v14 = vpop.eup %7886  ;;  %7908 = vpow2.f32 %v6450_v48  ;;  %v3861_v49 = vmul.f32 %v7885_v57, %v10804_v37  ;;  %v6462_v37 = vmul.f32 -1.442695, %v10824_v20 }
 0x3ed   : > { %v7889_v9 = vpop.eup %7888  ;;  %7910 = vpow2.f32 %v6453_v10  ;;  %v3304_v56 = vadd.f32 1.0, %v7887_v14 }
 0x3ee   : > { %v2489_v29 = vpop.f32.mrb[252].mxu1  ;;  %5039 = vmatprep.mubr.bf16.mxu0 %v4173_v6  ;;  %v7891_v27 = vpop.eup %7890  ;;  %7912 = vpow2.f32 %v6454_v58  ;;  %v3305_v44 = vadd.f32 1.0, %v7889_v9 }
 0x3ef   : > { %v4044_v33 = vmul.f32 %v3852_v0, %v2489_v29  ;;  %v2491_v8 = vpop.f32.mrb[253].mxu1  ;;  %5040 = vmatmul.mubr.bf16.gmra.mrb[152].mxu0 %v4172_v31  ;;  %v7893_v45 = vpop.eup %7892  ;;  %7914 = vpow2.f32 %v6457_v51  ;;  %v3864_v24 = vmul.f32 %v7891_v27, %v10805_v1  ;;  %v6461_v31 = vmul.f32 -1.442695, %v10823_v55 }
 0x3f0   : > { %v4045_v43 = vmul.f32 %v3853_v2, %v2491_v8  ;;  %v2493_v42 = vpop.f32.mrb[254].mxu1  ;;  %v7895_v13 = vpop.eup %7894  ;;  %7916 = vrcp.f32 %v3300_v32  ;;  %v3865_v6 = vmul.f32 %v7893_v45, %v10806_v22  ;;  %v10825_v2 = vld [vmem:[#allocation70_spill] sm:$0xff] }
 0x3f1   : > { %v4048_v5 = vmul.f32 %v3856_v63, %v2493_v42  ;;  %v2495_v39 = vpop.f32.mrb[255].mxu1  ;;  %v7897_v35 = vpop.eup %7896  ;;  %7918 = vrcp.f32 %v3301_v50  ;;  %v6465_v48 = vmul.f32 -1.442695, %v10825_v2 }
 0x3f2   : > { %v4049_v53 = vmul.f32 %v3857_v16, %v2495_v39  ;;  %v7899_v23 = vpop.eup %7898  ;;  %7920 = vrcp.f32 %v3304_v56  ;;  %v3869_v51 = vmul.f32 %v7897_v35, %v10808_v60 }
 0x3f3   : > { %v4176_v46 = vpack.c.bf16 %v4048_v5, %v4044_v33  ;;  %v7901_v7 = vpop.eup %7900  ;;  %7922 = vrcp.f32 %v3305_v44  ;;  %v3308_v33 = vadd.f32 1.0, %v7899_v23  ;;  %v10826_v5 = vld [vmem:[#allocation71_spill] sm:$0xff]  ;;  %v10827_v23 = vld [vmem:[#allocation72_spill] sm:$0xff] }
 0x3f4   : > { %v4177_v11 = vpack.c.bf16 %v4049_v53, %v4045_v43  ;;  %v7903_v15 = vpop.eup %7902  ;;  %7924 = vpow2.f32 %v6458_v30  ;;  %v3309_v22 = vadd.f32 1.0, %v7901_v7  ;;  %v3868_v43 = vmul.f32 %v7895_v13, %v10807_v4 }
 0x3f5   : > { %v7905_v34 = vpop.eup %7904  ;;  %7926 = vpow2.f32 %v6461_v31  ;;  %v6466_v39 = vmul.f32 -1.442695, %v10826_v5  ;;  %v3872_v53 = vmul.f32 %v7903_v15, %v10809_v47 }
 0x3f6   : > { %v2499_v19 = vpop.f32.mrb[0].mxu1  ;;  %5049 = vmatprep.mubr.bf16.mxu0 %v4177_v11  ;;  %v7907_v10 = vpop.eup %7906  ;;  %7928 = vpow2.f32 %v6462_v37  ;;  %v3312_v42 = vadd.f32 1.0, %v7905_v34 }
 0x3f7   : > { %v4052_v61 = vmul.f32 %v3860_v18, %v2499_v19  ;;  %v2501_v62 = vpop.f32.mrb[1].mxu1  ;;  %5050 = vmatmul.mubr.bf16.gmra.mrb[156].mxu0 %v4176_v46  ;;  %v7909_v57 = vpop.eup %7908  ;;  %7930 = vpow2.f32 %v6465_v48  ;;  %v3873_v4 = vmul.f32 %v7907_v10, %v10810_v21  ;;  %v10828_v21 = vld [vmem:[#allocation73_spill] sm:$0xff] }
 0x3f8   : > { %v4053_v0 = vmul.f32 %v3861_v49, %v2501_v62  ;;  %v2503_v41 = vpop.f32.mrb[2].mxu1  ;;  %v7911_v58 = vpop.eup %7910  ;;  %7932 = vrcp.f32 %v3308_v33  ;;  %v3313_v27 = vadd.f32 1.0, %v7909_v57  ;;  %v6470_v62 = vmul.f32 -1.442695, %v10828_v21 }
 0x3f9   : > { %v4056_v29 = vmul.f32 %v3864_v24, %v2503_v41  ;;  %v2505_v1 = vpop.f32.mrb[3].mxu1  ;;  %v7913_v14 = vpop.eup %7912  ;;  %7934 = vrcp.f32 %v3309_v22  ;;  %v3316_v56 = vadd.f32 1.0, %v7911_v58  ;;  %v6469_v24 = vmul.f32 -1.442695, %v10827_v23 }
 0x3fa   : > { %v4057_v63 = vmul.f32 %v3865_v6, %v2505_v1  ;;  %v7915_v32 = vpop.eup %7914  ;;  %7936 = vrcp.f32 %v3312_v42  ;;  %v3317_v18 = vadd.f32 1.0, %v7913_v14 }
 0x3fb   : > { %v4180_v8 = vpack.c.bf16 %v4056_v29, %v4052_v61  ;;  %v7917_v45 = vpop.eup %7916  ;;  %v3320_v30 = vadd.f32 1.0, %v7915_v32  ;;  %7938 = vpow2.f32 %v6466_v39  ;;  %v10830_v29 = vld [vmem:[#allocation75_spill] sm:$0xff]  ;;  %v10831_v32 = vld [vmem:[#allocation76_spill] sm:$0xff] }
 0x3fc   : > { %v4181_v16 = vpack.c.bf16 %v4057_v63, %v4053_v0  ;;  %v7919_v60 = vpop.eup %7918  ;;  %7940 = vrcp.f32 %v3313_v27  ;;  %v3876_v37 = vmul.f32 %v7917_v45, %v10811_v54  ;;  %v10829_v0 = vld [vmem:[#allocation74_spill] sm:$0xff]  ;;  %v6474_v1 = vmul.f32 -1.442695, %v10830_v29 }
 0x3fd   : > { %v7921_v49 = vpop.eup %7920  ;;  %7942 = vrcp.f32 %v3316_v56  ;;  %v6473_v41 = vmul.f32 -1.442695, %v10829_v0  ;;  %v3877_v48 = vmul.f32 %v7919_v60, %v10812_v26 }
 0x3fe   : > { %v2509_v9 = vpop.f32.mrb[4].mxu1  ;;  %5059 = vmatprep.mubr.bf16.mxu0 %v4181_v16  ;;  %v7923_v19 = vpop.eup %7922  ;;  %7944 = vrcp.f32 %v3317_v18  ;;  %v3880_v10 = vmul.f32 %v7921_v49, %v10813_v36 }
 0x3ff   : > { %v4060_v50 = vmul.f32 %v3868_v43, %v2509_v9  ;;  %v2511_v46 = vpop.f32.mrb[5].mxu1  ;;  %5060 = vmatmul.mubr.bf16.gmra.mrb[160].mxu0 %v4180_v8  ;;  %v7925_v61 = vpop.eup %7924  ;;  %7946 = vrcp.f32 %v3320_v30  ;;  %v3881_v54 = vmul.f32 %v7923_v19, %v10814_v3  ;;  %v10832_v3 = vld [vmem:[#allocation77_spill] sm:$0xff] }
 0x400   : > { %v4061_v11 = vmul.f32 %v3869_v51, %v2511_v46  ;;  %v2513_v13 = vpop.f32.mrb[6].mxu1  ;;  %v7927_v6 = vpop.eup %7926  ;;  %v3321_v33 = vadd.f32 1.0, %v7925_v61  ;;  %7948 = vpow2.f32 %v6469_v24  ;;  %v6478_v46 = vmul.f32 -1.442695, %v10832_v3 }
 0x401   : > { %v4064_v44 = vmul.f32 %v3872_v53, %v2513_v13  ;;  %v2515_v35 = vpop.f32.mrb[7].mxu1  ;;  %v7929_v15 = vpop.eup %7928  ;;  %v3324_v22 = vadd.f32 1.0, %v7927_v6  ;;  %7950 = vpow2.f32 %v6470_v62  ;;  %v6477_v53 = vmul.f32 -1.442695, %v10831_v32 }
 0x402   : > { %v4065_v47 = vmul.f32 %v3873_v4, %v2515_v35  ;;  %v7931_v63 = vpop.eup %7930  ;;  %v3325_v43 = vadd.f32 1.0, %v7929_v15  ;;  %7952 = vpow2.f32 %v6473_v41 }
 0x403   : > { %v4184_v31 = vpack.c.bf16 %v4064_v44, %v4060_v50  ;;  %v7933_v26 = vpop.eup %7932  ;;  %v3328_v39 = vadd.f32 1.0, %v7931_v63  ;;  %7954 = vpow2.f32 %v6474_v1  ;;  %v10834_v44 = vld [vmem:[#allocation79_spill] sm:$0xff] }
 0x404   : > { %v4185_v7 = vpack.c.bf16 %v4065_v47, %v4061_v11  ;;  %v7935_v51 = vpop.eup %7934  ;;  %7956 = vrcp.f32 %v3321_v33  ;;  %v3884_v56 = vmul.f32 %v7933_v26, %v10815_v52  ;;  %v10833_v11 = vld [vmem:[#allocation78_spill] sm:$0xff]  ;;  %v6482_v35 = vmul.f32 -1.442695, %v10834_v44 }
 0x405   : > { %v7937_v9 = vpop.eup %7936  ;;  %7958 = vrcp.f32 %v3324_v22  ;;  %v6481_v13 = vmul.f32 -1.442695, %v10833_v11  ;;  %v3885_v18 = vmul.f32 %v7935_v51, %v10816_v25 }
 0x406   : > { %v2519_v34 = vpop.f32.mrb[8].mxu1  ;;  %5069 = vmatprep.mubr.bf16.mxu0 %v4185_v7  ;;  %v7939_v50 = vpop.eup %7938  ;;  %7960 = vrcp.f32 %v3325_v43  ;;  %v3888_v47 = vmul.f32 %v7937_v9, %v10817_v17 }
 0x407   : > { %v4068_v8 = vmul.f32 %v3876_v37, %v2519_v34  ;;  %v2521_v57 = vpop.f32.mrb[9].mxu1  ;;  %5070 = vmatmul.mubr.bf16.gmra.mrb[164].mxu0 %v4184_v31  ;;  %v7941_v4 = vpop.eup %7940  ;;  %7962 = vrcp.f32 %v3328_v39  ;;  %v3329_v19 = vadd.f32 1.0, %v7939_v50 }
 0x408   : > { %v4069_v16 = vmul.f32 %v3877_v48, %v2521_v57  ;;  %v2523_v58 = vpop.f32.mrb[10].mxu1  ;;  %v7943_v60 = vpop.eup %7942  ;;  %7964 = vpow2.f32 %v6477_v53  ;;  %v3889_v61 = vmul.f32 %v7941_v4, %v10818_v28 }
 0x409   : > { %v4072_v42 = vmul.f32 %v3880_v10, %v2523_v58  ;;  %v2525_v14 = vpop.f32.mrb[11].mxu1  ;;  %v7945_v30 = vpop.eup %7944  ;;  %7966 = vpow2.f32 %v6478_v46  ;;  %v3892_v33 = vmul.f32 %v7943_v60, %v10819_v12 }
 0x40a   : > { %v4073_v36 = vmul.f32 %v3881_v54, %v2525_v14  ;;  %v7947_v52 = vpop.eup %7946  ;;  %7968 = vpow2.f32 %v6481_v13  ;;  %v3893_v57 = vmul.f32 %v7945_v30, %v10820_v38 }
 0x40b   : > { %v4188_v27 = vpack.c.bf16 %v4072_v42, %v4068_v8  ;;  %v7949_v25 = vpop.eup %7948  ;;  %7970 = vpow2.f32 %v6482_v35  ;;  %v3896_v58 = vmul.f32 %v7947_v52, %v10821_v59 }
 0x40c   : > { %v4189_v45 = vpack.c.bf16 %v4073_v36, %v4069_v16  ;;  %v7951_v41 = vpop.eup %7950  ;;  %7972 = vrcp.f32 %v3329_v19  ;;  %v3332_v34 = vadd.f32 1.0, %v7949_v25 }
 0x40d   : > { %v7953_v48 = vpop.eup %7952  ;;  %v3333_v28 = vadd.f32 1.0, %v7951_v41 }
 0x40e   : > { %v2529_v49 = vpop.f32.mrb[12].mxu1  ;;  %5079 = vmatprep.mubr.bf16.mxu0 %v4189_v45  ;;  %v7955_v1 = vpop.eup %7954  ;;  %v3336_v54 = vadd.f32 1.0, %v7953_v48  ;;  %7974 = vrcp.f32 %v3332_v34 }
 0x40f   : > { %v4076_v24 = vmul.f32 %v3884_v56, %v2529_v49  ;;  %v2531_v31 = vpop.f32.mrb[13].mxu1  ;;  %5080 = vmatmul.mubr.bf16.gmra.mrb[168].mxu0 %v4188_v27  ;;  %v7957_v10 = vpop.eup %7956  ;;  %v3337_v26 = vadd.f32 1.0, %v7955_v1  ;;  %7976 = vrcp.f32 %v3333_v28 }
 0x410   : > { %v4077_v62 = vmul.f32 %v3885_v18, %v2531_v31  ;;  %v2533_v7 = vpop.f32.mrb[14].mxu1  ;;  %v7959_v8 = vpop.eup %7958  ;;  %v3897_v51 = vmul.f32 %v7957_v10, %v10822_v40  ;;  %7978 = vrcp.f32 %v3336_v54 }
 0x411   : > { %v4080_v6 = vmul.f32 %v3888_v47, %v2533_v7  ;;  %v2535_v37 = vpop.f32.mrb[15].mxu1  ;;  %v7961_v16 = vpop.eup %7960  ;;  %7980 = vrcp.f32 %v3337_v26  ;;  %v3900_v13 = vmul.f32 %v7959_v8, %v10823_v55 }
 0x412   : > { %v4081_v15 = vmul.f32 %v3889_v61, %v2535_v37  ;;  %v7963_v14 = vpop.eup %7962  ;;  %v3901_v60 = vmul.f32 %v7961_v16, %v10824_v20 }
 0x413   : > { %v4192_v17 = vpack.c.bf16 %v4080_v6, %v4076_v24  ;;  %v7965_v36 = vpop.eup %7964  ;;  %v3904_v49 = vmul.f32 %v7963_v14, %v10825_v2 }
 0x414   : > { %v4193_v63 = vpack.c.bf16 %v4081_v15, %v4077_v62  ;;  %v7967_v53 = vpop.eup %7966  ;;  %v3340_v45 = vadd.f32 1.0, %v7965_v36 }
 0x415   : > { %v7969_v50 = vpop.eup %7968  ;;  %v3341_v40 = vadd.f32 1.0, %v7967_v53 }
 0x416   : > { %v2539_v22 = vpop.f32.mrb[16].mxu1  ;;  %5089 = vmatprep.mubr.bf16.mxu0 %v4193_v63  ;;  %v7971_v46 = vpop.eup %7970  ;;  %v3344_v18 = vadd.f32 1.0, %v7969_v50  ;;  %7982 = vrcp.f32 %v3340_v45 }
 0x417   : > { %v4084_v43 = vmul.f32 %v3892_v33, %v2539_v22  ;;  %v2541_v42 = vpop.f32.mrb[17].mxu1  ;;  %5090 = vmatmul.mubr.bf16.gmra.mrb[172].mxu0 %v4192_v17  ;;  %v7973_v56 = vpop.eup %7972  ;;  %v3345_v30 = vadd.f32 1.0, %v7971_v46  ;;  %7984 = vrcp.f32 %v3341_v40 }
 0x418   : > { %v4085_v39 = vmul.f32 %v3893_v57, %v2541_v42  ;;  %v2543_v12 = vpop.f32.mrb[18].mxu1  ;;  %v3905_v24 = vmul.f32 %v7973_v56, %v10826_v5  ;;  %v7975_v62 = vpop.eup %7974  ;;  %7986 = vrcp.f32 %v3344_v18 }
 0x419   : > { %v4088_v9 = vmul.f32 %v3896_v58, %v2543_v12  ;;  %v2545_v38 = vpop.f32.mrb[19].mxu1  ;;  %v7977_v7 = vpop.eup %7976  ;;  %7988 = vrcp.f32 %v3345_v30  ;;  %v3908_v41 = vmul.f32 %v7975_v62, %v10827_v23 }
 0x41a   : > { %v4089_v27 = vmul.f32 %v3897_v51, %v2545_v38  ;;  %v7979_v6 = vpop.eup %7978  ;;  %v3909_v15 = vmul.f32 %v7977_v7, %v10828_v21 }
 0x41b   : > { %v4196_v59 = vpack.c.bf16 %v4088_v9, %v4084_v43  ;;  %v7981_v37 = vpop.eup %7980  ;;  %v3912_v48 = vmul.f32 %v7979_v6, %v10829_v0 }
 0x41c   : > { %v4197_v4 = vpack.c.bf16 %v4089_v27, %v4085_v39  ;;  %v3913_v34 = vmul.f32 %v7981_v37, %v10830_v29 }
 0x41e   : > { %v2549_v35 = vpop.f32.mrb[20].mxu1  ;;  %5099 = vmatprep.mubr.bf16.mxu0 %v4197_v4 }
 0x41f   : > { %v4092_v47 = vmul.f32 %v3900_v13, %v2549_v35  ;;  %v2551_v19 = vpop.f32.mrb[21].mxu1  ;;  %5100 = vmatmul.mubr.bf16.gmra.mrb[176].mxu0 %v4196_v59 }
 0x420   : > { %v4093_v31 = vmul.f32 %v3901_v60, %v2551_v19  ;;  %v2553_v52 = vpop.f32.mrb[22].mxu1  ;;  %v7983_v8 = vpop.eup %7982 }
 0x421   : > { %v4096_v61 = vmul.f32 %v3904_v49, %v2553_v52  ;;  %v2555_v55 = vpop.f32.mrb[23].mxu1  ;;  %v7985_v54 = vpop.eup %7984  ;;  %v3916_v58 = vmul.f32 %v7983_v8, %v10831_v32 }
 0x422   : > { %v4097_v20 = vmul.f32 %v3905_v24, %v2555_v55  ;;  %v7987_v23 = vpop.eup %7986  ;;  %v3917_v0 = vmul.f32 %v7985_v54, %v10832_v3 }
 0x423   : > { %v4200_v25 = vpack.c.bf16 %v4096_v61, %v4092_v47  ;;  %v7989_v21 = vpop.eup %7988  ;;  %v3920_v43 = vmul.f32 %v7987_v23, %v10833_v11 }
 0x424   : > { %v4201_v2 = vpack.c.bf16 %v4097_v20, %v4093_v31  ;;  %v3921_v14 = vmul.f32 %v7989_v21, %v10834_v44 }
 0x426   : > { %v2559_v5 = vpop.f32.mrb[24].mxu1  ;;  %5109 = vmatprep.mubr.bf16.mxu0 %v4201_v2 }
 0x427   : > { %v4100_v17 = vmul.f32 %v3908_v41, %v2559_v5  ;;  %v2561_v1 = vpop.f32.mrb[25].mxu1  ;;  %5110 = vmatmul.mubr.bf16.gmra.mrb[180].mxu0 %v4200_v25 }
 0x428   : > { %v4101_v63 = vmul.f32 %v3909_v15, %v2561_v1  ;;  %v2563_v10 = vpop.f32.mrb[26].mxu1 }
 0x429   : > { %v4104_v33 = vmul.f32 %v3912_v48, %v2563_v10  ;;  %v2565_v28 = vpop.f32.mrb[27].mxu1 }
 0x42a   : > { %v4105_v57 = vmul.f32 %v3913_v34, %v2565_v28 }
 0x42b   : > { %v4204_v22 = vpack.c.bf16 %v4104_v33, %v4100_v17 }
 0x42c   : > { %v4205_v16 = vpack.c.bf16 %v4105_v57, %v4101_v63 }
 0x42e   : > { %v2569_v26 = vpop.f32.mrb[28].mxu1  ;;  %5119 = vmatprep.mubr.bf16.mxu0 %v4205_v16 }
 0x42f   : > { %v4108_v29 = vmul.f32 %v3916_v58, %v2569_v26  ;;  %v2571_v42 = vpop.f32.mrb[29].mxu1  ;;  %5120 = vmatmul.mubr.bf16.gmra.mrb[184].mxu0 %v4204_v22 }
 0x430   : > { %v4109_v51 = vmul.f32 %v3917_v0, %v2571_v42  ;;  %v2573_v39 = vpop.f32.mrb[30].mxu1 }
 0x431   : > { %v4112_v12 = vmul.f32 %v3920_v43, %v2573_v39  ;;  %v2575_v36 = vpop.f32.mrb[31].mxu1 }
 0x432   : > { %v4113_v9 = vmul.f32 %v3921_v14, %v2575_v36 }
 0x433   : > { %v4208_v38 = vpack.c.bf16 %v4112_v12, %v4108_v29 }
 0x434   : > { %v4209_v53 = vpack.c.bf16 %v4113_v9, %v4109_v51 }
 0x436   : > { %5129 = vmatprep.mubr.bf16.mxu0 %v4209_v53 }
 0x437   : > { %5130 = vmatmul.mubr.bf16.gmra.mrb[188].mxu0 %v4208_v38 }
 0x452   : > { %v10160_v32 = vpop.f32.mrb[96].mxu0 }
 0x453   : > { %10835 = vst [vmem:[#allocation22_spill] sm:$0xff] %v10160_v32  ;;  %v10162_v3 = vpop.f32.mrb[97].mxu0 }
 0x454   : > { %10836 = vst [vmem:[#allocation24_spill] sm:$0xff] %v10162_v3  ;;  %v10164_v27 = vpop.f32.mrb[98].mxu0 }
 0x455   : > { %10837 = vst [vmem:[#allocation23_spill] sm:$0xff] %v10164_v27  ;;  %v10166_v11 = vpop.f32.mrb[99].mxu0 }
 0x45a   : > { %v10168_v50 = vpop.f32.mrb[100].mxu0 }
 0x45b   : > { %v10170_v44 = vpop.f32.mrb[101].mxu0 }
 0x45c   : > { %v10172_v59 = vpop.f32.mrb[102].mxu0 }
 0x45d   : > { %v10174_v46 = vpop.f32.mrb[103].mxu0 }
 0x462   : > { %v10176_v45 = vpop.f32.mrb[104].mxu0 }
 0x463   : > { %v10178_v4 = vpop.f32.mrb[105].mxu0 }
 0x464   : > { %v10180_v56 = vpop.f32.mrb[106].mxu0 }
 0x465   : > { %v10182_v13 = vpop.f32.mrb[107].mxu0 }
 0x46a   : > { %v10184_v40 = vpop.f32.mrb[108].mxu0 }
 0x46b   : > { %v10186_v60 = vpop.f32.mrb[109].mxu0 }
 0x46c   : > { %v10188_v18 = vpop.f32.mrb[110].mxu0 }
 0x46d   : > { %v10190_v35 = vpop.f32.mrb[111].mxu0 }
 0x472   : > { %v10192_v49 = vpop.f32.mrb[112].mxu0 }
 0x473   : > { %v10194_v30 = vpop.f32.mrb[113].mxu0 }
 0x474   : > { %v10196_v47 = vpop.f32.mrb[114].mxu0 }
 0x475   : > { %v10198_v19 = vpop.f32.mrb[115].mxu0 }
 0x47a   : > { %v10200_v24 = vpop.f32.mrb[116].mxu0 }
 0x47b   : > { %v10202_v31 = vpop.f32.mrb[117].mxu0 }
 0x47c   : > { %v10204_v52 = vpop.f32.mrb[118].mxu0 }
 0x47d   : > { %v10206_v61 = vpop.f32.mrb[119].mxu0 }
 0x482   : > { %v10208_v55 = vpop.f32.mrb[120].mxu0 }
 0x483   : > { %v10210_v62 = vpop.f32.mrb[121].mxu0 }
 0x484   : > { %v10212_v20 = vpop.f32.mrb[122].mxu0 }
 0x485   : > { %v10214_v7 = vpop.f32.mrb[123].mxu0 }
 0x48a   : > { %v10216_v25 = vpop.f32.mrb[124].mxu0 }
 0x48b   : > { %v10218_v6 = vpop.f32.mrb[125].mxu0 }
 0x48c   : > { %v10220_v2 = vpop.f32.mrb[126].mxu0 }
 0x48d   : > { %v10222_v37 = vpop.f32.mrb[127].mxu0 }
 0x492   : > { %v10224_v41 = vpop.f32.mrb[128].mxu0 }
 0x493   : > { %v10226_v15 = vpop.f32.mrb[129].mxu0 }
 0x494   : > { %v10228_v5 = vpop.f32.mrb[130].mxu0 }
 0x495   : > { %v10230_v48 = vpop.f32.mrb[131].mxu0 }
 0x49a   : > { %v10232_v17 = vpop.f32.mrb[132].mxu0 }
 0x49b   : > { %v10234_v1 = vpop.f32.mrb[133].mxu0 }
 0x49c   : > { %v10236_v34 = vpop.f32.mrb[134].mxu0 }
 0x49d   : > { %v10238_v63 = vpop.f32.mrb[135].mxu0 }
 0x4a2   : > { %v10240_v10 = vpop.f32.mrb[136].mxu0 }
 0x4a3   : > { %v10242_v33 = vpop.f32.mrb[137].mxu0 }
 0x4a4   : > { %v10244_v28 = vpop.f32.mrb[138].mxu0 }
 0x4a5   : > { %v10246_v8 = vpop.f32.mrb[139].mxu0 }
 0x4a6   : > { %10838 = vst [vmem:[#allocation25_spill] sm:$0xff] %v10246_v8 }
 0x4aa   : > { %v10248_v57 = vpop.f32.mrb[140].mxu0 }
 0x4ab   : > { %10839 = vst [vmem:[#allocation26_spill] sm:$0xff] %v10248_v57  ;;  %v10250_v54 = vpop.f32.mrb[141].mxu0 }
 0x4ac   : > { %10840 = vst [vmem:[#allocation27_spill] sm:$0xff] %v10250_v54  ;;  %v10252_v22 = vpop.f32.mrb[142].mxu0 }
 0x4ad   : > { %10841 = vst [vmem:[#allocation28_spill] sm:$0xff] %v10252_v22  ;;  %v10254_v23 = vpop.f32.mrb[143].mxu0 }
 0x4ae   : > { %10842 = vst [vmem:[#allocation29_spill] sm:$0xff] %v10254_v23 }
 0x4b2   : > { %v10256_v16 = vpop.f32.mrb[144].mxu0 }
 0x4b3   : > { %10843 = vst [vmem:[#allocation30_spill] sm:$0xff] %v10256_v16  ;;  %v10258_v21 = vpop.f32.mrb[145].mxu0 }
 0x4b4   : > { %10844 = vst [vmem:[#allocation31_spill] sm:$0xff] %v10258_v21  ;;  %v10260_v58 = vpop.f32.mrb[146].mxu0  ;;  %v5152_v21 = vld [vmem:[#allocation2 + $0x40] sm:$0xff] (!%p6547_p0) }
 0x4b5   : > { %10845 = vst [vmem:[#allocation32_spill] sm:$0xff] %v10260_v58  ;;  %v10262_v0 = vpop.f32.mrb[147].mxu0  ;;  %v5151_v58 = vld [vmem:[#allocation2 + $0x38] sm:$0xff] (!%p6547_p0) }
 0x4b6   : > { %10846 = vst [vmem:[#allocation33_spill] sm:$0xff] %v10262_v0  ;;  %v5150_v0 = vld [vmem:[#allocation2 + $0x30] sm:$0xff] (!%p6547_p0) }
 0x4ba   : > { %v10264_v26 = vpop.f32.mrb[148].mxu0 }
 0x4bb   : > { %10847 = vst [vmem:[#allocation34_spill] sm:$0xff] %v10264_v26  ;;  %v10266_v43 = vpop.f32.mrb[149].mxu0  ;;  %v5149_v26 = vld [vmem:[#allocation2 + $0x28] sm:$0xff] (!%p6547_p0) }
 0x4bc   : > { %10848 = vst [vmem:[#allocation35_spill] sm:$0xff] %v10266_v43  ;;  %v10268_v29 = vpop.f32.mrb[150].mxu0 }
 0x4bd   : > { %10849 = vst [vmem:[#allocation36_spill] sm:$0xff] %v10268_v29  ;;  %v10270_v42 = vpop.f32.mrb[151].mxu0 }
 0x4be   : > { %10850 = vst [vmem:[#allocation37_spill] sm:$0xff] %v10270_v42 }
 0x4c2   : > { %v10272_v14 = vpop.f32.mrb[152].mxu0 }
 0x4c3   : > { %10851 = vst [vmem:[#allocation38_spill] sm:$0xff] %v10272_v14  ;;  %v10274_v51 = vpop.f32.mrb[153].mxu0 }
 0x4c4   : > { %10852 = vst [vmem:[#allocation39_spill] sm:$0xff] %v10274_v51  ;;  %v10276_v39 = vpop.f32.mrb[154].mxu0 }
 0x4c5   : > { %10853 = vst [vmem:[#allocation40_spill] sm:$0xff] %v10276_v39  ;;  %v10278_v12 = vpop.f32.mrb[155].mxu0 }
 0x4c6   : > { %10854 = vst [vmem:[#allocation41_spill] sm:$0xff] %v10278_v12 }
 0x4ca   : > { %v10280_v36 = vpop.f32.mrb[156].mxu0 }
 0x4cb   : > { %10855 = vst [vmem:[#allocation42_spill] sm:$0xff] %v10280_v36  ;;  %v10282_v9 = vpop.f32.mrb[157].mxu0 }
 0x4cc   : > { %10856 = vst [vmem:[#allocation43_spill] sm:$0xff] %v10282_v9  ;;  %v10284_v38 = vpop.f32.mrb[158].mxu0 }
 0x4cd   : > { %10857 = vst [vmem:[#allocation44_spill] sm:$0xff] %v10284_v38  ;;  %v10286_v53 = vpop.f32.mrb[159].mxu0 }
 0x4ce   : > { %10858 = vst [vmem:[#allocation45_spill] sm:$0xff] %v10286_v53 }
 0x4d2   : > { %v10288_v43 = vpop.f32.mrb[160].mxu0 }
 0x4d3   : > { %10859 = vst [vmem:[#allocation46_spill] sm:$0xff] %v10288_v43  ;;  %v10290_v29 = vpop.f32.mrb[161].mxu0 }
 0x4d4   : > { %10860 = vst [vmem:[#allocation47_spill] sm:$0xff] %v10290_v29  ;;  %v10292_v42 = vpop.f32.mrb[162].mxu0 }
 0x4d5   : > { %10861 = vst [vmem:[#allocation48_spill] sm:$0xff] %v10292_v42  ;;  %v10294_v14 = vpop.f32.mrb[163].mxu0 }
 0x4d6   : > { %10862 = vst [vmem:[#allocation49_spill] sm:$0xff] %v10294_v14 }
 0x4da   : > { %v10296_v51 = vpop.f32.mrb[164].mxu0 }
 0x4db   : > { %10863 = vst [vmem:[#allocation50_spill] sm:$0xff] %v10296_v51  ;;  %v10298_v39 = vpop.f32.mrb[165].mxu0 }
 0x4dc   : > { %10864 = vst [vmem:[#allocation51_spill] sm:$0xff] %v10298_v39  ;;  %v10300_v12 = vpop.f32.mrb[166].mxu0 }
 0x4dd   : > { %10865 = vst [vmem:[#allocation52_spill] sm:$0xff] %v10300_v12  ;;  %v10302_v36 = vpop.f32.mrb[167].mxu0 }
 0x4de   : > { %10866 = vst [vmem:[#allocation53_spill] sm:$0xff] %v10302_v36 }
 0x4e2   : > { %v10304_v9 = vpop.f32.mrb[168].mxu0 }
 0x4e3   : > { %10867 = vst [vmem:[#allocation54_spill] sm:$0xff] %v10304_v9  ;;  %v10306_v38 = vpop.f32.mrb[169].mxu0 }
 0x4e4   : > { %10868 = vst [vmem:[#allocation55_spill] sm:$0xff] %v10306_v38  ;;  %v10308_v53 = vpop.f32.mrb[170].mxu0 }
 0x4e5   : > { %10869 = vst [vmem:[#allocation56_spill] sm:$0xff] %v10308_v53  ;;  %v10310_v43 = vpop.f32.mrb[171].mxu0 }
 0x4e6   : > { %10870 = vst [vmem:[#allocation57_spill] sm:$0xff] %v10310_v43 }
 0x4ea   : > { %v10312_v29 = vpop.f32.mrb[172].mxu0 }
 0x4eb   : > { %10871 = vst [vmem:[#allocation58_spill] sm:$0xff] %v10312_v29  ;;  %v10314_v42 = vpop.f32.mrb[173].mxu0 }
 0x4ec   : > { %10872 = vst [vmem:[#allocation59_spill] sm:$0xff] %v10314_v42  ;;  %v10316_v14 = vpop.f32.mrb[174].mxu0 }
 0x4ed   : > { %10873 = vst [vmem:[#allocation60_spill] sm:$0xff] %v10316_v14  ;;  %v10318_v51 = vpop.f32.mrb[175].mxu0 }
 0x4ee   : > { %10874 = vst [vmem:[#allocation61_spill] sm:$0xff] %v10318_v51 }
 0x4f2   : > { %v10320_v39 = vpop.f32.mrb[176].mxu0 }
 0x4f3   : > { %10875 = vst [vmem:[#allocation62_spill] sm:$0xff] %v10320_v39  ;;  %v10322_v12 = vpop.f32.mrb[177].mxu0 }
 0x4f4   : > { %10876 = vst [vmem:[#allocation63_spill] sm:$0xff] %v10322_v12  ;;  %v10324_v36 = vpop.f32.mrb[178].mxu0 }
 0x4f5   : > { %10877 = vst [vmem:[#allocation64_spill] sm:$0xff] %v10324_v36  ;;  %v10326_v9 = vpop.f32.mrb[179].mxu0 }
 0x4f6   : > { %10878 = vst [vmem:[#allocation65_spill] sm:$0xff] %v10326_v9 }
 0x4fa   : > { %v10328_v38 = vpop.f32.mrb[180].mxu0 }
 0x4fb   : > { %10879 = vst [vmem:[#allocation66_spill] sm:$0xff] %v10328_v38  ;;  %v10330_v53 = vpop.f32.mrb[181].mxu0 }
 0x4fc   : > { %10880 = vst [vmem:[#allocation67_spill] sm:$0xff] %v10330_v53  ;;  %v10332_v43 = vpop.f32.mrb[182].mxu0  ;;  %v5147_v53 = vld [vmem:[#allocation2 + $0x18] sm:$0xff] (!%p6547_p0) }
 0x4fd   : > { %10881 = vst [vmem:[#allocation68_spill] sm:$0xff] %v10332_v43  ;;  %v10334_v29 = vpop.f32.mrb[183].mxu0  ;;  %v5145_v43 = vld [vmem:[#allocation2 + $0x8] sm:$0xff] (!%p6547_p0) }
 0x4fe   : > { %10882 = vst [vmem:[#allocation69_spill] sm:$0xff] %v10334_v29  ;;  %v5144_v29 = vld [vmem:[#allocation2] sm:$0xff] (!%p6547_p0) }
 0x502   : > { %v10336_v42 = vpop.f32.mrb[184].mxu0 }
 0x503   : > { %10883 = vst [vmem:[#allocation70_spill] sm:$0xff] %v10336_v42  ;;  %v10338_v14 = vpop.f32.mrb[185].mxu0  ;;  %v5146_v42 = vld [vmem:[#allocation2 + $0x10] sm:$0xff] (!%p6547_p0) }
 0x504   : > { %10884 = vst [vmem:[#allocation71_spill] sm:$0xff] %v10338_v14  ;;  %v10340_v51 = vpop.f32.mrb[186].mxu0  ;;  %v5240_v14 = vadd.f32 (!%p6547_p0), %v5144_v29, %v10160_v32  ;;  %v5246_v29 = vadd.f32 (!%p6547_p0), %v5150_v0, %v10172_v59  ;;  %v5155_v32 = vld [vmem:[#allocation2 + $0x58] sm:$0xff] (!%p6547_p0) }
 0x505   : > { %10885 = vst [vmem:[#allocation72_spill] sm:$0xff] %v10340_v51  ;;  %v10342_v39 = vpop.f32.mrb[187].mxu0  ;;  %v5241_v51 = vadd.f32 (!%p6547_p0), %v5145_v43, %v10162_v3  ;;  %v5247_v43 = vadd.f32 (!%p6547_p0), %v5151_v58, %v10174_v46  ;;  %v5154_v3 = vld [vmem:[#allocation2 + $0x50] sm:$0xff] (!%p6547_p0) }
 0x506   : > { %10886 = vst [vmem:[#allocation73_spill] sm:$0xff] %v10342_v39  ;;  %v5242_v39 = vadd.f32 (!%p6547_p0), %v5146_v42, %v10164_v27  ;;  %5336 = vst [vmem:[#allocation2] sm:$0xff] (!%p6547_p0), %v5240_v14  ;;  %v5248_v42 = vadd.f32 (!%p6547_p0), %v5152_v21, %v10176_v45  ;;  %v5153_v27 = vld [vmem:[#allocation2 + $0x48] sm:$0xff] (!%p6547_p0)  ;;  %v5251_v14 = vadd.f32 (!%p6547_p0), %v5155_v32, %v10182_v13 }
 0x507   : > { %5337 = vst [vmem:[#allocation2 + $0x8] sm:$0xff] (!%p6547_p0), %v5241_v51  ;;  %v5156_v51 = vld [vmem:[#allocation2 + $0x60] sm:$0xff] (!%p6547_p0)  ;;  %5342 = vst [vmem:[#allocation2 + $0x30] sm:$0xff] (!%p6547_p0), %v5246_v29  ;;  %v5162_v29 = vld [vmem:[#allocation2 + $0x90] sm:$0xff] (!%p6547_p0) }
 0x508   : > { %5143 = sbr.rel (%p6547_p0) target bundleno = 1348 (0x544), region = 60  ;;  %5338 = vst [vmem:[#allocation2 + $0x10] sm:$0xff] (!%p6547_p0), %v5242_v39  ;;  %v5157_v39 = vld [vmem:[#allocation2 + $0x68] sm:$0xff] (!%p6547_p0)  ;;  %5343 = vst [vmem:[#allocation2 + $0x38] sm:$0xff] (!%p6547_p0), %v5247_v43  ;;  %v5252_v21 = vadd.f32 (!%p6547_p0), %v5156_v51, %v10184_v40  ;;  %v5163_v43 = vld [vmem:[#allocation2 + $0x98] sm:$0xff] (!%p6547_p0)  ;;  %v5258_v51 = vadd.f32 (!%p6547_p0), %v5162_v29, %v10196_v47 }
 0x509   : > { %5344 = vst [vmem:[#allocation2 + $0x40] sm:$0xff] (!%p6547_p0), %v5248_v42  ;;  %v5253_v58 = vadd.f32 (!%p6547_p0), %v5157_v39, %v10186_v60  ;;  %5347 = vst [vmem:[#allocation2 + $0x58] sm:$0xff] (!%p6547_p0), %v5251_v14  ;;  %v5164_v42 = vld [vmem:[#allocation2 + $0xa0] sm:$0xff] (!%p6547_p0)  ;;  %v5259_v39 = vadd.f32 (!%p6547_p0), %v5163_v43, %v10198_v19  ;;  %v5166_v14 = vld [vmem:[#allocation2 + $0xb0] sm:$0xff] (!%p6547_p0) }
 0x50a   : > { %v10344_v12 = vpop.f32.mrb[188].mxu0  ;;  %5348 = vst [vmem:[#allocation2 + $0x60] sm:$0xff] (!%p6547_p0), %v5252_v21  ;;  %5354 = vst [vmem:[#allocation2 + $0x90] sm:$0xff] (!%p6547_p0), %v5258_v51 }
 0x50b   : > { %10887 = vst [vmem:[#allocation74_spill] sm:$0xff] %v10344_v12  ;;  %v10346_v36 = vpop.f32.mrb[189].mxu0  ;;  %v5148_v12 = vld [vmem:[#allocation2 + $0x20] sm:$0xff] (!%p6547_p0)  ;;  %5349 = vst [vmem:[#allocation2 + $0x68] sm:$0xff] (!%p6547_p0), %v5253_v58 }
 0x50c   : > { %10888 = vst [vmem:[#allocation75_spill] sm:$0xff] %v10346_v36  ;;  %v10348_v9 = vpop.f32.mrb[190].mxu0  ;;  %v5243_v36 = vadd.f32 (!%p6547_p0), %v5147_v53, %v10166_v11  ;;  %v5158_v53 = vld [vmem:[#allocation2 + $0x70] sm:$0xff] (!%p6547_p0)  ;;  %v5168_v58 = vld [vmem:[#allocation2 + $0xc0] sm:$0xff] (!%p6547_p0)  ;;  %5355 = vst [vmem:[#allocation2 + $0x98] sm:$0xff] (!%p6547_p0), %v5259_v39 }
 0x50d   : > { %10889 = vst [vmem:[#allocation76_spill] sm:$0xff] %v10348_v9  ;;  %v10350_v38 = vpop.f32.mrb[191].mxu0  ;;  %v5244_v9 = vadd.f32 (!%p6547_p0), %v5148_v12, %v10168_v50  ;;  %v5250_v12 = vadd.f32 (!%p6547_p0), %v5154_v3, %v10180_v56  ;;  %v5254_v0 = vadd.f32 (!%p6547_p0), %v5158_v53, %v10188_v18  ;;  %v5167_v53 = vld [vmem:[#allocation2 + $0xb8] sm:$0xff] (!%p6547_p0)  ;;  %v5264_v29 = vadd.f32 (!%p6547_p0), %v5168_v58, %v10208_v55  ;;  %v5174_v39 = vld [vmem:[#allocation2 + $0xf0] sm:$0xff] (!%p6547_p0) }
 0x50e   : > { %10890 = vst [vmem:[#allocation77_spill] sm:$0xff] %v10350_v38  ;;  %v5245_v38 = vadd.f32 (!%p6547_p0), %v5149_v26, %v10170_v44  ;;  %5339 = vst [vmem:[#allocation2 + $0x18] sm:$0xff] (!%p6547_p0), %v5243_v36  ;;  %v5249_v26 = vadd.f32 (!%p6547_p0), %v5153_v27, %v10178_v4  ;;  %v5159_v36 = vld [vmem:[#allocation2 + $0x78] sm:$0xff] (!%p6547_p0)  ;;  %v5263_v21 = vadd.f32 (!%p6547_p0), %v5167_v53, %v10206_v61  ;;  %v5176_v53 = vld [vmem:[#allocation2 + $0x100] sm:$0xff] (!%p6547_p0) }
 0x50f   : > { %5340 = vst [vmem:[#allocation2 + $0x20] sm:$0xff] %v5244_v9  ;;  %v5160_v9 = vld [vmem:[#allocation2 + $0x80] sm:$0xff]  ;;  %5346 = vst [vmem:[#allocation2 + $0x50] sm:$0xff] %v5250_v12  ;;  %v5255_v32 = vadd.f32 %v5159_v36, %v10190_v35  ;;  %v5165_v12 = vld [vmem:[#allocation2 + $0xa8] sm:$0xff]  ;;  %v5270_v58 = vadd.f32 %v5174_v39, %v10220_v2 }
 0x510   : > { %5341 = vst [vmem:[#allocation2 + $0x28] sm:$0xff] %v5245_v38  ;;  %v5161_v38 = vld [vmem:[#allocation2 + $0x88] sm:$0xff]  ;;  %5345 = vst [vmem:[#allocation2 + $0x48] sm:$0xff] %v5249_v26  ;;  %v5256_v3 = vadd.f32 %v5160_v9, %v10192_v49  ;;  %v5260_v26 = vadd.f32 %v5164_v42, %v10200_v24  ;;  %v5261_v36 = vadd.f32 %v5165_v12, %v10202_v31 }
 0x511   : > { %v5257_v27 = vadd.f32 %v5161_v38, %v10194_v30  ;;  %5350 = vst [vmem:[#allocation2 + $0x70] sm:$0xff] %v5254_v0  ;;  %5351 = vst [vmem:[#allocation2 + $0x78] sm:$0xff] %v5255_v32  ;;  %v5262_v9 = vadd.f32 %v5166_v14, %v10204_v52  ;;  %v5169_v0 = vld [vmem:[#allocation2 + $0xc8] sm:$0xff]  ;;  %v5170_v38 = vld [vmem:[#allocation2 + $0xd0] sm:$0xff] }
 0x512   : > { %5352 = vst [vmem:[#allocation2 + $0x80] sm:$0xff] %v5256_v3  ;;  %5356 = vst [vmem:[#allocation2 + $0xa0] sm:$0xff] %v5260_v26  ;;  %v5265_v43 = vadd.f32 %v5169_v0, %v10210_v62  ;;  %v5266_v32 = vadd.f32 %v5170_v38, %v10212_v20  ;;  %v5171_v3 = vld [vmem:[#allocation2 + $0xd8] sm:$0xff]  ;;  %v5173_v42 = vld [vmem:[#allocation2 + $0xe8] sm:$0xff] }
 0x513   : > { %5353 = vst [vmem:[#allocation2 + $0x88] sm:$0xff] %v5257_v27  ;;  %v5172_v27 = vld [vmem:[#allocation2 + $0xe0] sm:$0xff]  ;;  %5357 = vst [vmem:[#allocation2 + $0xa8] sm:$0xff] %v5261_v36  ;;  %v5267_v12 = vadd.f32 %v5171_v3, %v10214_v7  ;;  %v5269_v51 = vadd.f32 %v5173_v42, %v10218_v6  ;;  %v5175_v26 = vld [vmem:[#allocation2 + $0xf8] sm:$0xff]  ;;  %v5272_v36 = vadd.f32 %v5176_v53, %v10224_v41 }
 0x514   : > { %5358 = vst [vmem:[#allocation2 + $0xb0] sm:$0xff] %v5262_v9  ;;  %5359 = vst [vmem:[#allocation2 + $0xb8] sm:$0xff] %v5263_v21  ;;  %v5268_v14 = vadd.f32 %v5172_v27, %v10216_v25  ;;  %v5271_v0 = vadd.f32 %v5175_v26, %v10222_v37  ;;  %v5177_v9 = vld [vmem:[#allocation2 + $0x108] sm:$0xff]  ;;  %v5178_v21 = vld [vmem:[#allocation2 + $0x110] sm:$0xff] }
 0x515   : > { %5360 = vst [vmem:[#allocation2 + $0xc0] sm:$0xff] %v5264_v29  ;;  %5361 = vst [vmem:[#allocation2 + $0xc8] sm:$0xff] %v5265_v43  ;;  %v5179_v38 = vld [vmem:[#allocation2 + $0x118] sm:$0xff]  ;;  %v5273_v3 = vadd.f32 %v5177_v9, %v10226_v15  ;;  %v5274_v27 = vadd.f32 %v5178_v21, %v10228_v5  ;;  %v5180_v43 = vld [vmem:[#allocation2 + $0x120] sm:$0xff] }
 0x516   : > { %5362 = vst [vmem:[#allocation2 + $0xd0] sm:$0xff] %v5266_v32  ;;  %5363 = vst [vmem:[#allocation2 + $0xd8] sm:$0xff] %v5267_v12  ;;  %v5275_v29 = vadd.f32 %v5179_v38, %v10230_v48  ;;  %v5181_v32 = vld [vmem:[#allocation2 + $0x128] sm:$0xff]  ;;  %v5182_v42 = vld [vmem:[#allocation2 + $0x130] sm:$0xff]  ;;  %v5276_v39 = vadd.f32 %v5180_v43, %v10232_v17 }
 0x517   : > { %5364 = vst [vmem:[#allocation2 + $0xe0] sm:$0xff] %v5268_v14  ;;  %5365 = vst [vmem:[#allocation2 + $0xe8] sm:$0xff] %v5269_v51  ;;  %v5277_v26 = vadd.f32 %v5181_v32, %v10234_v1  ;;  %v5278_v12 = vadd.f32 %v5182_v42, %v10236_v34  ;;  %v5183_v14 = vld [vmem:[#allocation2 + $0x138] sm:$0xff]  ;;  %v5184_v51 = vld [vmem:[#allocation2 + $0x140] sm:$0xff] }
 0x518   : > { %5366 = vst [vmem:[#allocation2 + $0xf0] sm:$0xff] %v5270_v58  ;;  %5367 = vst [vmem:[#allocation2 + $0xf8] sm:$0xff] %v5271_v0  ;;  %v5185_v53 = vld [vmem:[#allocation2 + $0x148] sm:$0xff]  ;;  %v5279_v9 = vadd.f32 %v5183_v14, %v10238_v63  ;;  %v5280_v21 = vadd.f32 %v5184_v51, %v10240_v10  ;;  %v5186_v0 = vld [vmem:[#allocation2 + $0x150] sm:$0xff] }
 0x519   : > { %5368 = vst [vmem:[#allocation2 + $0x100] sm:$0xff] %v5272_v36  ;;  %5369 = vst [vmem:[#allocation2 + $0x108] sm:$0xff] %v5273_v3  ;;  %v5281_v58 = vadd.f32 %v5185_v53, %v10242_v33  ;;  %v5187_v36 = vld [vmem:[#allocation2 + $0x158] sm:$0xff]  ;;  %v5188_v38 = vld [vmem:[#allocation2 + $0x160] sm:$0xff]  ;;  %v5282_v43 = vadd.f32 %v5186_v0, %v10244_v28 }
 0x51a   : > { %5370 = vst [vmem:[#allocation2 + $0x110] sm:$0xff] %v5274_v27  ;;  %5371 = vst [vmem:[#allocation2 + $0x118] sm:$0xff] %v5275_v29  ;;  %v5283_v32 = vadd.f32 %v5187_v36, %v10246_v8  ;;  %v5284_v3 = vadd.f32 %v5188_v38, %v10248_v57  ;;  %v5189_v27 = vld [vmem:[#allocation2 + $0x168] sm:$0xff]  ;;  %v5190_v29 = vld [vmem:[#allocation2 + $0x170] sm:$0xff] }
 0x51b   : > { %5372 = vst [vmem:[#allocation2 + $0x120] sm:$0xff] %v5276_v39  ;;  %5373 = vst [vmem:[#allocation2 + $0x128] sm:$0xff] %v5277_v26  ;;  %v5191_v42 = vld [vmem:[#allocation2 + $0x178] sm:$0xff]  ;;  %v5285_v14 = vadd.f32 %v5189_v27, %v10250_v54  ;;  %v5286_v51 = vadd.f32 %v5190_v29, %v10252_v22  ;;  %v5192_v26 = vld [vmem:[#allocation2 + $0x180] sm:$0xff] }
 0x51c   : > { %5374 = vst [vmem:[#allocation2 + $0x130] sm:$0xff] %v5278_v12  ;;  %5375 = vst [vmem:[#allocation2 + $0x138] sm:$0xff] %v5279_v9  ;;  %v5287_v39 = vadd.f32 %v5191_v42, %v10254_v23  ;;  %v5193_v12 = vld [vmem:[#allocation2 + $0x188] sm:$0xff]  ;;  %v5194_v53 = vld [vmem:[#allocation2 + $0x190] sm:$0xff]  ;;  %v5288_v0 = vadd.f32 %v5192_v26, %v10256_v16 }
 0x51d   : > { %5376 = vst [vmem:[#allocation2 + $0x140] sm:$0xff] %v5280_v21  ;;  %5377 = vst [vmem:[#allocation2 + $0x148] sm:$0xff] %v5281_v58  ;;  %v10892_v36 = vld [vmem:[#allocation31_spill] sm:$0xff]  ;;  %v10893_v57 = vld [vmem:[#allocation32_spill] sm:$0xff] }
 0x51e   : > { %5378 = vst [vmem:[#allocation2 + $0x150] sm:$0xff] %v5282_v43  ;;  %5379 = vst [vmem:[#allocation2 + $0x158] sm:$0xff] %v5283_v32  ;;  %v5289_v38 = vadd.f32 %v5193_v12, %v10892_v36  ;;  %v5290_v9 = vadd.f32 %v5194_v53, %v10893_v57  ;;  %v5195_v21 = vld [vmem:[#allocation2 + $0x198] sm:$0xff]  ;;  %v5196_v58 = vld [vmem:[#allocation2 + $0x1a0] sm:$0xff] }
 0x51f   : > { %5380 = vst [vmem:[#allocation2 + $0x160] sm:$0xff] %v5284_v3  ;;  %v5197_v8 = vld [vmem:[#allocation2 + $0x1a8] sm:$0xff]  ;;  %5381 = vst [vmem:[#allocation2 + $0x168] sm:$0xff] %v5285_v14  ;;  %v10894_v27 = vld [vmem:[#allocation33_spill] sm:$0xff] }
 0x520   : > { %5382 = vst [vmem:[#allocation2 + $0x170] sm:$0xff] %v5286_v51  ;;  %5383 = vst [vmem:[#allocation2 + $0x178] sm:$0xff] %v5287_v39  ;;  %v5291_v29 = vadd.f32 %v5195_v21, %v10894_v27  ;;  %v10895_v42 = vld [vmem:[#allocation34_spill] sm:$0xff]  ;;  %v10896_v22 = vld [vmem:[#allocation35_spill] sm:$0xff] }
 0x521   : > { %v5292_v23 = vadd.f32 %v5196_v58, %v10895_v42  ;;  %v5293_v43 = vadd.f32 %v5197_v8, %v10896_v22  ;;  %v5198_v32 = vld [vmem:[#allocation2 + $0x1b0] sm:$0xff]  ;;  %v5199_v3 = vld [vmem:[#allocation2 + $0x1b8] sm:$0xff]  ;;  %v5200_v54 = vld [vmem:[#allocation2 + $0x1c0] sm:$0xff]  ;;  %5384 = vst [vmem:[#allocation2 + $0x180] sm:$0xff] %v5288_v0 }
 0x522   : > { %5385 = vst [vmem:[#allocation2 + $0x188] sm:$0xff] %v5289_v38  ;;  %5386 = vst [vmem:[#allocation2 + $0x190] sm:$0xff] %v5290_v9  ;;  %v10897_v26 = vld [vmem:[#allocation36_spill] sm:$0xff]  ;;  %v10898_v12 = vld [vmem:[#allocation37_spill] sm:$0xff] }
 0x523   : > { %v5294_v57 = vadd.f32 %v5198_v32, %v10897_v26  ;;  %v5295_v53 = vadd.f32 %v5199_v3, %v10898_v12  ;;  %v10899_v36 = vld [vmem:[#allocation38_spill] sm:$0xff]  ;;  %v5201_v51 = vld [vmem:[#allocation2 + $0x1c8] sm:$0xff]  ;;  %v5202_v39 = vld [vmem:[#allocation2 + $0x1d0] sm:$0xff]  ;;  %5387 = vst [vmem:[#allocation2 + $0x198] sm:$0xff] %v5291_v29 }
 0x524   : > { %v5296_v14 = vadd.f32 %v5200_v54, %v10899_v36  ;;  %v5203_v16 = vld [vmem:[#allocation2 + $0x1d8] sm:$0xff]  ;;  %5388 = vst [vmem:[#allocation2 + $0x1a0] sm:$0xff] %v5292_v23  ;;  %5389 = vst [vmem:[#allocation2 + $0x1a8] sm:$0xff] %v5293_v43  ;;  %v10900_v21 = vld [vmem:[#allocation39_spill] sm:$0xff] }
 0x525   : > { %v5297_v8 = vadd.f32 %v5201_v51, %v10900_v21  ;;  %v10901_v22 = vld [vmem:[#allocation40_spill] sm:$0xff]  ;;  %v10902_v27 = vld [vmem:[#allocation41_spill] sm:$0xff]  ;;  %v5204_v38 = vld [vmem:[#allocation2 + $0x1e0] sm:$0xff]  ;;  %5390 = vst [vmem:[#allocation2 + $0x1b0] sm:$0xff] %v5294_v57 }
 0x526   : > { %v5298_v58 = vadd.f32 %v5202_v39, %v10901_v22  ;;  %v5299_v0 = vadd.f32 %v5203_v16, %v10902_v27  ;;  %v5205_v9 = vld [vmem:[#allocation2 + $0x1e8] sm:$0xff]  ;;  %v5206_v42 = vld [vmem:[#allocation2 + $0x1f0] sm:$0xff]  ;;  %5391 = vst [vmem:[#allocation2 + $0x1b8] sm:$0xff] %v5295_v53  ;;  %5392 = vst [vmem:[#allocation2 + $0x1c0] sm:$0xff] %v5296_v14 }
 0x527   : > { %v10903_v32 = vld [vmem:[#allocation42_spill] sm:$0xff]  ;;  %v10904_v3 = vld [vmem:[#allocation43_spill] sm:$0xff]  ;;  %v10905_v12 = vld [vmem:[#allocation44_spill] sm:$0xff]  ;;  %5393 = vst [vmem:[#allocation2 + $0x1c8] sm:$0xff] %v5297_v8 }
 0x528   : > { %v5300_v54 = vadd.f32 %v5204_v38, %v10903_v32  ;;  %v5301_v26 = vadd.f32 %v5205_v9, %v10904_v3  ;;  %v5302_v29 = vadd.f32 %v5206_v42, %v10905_v12  ;;  %v5207_v23 = vld [vmem:[#allocation2 + $0x1f8] sm:$0xff]  ;;  %v5208_v43 = vld [vmem:[#allocation2 + $0x200] sm:$0xff]  ;;  %v5209_v36 = vld [vmem:[#allocation2 + $0x208] sm:$0xff]  ;;  %5394 = vst [vmem:[#allocation2 + $0x1d0] sm:$0xff] %v5298_v58 }
 0x529   : > { %5395 = vst [vmem:[#allocation2 + $0x1d8] sm:$0xff] %v5299_v0  ;;  %v10906_v51 = vld [vmem:[#allocation45_spill] sm:$0xff]  ;;  %v10907_v39 = vld [vmem:[#allocation46_spill] sm:$0xff]  ;;  %v10908_v22 = vld [vmem:[#allocation47_spill] sm:$0xff] }
 0x52a   : > { %v5303_v16 = vadd.f32 %v5207_v23, %v10906_v51  ;;  %v5304_v21 = vadd.f32 %v5208_v43, %v10907_v39  ;;  %v5305_v57 = vadd.f32 %v5209_v36, %v10908_v22  ;;  %v5210_v53 = vld [vmem:[#allocation2 + $0x210] sm:$0xff]  ;;  %v5211_v14 = vld [vmem:[#allocation2 + $0x218] sm:$0xff]  ;;  %v5212_v27 = vld [vmem:[#allocation2 + $0x220] sm:$0xff]  ;;  %5396 = vst [vmem:[#allocation2 + $0x1e0] sm:$0xff] %v5300_v54 }
 0x52b   : > { %5397 = vst [vmem:[#allocation2 + $0x1e8] sm:$0xff] %v5301_v26  ;;  %5398 = vst [vmem:[#allocation2 + $0x1f0] sm:$0xff] %v5302_v29  ;;  %v10909_v38 = vld [vmem:[#allocation48_spill] sm:$0xff]  ;;  %v10910_v42 = vld [vmem:[#allocation49_spill] sm:$0xff] }
 0x52c   : > { %v5306_v9 = vadd.f32 %v5210_v53, %v10909_v38  ;;  %v5307_v32 = vadd.f32 %v5211_v14, %v10910_v42  ;;  %v10911_v3 = vld [vmem:[#allocation50_spill] sm:$0xff]  ;;  %v5213_v58 = vld [vmem:[#allocation2 + $0x228] sm:$0xff]  ;;  %v5214_v0 = vld [vmem:[#allocation2 + $0x230] sm:$0xff]  ;;  %5399 = vst [vmem:[#allocation2 + $0x1f8] sm:$0xff] %v5303_v16 }
 0x52d   : > { %v5308_v8 = vadd.f32 %v5212_v27, %v10911_v3  ;;  %v5215_v12 = vld [vmem:[#allocation2 + $0x238] sm:$0xff]  ;;  %5400 = vst [vmem:[#allocation2 + $0x200] sm:$0xff] %v5304_v21  ;;  %5401 = vst [vmem:[#allocation2 + $0x208] sm:$0xff] %v5305_v57  ;;  %v10912_v23 = vld [vmem:[#allocation51_spill] sm:$0xff] }
 0x52e   : > { %v5309_v43 = vadd.f32 %v5213_v58, %v10912_v23  ;;  %v10913_v36 = vld [vmem:[#allocation52_spill] sm:$0xff]  ;;  %v10914_v39 = vld [vmem:[#allocation53_spill] sm:$0xff]  ;;  %v5216_v26 = vld [vmem:[#allocation2 + $0x240] sm:$0xff]  ;;  %5402 = vst [vmem:[#allocation2 + $0x210] sm:$0xff] %v5306_v9 }
 0x52f   : > { %v5310_v51 = vadd.f32 %v5214_v0, %v10913_v36  ;;  %v5311_v54 = vadd.f32 %v5215_v12, %v10914_v39  ;;  %v5217_v29 = vld [vmem:[#allocation2 + $0x248] sm:$0xff]  ;;  %v5218_v22 = vld [vmem:[#allocation2 + $0x250] sm:$0xff]  ;;  %5403 = vst [vmem:[#allocation2 + $0x218] sm:$0xff] %v5307_v32  ;;  %5404 = vst [vmem:[#allocation2 + $0x220] sm:$0xff] %v5308_v8 }
 0x530   : > { %v10915_v53 = vld [vmem:[#allocation54_spill] sm:$0xff]  ;;  %v10916_v27 = vld [vmem:[#allocation55_spill] sm:$0xff]  ;;  %v10917_v42 = vld [vmem:[#allocation56_spill] sm:$0xff]  ;;  %5405 = vst [vmem:[#allocation2 + $0x228] sm:$0xff] %v5309_v43 }
 0x531   : > { %v5312_v14 = vadd.f32 %v5216_v26, %v10915_v53  ;;  %v5313_v38 = vadd.f32 %v5217_v29, %v10916_v27  ;;  %v5314_v16 = vadd.f32 %v5218_v22, %v10917_v42  ;;  %v5219_v21 = vld [vmem:[#allocation2 + $0x258] sm:$0xff]  ;;  %v5220_v57 = vld [vmem:[#allocation2 + $0x260] sm:$0xff]  ;;  %v5221_v3 = vld [vmem:[#allocation2 + $0x268] sm:$0xff]  ;;  %5406 = vst [vmem:[#allocation2 + $0x230] sm:$0xff] %v5310_v51 }
 0x532   : > { %5407 = vst [vmem:[#allocation2 + $0x238] sm:$0xff] %v5311_v54  ;;  %v10918_v58 = vld [vmem:[#allocation57_spill] sm:$0xff]  ;;  %v10919_v12 = vld [vmem:[#allocation58_spill] sm:$0xff]  ;;  %v10920_v36 = vld [vmem:[#allocation59_spill] sm:$0xff] }
 0x533   : > { %v5315_v0 = vadd.f32 %v5219_v21, %v10918_v58  ;;  %v5316_v23 = vadd.f32 %v5220_v57, %v10919_v12  ;;  %v5317_v9 = vadd.f32 %v5221_v3, %v10920_v36  ;;  %v5222_v32 = vld [vmem:[#allocation2 + $0x270] sm:$0xff]  ;;  %v5223_v8 = vld [vmem:[#allocation2 + $0x278] sm:$0xff]  ;;  %v5224_v39 = vld [vmem:[#allocation2 + $0x280] sm:$0xff]  ;;  %5408 = vst [vmem:[#allocation2 + $0x240] sm:$0xff] %v5312_v14 }
 0x534   : > { %5409 = vst [vmem:[#allocation2 + $0x248] sm:$0xff] %v5313_v38  ;;  %5410 = vst [vmem:[#allocation2 + $0x250] sm:$0xff] %v5314_v16  ;;  %v10921_v26 = vld [vmem:[#allocation60_spill] sm:$0xff]  ;;  %v10922_v22 = vld [vmem:[#allocation61_spill] sm:$0xff] }
 0x535   : > { %v5318_v29 = vadd.f32 %v5222_v32, %v10921_v26  ;;  %v5319_v53 = vadd.f32 %v5223_v8, %v10922_v22  ;;  %v10923_v27 = vld [vmem:[#allocation62_spill] sm:$0xff]  ;;  %v5225_v51 = vld [vmem:[#allocation2 + $0x288] sm:$0xff]  ;;  %v5226_v54 = vld [vmem:[#allocation2 + $0x290] sm:$0xff]  ;;  %5411 = vst [vmem:[#allocation2 + $0x258] sm:$0xff] %v5315_v0 }
 0x536   : > { %v5320_v43 = vadd.f32 %v5224_v39, %v10923_v27  ;;  %v5227_v42 = vld [vmem:[#allocation2 + $0x298] sm:$0xff]  ;;  %5412 = vst [vmem:[#allocation2 + $0x260] sm:$0xff] %v5316_v23  ;;  %5413 = vst [vmem:[#allocation2 + $0x268] sm:$0xff] %v5317_v9  ;;  %v10924_v21 = vld [vmem:[#allocation63_spill] sm:$0xff] }
 0x537   : > { %v5321_v57 = vadd.f32 %v5225_v51, %v10924_v21  ;;  %v10925_v3 = vld [vmem:[#allocation64_spill] sm:$0xff]  ;;  %v10926_v12 = vld [vmem:[#allocation65_spill] sm:$0xff]  ;;  %v5228_v38 = vld [vmem:[#allocation2 + $0x2a0] sm:$0xff]  ;;  %5414 = vst [vmem:[#allocation2 + $0x270] sm:$0xff] %v5318_v29 }
 0x538   : > { %v5322_v58 = vadd.f32 %v5226_v54, %v10925_v3  ;;  %v5323_v14 = vadd.f32 %v5227_v42, %v10926_v12  ;;  %v5229_v16 = vld [vmem:[#allocation2 + $0x2a8] sm:$0xff]  ;;  %v5230_v36 = vld [vmem:[#allocation2 + $0x2b0] sm:$0xff]  ;;  %5415 = vst [vmem:[#allocation2 + $0x278] sm:$0xff] %v5319_v53  ;;  %5416 = vst [vmem:[#allocation2 + $0x280] sm:$0xff] %v5320_v43 }
 0x539   : > { %v10927_v32 = vld [vmem:[#allocation66_spill] sm:$0xff]  ;;  %v10928_v39 = vld [vmem:[#allocation67_spill] sm:$0xff]  ;;  %v10929_v22 = vld [vmem:[#allocation68_spill] sm:$0xff]  ;;  %5417 = vst [vmem:[#allocation2 + $0x288] sm:$0xff] %v5321_v57 }
 0x53a   : > { %v5324_v8 = vadd.f32 %v5228_v38, %v10927_v32  ;;  %v5325_v26 = vadd.f32 %v5229_v16, %v10928_v39  ;;  %v5326_v0 = vadd.f32 %v5230_v36, %v10929_v22  ;;  %v5231_v23 = vld [vmem:[#allocation2 + $0x2b8] sm:$0xff]  ;;  %v5232_v9 = vld [vmem:[#allocation2 + $0x2c0] sm:$0xff]  ;;  %v5233_v27 = vld [vmem:[#allocation2 + $0x2c8] sm:$0xff]  ;;  %5418 = vst [vmem:[#allocation2 + $0x290] sm:$0xff] %v5322_v58 }
 0x53b   : > { %5419 = vst [vmem:[#allocation2 + $0x298] sm:$0xff] %v5323_v14  ;;  %v10930_v51 = vld [vmem:[#allocation69_spill] sm:$0xff]  ;;  %v10931_v42 = vld [vmem:[#allocation70_spill] sm:$0xff]  ;;  %v10932_v3 = vld [vmem:[#allocation71_spill] sm:$0xff] }
 0x53c   : > { %v5327_v54 = vadd.f32 %v5231_v23, %v10930_v51  ;;  %v5328_v21 = vadd.f32 %v5232_v9, %v10931_v42  ;;  %v5329_v29 = vadd.f32 %v5233_v27, %v10932_v3  ;;  %v5234_v53 = vld [vmem:[#allocation2 + $0x2d0] sm:$0xff]  ;;  %v5235_v43 = vld [vmem:[#allocation2 + $0x2d8] sm:$0xff]  ;;  %v5236_v12 = vld [vmem:[#allocation2 + $0x2e0] sm:$0xff]  ;;  %5420 = vst [vmem:[#allocation2 + $0x2a0] sm:$0xff] %v5324_v8 }
 0x53d   : > { %5421 = vst [vmem:[#allocation2 + $0x2a8] sm:$0xff] %v5325_v26  ;;  %5422 = vst [vmem:[#allocation2 + $0x2b0] sm:$0xff] %v5326_v0  ;;  %v10933_v38 = vld [vmem:[#allocation72_spill] sm:$0xff]  ;;  %v10934_v36 = vld [vmem:[#allocation73_spill] sm:$0xff] }
 0x53e   : > { %v5330_v16 = vadd.f32 %v5234_v53, %v10933_v38  ;;  %v5331_v32 = vadd.f32 %v5235_v43, %v10934_v36  ;;  %v10935_v39 = vld [vmem:[#allocation74_spill] sm:$0xff]  ;;  %v5237_v58 = vld [vmem:[#allocation2 + $0x2e8] sm:$0xff]  ;;  %v5238_v14 = vld [vmem:[#allocation2 + $0x2f0] sm:$0xff]  ;;  %5423 = vst [vmem:[#allocation2 + $0x2b8] sm:$0xff] %v5327_v54 }
 0x53f   : > { %v5332_v57 = vadd.f32 %v5236_v12, %v10935_v39  ;;  %v5239_v22 = vld [vmem:[#allocation2 + $0x2f8] sm:$0xff]  ;;  %5424 = vst [vmem:[#allocation2 + $0x2c0] sm:$0xff] %v5328_v21  ;;  %5425 = vst [vmem:[#allocation2 + $0x2c8] sm:$0xff] %v5329_v29  ;;  %v10936_v23 = vld [vmem:[#allocation75_spill] sm:$0xff] }
 0x540   : > { %v5333_v9 = vadd.f32 %v5237_v58, %v10936_v23  ;;  %v10937_v27 = vld [vmem:[#allocation76_spill] sm:$0xff]  ;;  %v10938_v42 = vld [vmem:[#allocation77_spill] sm:$0xff]  ;;  %5426 = vst [vmem:[#allocation2 + $0x2d0] sm:$0xff] %v5330_v16  ;;  %5427 = vst [vmem:[#allocation2 + $0x2d8] sm:$0xff] %v5331_v32 }
 0x541   : > { %v5334_v51 = vadd.f32 %v5238_v14, %v10937_v27  ;;  %v5335_v8 = vadd.f32 %v5239_v22, %v10938_v42  ;;  %5428 = vst [vmem:[#allocation2 + $0x2e0] sm:$0xff] %v5332_v57 }
 0x542   : > { %5429 = vst [vmem:[#allocation2 + $0x2e8] sm:$0xff] %v5333_v9 }
 0x543   : > { %5430 = vst [vmem:[#allocation2 + $0x2f0] sm:$0xff] %v5334_v51  ;;  %5431 = vst [vmem:[#allocation2 + $0x2f8] sm:$0xff] %v5335_v8 }
 0x544 PF: > { %s10939_s9 = sld [smem:[#allocation17_spill]] }
 0x54a   : > { %p6548_p11 = scmp.ne.s32.totalorder %s10939_s9, 1 }
 0x54b   : > { %v5436_v26 = vld [vmem:[#allocation2] sm:$0xff] (!%p6548_p11)  ;;  %v5437_v0 = vld [vmem:[#allocation2 + $0x8] sm:$0xff] (!%p6548_p11)  ;;  %v5438_v54 = vld [vmem:[#allocation2 + $0x10] sm:$0xff] (!%p6548_p11) }
 0x54c   : > { %5435 = sbr.rel (%p6548_p11) target bundleno = 1412 (0x584), region = 64  ;;  %v10940_v21 = vld [vmem:[#allocation22_spill] sm:$0xff] (!%p6548_p11)  ;;  %v10941_v29 = vld [vmem:[#allocation24_spill] sm:$0xff] (!%p6548_p11)  ;;  %v5439_v43 = vld [vmem:[#allocation2 + $0x18] sm:$0xff] (!%p6548_p11) }
 0x54d   : > { %v5532_v3 = vadd.f32 (!%p6548_p11), %v5436_v26, %v10940_v21  ;;  %v5533_v53 = vadd.f32 (!%p6548_p11), %v5437_v0, %v10941_v29  ;;  %v10942_v12 = vld [vmem:[#allocation23_spill] sm:$0xff] (!%p6548_p11)  ;;  %v5440_v16 = vld [vmem:[#allocation2 + $0x20] sm:$0xff] (!%p6548_p11)  ;;  %v5535_v32 = vadd.f32 (!%p6548_p11), %v5439_v43, %v10166_v11  ;;  %v5442_v58 = vld [vmem:[#allocation2 + $0x30] sm:$0xff] (!%p6548_p11) }
 0x54e   : > { %v5534_v38 = vadd.f32 (!%p6548_p11), %v5438_v54, %v10942_v12  ;;  %v5441_v36 = vld [vmem:[#allocation2 + $0x28] sm:$0xff] (!%p6548_p11)  ;;  %v5536_v39 = vadd.f32 (!%p6548_p11), %v5440_v16, %v10168_v50  ;;  %v5443_v14 = vld [vmem:[#allocation2 + $0x38] sm:$0xff] (!%p6548_p11)  ;;  %v5444_v22 = vld [vmem:[#allocation2 + $0x40] sm:$0xff] (!%p6548_p11)  ;;  %v5538_v9 = vadd.f32 (!%p6548_p11), %v5442_v58, %v10172_v59 }
 0x54f   : > { %v5537_v57 = vadd.f32 (!%p6548_p11), %v5441_v36, %v10170_v44  ;;  %v6604_v23 = vpack.c.bf16 (!%p6548_p11), %v5533_v53, %v5532_v3  ;;  %v5539_v27 = vadd.f32 (!%p6548_p11), %v5443_v14, %v10174_v46  ;;  %v5445_v51 = vld [vmem:[#allocation2 + $0x48] sm:$0xff] (!%p6548_p11)  ;;  %v5540_v42 = vadd.f32 (!%p6548_p11), %v5444_v22, %v10176_v45  ;;  %v5446_v8 = vld [vmem:[#allocation2 + $0x50] sm:$0xff] (!%p6548_p11)  ;;  %v5447_v26 = vld [vmem:[#allocation2 + $0x58] sm:$0xff] (!%p6548_p11) }
 0x550   : > { %v6605_v0 = vpack.c.bf16 (!%p6548_p11), %v5535_v32, %v5534_v38  ;;  %v5541_v11 = vadd.f32 (!%p6548_p11), %v5445_v51, %v10178_v4  ;;  %v5542_v50 = vadd.f32 (!%p6548_p11), %v5446_v8, %v10180_v56  ;;  %v5448_v44 = vld [vmem:[#allocation2 + $0x60] sm:$0xff] (!%p6548_p11)  ;;  %v5449_v21 = vld [vmem:[#allocation2 + $0x68] sm:$0xff] (!%p6548_p11)  ;;  %v5450_v29 = vld [vmem:[#allocation2 + $0x70] sm:$0xff] (!%p6548_p11)  ;;  %v5543_v59 = vadd.f32 (!%p6548_p11), %v5447_v26, %v10182_v13 }
 0x551   : > { %v6606_v54 = vpack.c.bf16 (!%p6548_p11), %v5537_v57, %v5536_v39  ;;  %5916 = vst [vmem:[#allocation11] sm:$0xff] (!%p6548_p11), %v6604_v23  ;;  %v6607_v3 = vpack.c.bf16 (!%p6548_p11), %v5539_v27, %v5538_v9  ;;  %v5544_v46 = vadd.f32 (!%p6548_p11), %v5448_v44, %v10184_v40  ;;  %v5545_v53 = vadd.f32 (!%p6548_p11), %v5449_v21, %v10186_v60  ;;  %v5451_v45 = vld [vmem:[#allocation2 + $0x78] sm:$0xff] (!%p6548_p11)  ;;  %v5452_v43 = vld [vmem:[#allocation2 + $0x80] sm:$0xff] (!%p6548_p11)  ;;  %v5453_v12 = vld [vmem:[#allocation2 + $0x88] sm:$0xff] (!%p6548_p11) }
 0x552   : > { %5917 = vst [vmem:[#allocation11 + $0x8] sm:$0xff] (!%p6548_p11), %v6605_v0  ;;  %v6608_v38 = vpack.c.bf16 (!%p6548_p11), %v5541_v11, %v5540_v42  ;;  %v5546_v4 = vadd.f32 (!%p6548_p11), %v5450_v29, %v10188_v18  ;;  %v5547_v56 = vadd.f32 (!%p6548_p11), %v5451_v45, %v10190_v35  ;;  %v5548_v16 = vadd.f32 (!%p6548_p11), %v5452_v43, %v10192_v49  ;;  %v5454_v36 = vld [vmem:[#allocation2 + $0x90] sm:$0xff] (!%p6548_p11)  ;;  %v5455_v32 = vld [vmem:[#allocation2 + $0x98] sm:$0xff] (!%p6548_p11)  ;;  %v5456_v39 = vld [vmem:[#allocation2 + $0xa0] sm:$0xff] (!%p6548_p11) }
 0x553   : > { %5918 = vst [vmem:[#allocation11 + $0x10] sm:$0xff] %v6606_v54  ;;  %5919 = vst [vmem:[#allocation11 + $0x18] sm:$0xff] %v6607_v3  ;;  %v6609_v13 = vpack.c.bf16 %v5543_v59, %v5542_v50  ;;  %v6610_v40 = vpack.c.bf16 %v5545_v53, %v5544_v46  ;;  %v5549_v60 = vadd.f32 %v5453_v12, %v10194_v30  ;;  %v5457_v58 = vld [vmem:[#allocation2 + $0xa8] sm:$0xff]  ;;  %v5458_v14 = vld [vmem:[#allocation2 + $0xb0] sm:$0xff] }
 0x554   : > { %v5550_v57 = vadd.f32 %v5454_v36, %v10196_v47  ;;  %v5459_v22 = vld [vmem:[#allocation2 + $0xb8] sm:$0xff]  ;;  %5920 = vst [vmem:[#allocation11 + $0x20] sm:$0xff] %v6608_v38  ;;  %v6611_v23 = vpack.c.bf16 %v5547_v56, %v5546_v4  ;;  %v5551_v18 = vadd.f32 %v5455_v32, %v10198_v19  ;;  %v5552_v35 = vadd.f32 %v5456_v39, %v10200_v24  ;;  %v5460_v9 = vld [vmem:[#allocation2 + $0xc0] sm:$0xff]  ;;  %v5461_v27 = vld [vmem:[#allocation2 + $0xc8] sm:$0xff] }
 0x555   : > { %v5553_v49 = vadd.f32 %v5457_v58, %v10202_v31  ;;  %v5462_v51 = vld [vmem:[#allocation2 + $0xd0] sm:$0xff]  ;;  %5921 = vst [vmem:[#allocation11 + $0x28] sm:$0xff] %v6609_v13  ;;  %5922 = vst [vmem:[#allocation11 + $0x30] sm:$0xff] %v6610_v40  ;;  %v6612_v42 = vpack.c.bf16 %v5549_v60, %v5548_v16  ;;  %v5554_v30 = vadd.f32 %v5458_v14, %v10204_v52  ;;  %v5463_v26 = vld [vmem:[#allocation2 + $0xd8] sm:$0xff] }
 0x556   : > { %v5555_v47 = vadd.f32 %v5459_v22, %v10206_v61  ;;  %v5556_v8 = vadd.f32 %v5460_v9, %v10208_v55  ;;  %v5464_v0 = vld [vmem:[#allocation2 + $0xe0] sm:$0xff]  ;;  %v5465_v54 = vld [vmem:[#allocation2 + $0xe8] sm:$0xff]  ;;  %5923 = vst [vmem:[#allocation11 + $0x38] sm:$0xff] %v6611_v23  ;;  %v6613_v19 = vpack.c.bf16 %v5551_v18, %v5550_v57  ;;  %v5557_v31 = vadd.f32 %v5461_v27, %v10210_v62  ;;  %v5466_v50 = vld [vmem:[#allocation2 + $0xf0] sm:$0xff] }
 0x557   : > { %v6614_v24 = vpack.c.bf16 %v5553_v49, %v5552_v35  ;;  %v5558_v11 = vadd.f32 %v5462_v51, %v10212_v20  ;;  %v5467_v44 = vld [vmem:[#allocation2 + $0xf8] sm:$0xff]  ;;  %v5468_v21 = vld [vmem:[#allocation2 + $0x100] sm:$0xff]  ;;  %5924 = vst [vmem:[#allocation11 + $0x40] sm:$0xff] %v6612_v42  ;;  %v5559_v52 = vadd.f32 %v5463_v26, %v10214_v7  ;;  %v5560_v61 = vadd.f32 %v5464_v0, %v10216_v25  ;;  %v5469_v3 = vld [vmem:[#allocation2 + $0x108] sm:$0xff] }
 0x558   : > { %v6615_v29 = vpack.c.bf16 %v5555_v47, %v5554_v30  ;;  %v5561_v55 = vadd.f32 %v5465_v54, %v10218_v6  ;;  %v5470_v59 = vld [vmem:[#allocation2 + $0x110] sm:$0xff]  ;;  %v5471_v46 = vld [vmem:[#allocation2 + $0x118] sm:$0xff]  ;;  %5925 = vst [vmem:[#allocation11 + $0x48] sm:$0xff] %v6613_v19  ;;  %v6616_v53 = vpack.c.bf16 %v5557_v31, %v5556_v8  ;;  %v5562_v62 = vadd.f32 %v5466_v50, %v10220_v2  ;;  %v5472_v43 = vld [vmem:[#allocation2 + $0x120] sm:$0xff] }
 0x559   : > { %5926 = vst [vmem:[#allocation11 + $0x50] sm:$0xff] %v6614_v24  ;;  %v5563_v20 = vadd.f32 %v5467_v44, %v10222_v37  ;;  %v5564_v45 = vadd.f32 %v5468_v21, %v10224_v41  ;;  %v5473_v12 = vld [vmem:[#allocation2 + $0x128] sm:$0xff]  ;;  %v5474_v38 = vld [vmem:[#allocation2 + $0x130] sm:$0xff]  ;;  %v6617_v7 = vpack.c.bf16 %v5559_v52, %v5558_v11  ;;  %v5565_v6 = vadd.f32 %v5469_v3, %v10226_v15  ;;  %v5475_v56 = vld [vmem:[#allocation2 + $0x138] sm:$0xff] }
 0x55a   : > { %5927 = vst [vmem:[#allocation11 + $0x58] sm:$0xff] %v6615_v29  ;;  %v6618_v25 = vpack.c.bf16 %v5561_v55, %v5560_v61  ;;  %v5566_v4 = vadd.f32 %v5470_v59, %v10228_v5  ;;  %v5476_v16 = vld [vmem:[#allocation2 + $0x140] sm:$0xff]  ;;  %v5477_v36 = vld [vmem:[#allocation2 + $0x148] sm:$0xff]  ;;  %5928 = vst [vmem:[#allocation11 + $0x60] sm:$0xff] %v6616_v53  ;;  %v5567_v2 = vadd.f32 %v5471_v46, %v10230_v48 }
 0x55b   : > { %v6619_v32 = vpack.c.bf16 %v5563_v20, %v5562_v62  ;;  %v5568_v37 = vadd.f32 %v5472_v43, %v10232_v17  ;;  %v5569_v41 = vadd.f32 %v5473_v12, %v10234_v1  ;;  %v5478_v39 = vld [vmem:[#allocation2 + $0x150] sm:$0xff]  ;;  %v5479_v13 = vld [vmem:[#allocation2 + $0x158] sm:$0xff]  ;;  %v5480_v40 = vld [vmem:[#allocation2 + $0x160] sm:$0xff]  ;;  %5929 = vst [vmem:[#allocation11 + $0x68] sm:$0xff] %v6617_v7  ;;  %v6620_v60 = vpack.c.bf16 %v5565_v6, %v5564_v45 }
 0x55c   : > { %5930 = vst [vmem:[#allocation11 + $0x70] sm:$0xff] %v6618_v25  ;;  %v5570_v15 = vadd.f32 %v5474_v38, %v10236_v34  ;;  %v5571_v5 = vadd.f32 %v5475_v56, %v10238_v63  ;;  %v5572_v57 = vadd.f32 %v5476_v16, %v10240_v10  ;;  %v5481_v58 = vld [vmem:[#allocation2 + $0x168] sm:$0xff]  ;;  %v5482_v14 = vld [vmem:[#allocation2 + $0x170] sm:$0xff]  ;;  %v5483_v22 = vld [vmem:[#allocation2 + $0x178] sm:$0xff]  ;;  %v6621_v48 = vpack.c.bf16 %v5567_v2, %v5566_v4 }
 0x55d   : > { %5931 = vst [vmem:[#allocation11 + $0x78] sm:$0xff] %v6619_v32  ;;  %v6622_v17 = vpack.c.bf16 %v5569_v41, %v5568_v37  ;;  %v5573_v1 = vadd.f32 %v5477_v36, %v10242_v33  ;;  %v5574_v23 = vadd.f32 %v5478_v39, %v10244_v28  ;;  %v5484_v18 = vld [vmem:[#allocation2 + $0x180] sm:$0xff]  ;;  %v5485_v35 = vld [vmem:[#allocation2 + $0x188] sm:$0xff]  ;;  %v5486_v49 = vld [vmem:[#allocation2 + $0x190] sm:$0xff] }
 0x55e   : > { %5932 = vst [vmem:[#allocation11 + $0x80] sm:$0xff] %v6620_v60  ;;  %v6623_v9 = vpack.c.bf16 %v5571_v5, %v5570_v15  ;;  %v10943_v34 = vld [vmem:[#allocation25_spill] sm:$0xff]  ;;  %v10944_v63 = vld [vmem:[#allocation26_spill] sm:$0xff]  ;;  %v10945_v10 = vld [vmem:[#allocation27_spill] sm:$0xff] }
 0x55f   : > { %v5575_v27 = vadd.f32 %v5479_v13, %v10943_v34  ;;  %v5576_v51 = vadd.f32 %v5480_v40, %v10944_v63  ;;  %v5577_v42 = vadd.f32 %v5481_v58, %v10945_v10  ;;  %v5487_v30 = vld [vmem:[#allocation2 + $0x198] sm:$0xff]  ;;  %v5488_v47 = vld [vmem:[#allocation2 + $0x1a0] sm:$0xff]  ;;  %v5489_v8 = vld [vmem:[#allocation2 + $0x1a8] sm:$0xff]  ;;  %5933 = vst [vmem:[#allocation11 + $0x88] sm:$0xff] %v6621_v48  ;;  %v6624_v26 = vpack.c.bf16 %v5573_v1, %v5572_v57 }
 0x560   : > { %5934 = vst [vmem:[#allocation11 + $0x90] sm:$0xff] %v6622_v17  ;;  %v10946_v33 = vld [vmem:[#allocation28_spill] sm:$0xff]  ;;  %v10947_v28 = vld [vmem:[#allocation29_spill] sm:$0xff]  ;;  %v10948_v19 = vld [vmem:[#allocation30_spill] sm:$0xff] }
 0x561   : > { %v5578_v0 = vadd.f32 %v5482_v14, %v10946_v33  ;;  %v5579_v54 = vadd.f32 %v5483_v22, %v10947_v28  ;;  %v5580_v24 = vadd.f32 %v5484_v18, %v10948_v19  ;;  %v5490_v31 = vld [vmem:[#allocation2 + $0x1b0] sm:$0xff]  ;;  %v5491_v11 = vld [vmem:[#allocation2 + $0x1b8] sm:$0xff]  ;;  %v5492_v50 = vld [vmem:[#allocation2 + $0x1c0] sm:$0xff]  ;;  %5935 = vst [vmem:[#allocation11 + $0x98] sm:$0xff] %v6623_v9  ;;  %v6625_v44 = vpack.c.bf16 %v5575_v27, %v5574_v23 }
 0x562   : > { %v6626_v21 = vpack.c.bf16 %v5577_v42, %v5576_v51  ;;  %v10949_v29 = vld [vmem:[#allocation31_spill] sm:$0xff]  ;;  %v10950_v61 = vld [vmem:[#allocation32_spill] sm:$0xff]  ;;  %5936 = vst [vmem:[#allocation11 + $0xa0] sm:$0xff] %v6624_v26  ;;  %v10951_v53 = vld [vmem:[#allocation33_spill] sm:$0xff] }
 0x563   : > { %v5581_v52 = vadd.f32 %v5485_v35, %v10949_v29  ;;  %v5582_v55 = vadd.f32 %v5486_v49, %v10950_v61  ;;  %v5493_v3 = vld [vmem:[#allocation2 + $0x1c8] sm:$0xff]  ;;  %v5494_v59 = vld [vmem:[#allocation2 + $0x1d0] sm:$0xff]  ;;  %v6627_v46 = vpack.c.bf16 %v5579_v54, %v5578_v0  ;;  %v5583_v62 = vadd.f32 %v5487_v30, %v10951_v53  ;;  %v10952_v20 = vld [vmem:[#allocation34_spill] sm:$0xff]  ;;  %5937 = vst [vmem:[#allocation11 + $0xa8] sm:$0xff] %v6625_v44 }
 0x564   : > { %v5584_v45 = vadd.f32 %v5488_v47, %v10952_v20  ;;  %v10953_v43 = vld [vmem:[#allocation35_spill] sm:$0xff]  ;;  %v5495_v38 = vld [vmem:[#allocation2 + $0x1d8] sm:$0xff]  ;;  %v5496_v7 = vld [vmem:[#allocation2 + $0x1e0] sm:$0xff]  ;;  %5938 = vst [vmem:[#allocation11 + $0xb0] sm:$0xff] %v6626_v21 }
 0x565   : > { %v5585_v12 = vadd.f32 %v5489_v8, %v10953_v43  ;;  %v5497_v25 = vld [vmem:[#allocation2 + $0x1e8] sm:$0xff]  ;;  %v6628_v6 = vpack.c.bf16 %v5581_v52, %v5580_v24  ;;  %v10954_v4 = vld [vmem:[#allocation36_spill] sm:$0xff]  ;;  %v10955_v16 = vld [vmem:[#allocation37_spill] sm:$0xff]  ;;  %5939 = vst [vmem:[#allocation11 + $0xb8] sm:$0xff] %v6627_v46  ;;  %v6629_v13 = vpack.c.bf16 %v5583_v62, %v5582_v55 }
 0x566   : > { %v5586_v56 = vadd.f32 %v5490_v31, %v10954_v4  ;;  %v5587_v36 = vadd.f32 %v5491_v11, %v10955_v16  ;;  %v10956_v32 = vld [vmem:[#allocation38_spill] sm:$0xff]  ;;  %v5498_v37 = vld [vmem:[#allocation2 + $0x1f0] sm:$0xff]  ;;  %v5499_v41 = vld [vmem:[#allocation2 + $0x1f8] sm:$0xff] }
 0x567   : > { %v5588_v2 = vadd.f32 %v5492_v50, %v10956_v32  ;;  %v5500_v39 = vld [vmem:[#allocation2 + $0x200] sm:$0xff]  ;;  %v6630_v40 = vpack.c.bf16 %v5585_v12, %v5584_v45  ;;  %v10957_v60 = vld [vmem:[#allocation39_spill] sm:$0xff]  ;;  %v10958_v5 = vld [vmem:[#allocation40_spill] sm:$0xff]  ;;  %5940 = vst [vmem:[#allocation11 + $0xc0] sm:$0xff] %v6628_v6 }
 0x568   : > { %v5589_v15 = vadd.f32 %v5493_v3, %v10957_v60  ;;  %v5590_v57 = vadd.f32 %v5494_v59, %v10958_v5  ;;  %v5501_v58 = vld [vmem:[#allocation2 + $0x208] sm:$0xff]  ;;  %v5502_v14 = vld [vmem:[#allocation2 + $0x210] sm:$0xff]  ;;  %v6631_v22 = vpack.c.bf16 %v5587_v36, %v5586_v56  ;;  %v10959_v48 = vld [vmem:[#allocation41_spill] sm:$0xff]  ;;  %5941 = vst [vmem:[#allocation11 + $0xc8] sm:$0xff] %v6629_v13 }
 0x569   : > { %v5591_v17 = vadd.f32 %v5495_v38, %v10959_v48  ;;  %v10960_v1 = vld [vmem:[#allocation42_spill] sm:$0xff]  ;;  %v10961_v18 = vld [vmem:[#allocation43_spill] sm:$0xff]  ;;  %v5503_v49 = vld [vmem:[#allocation2 + $0x218] sm:$0xff]  ;;  %5942 = vst [vmem:[#allocation11 + $0xd0] sm:$0xff] %v6630_v40 }
 0x56a   : > { %v5592_v23 = vadd.f32 %v5496_v7, %v10960_v1  ;;  %v5593_v35 = vadd.f32 %v5497_v25, %v10961_v18  ;;  %v5504_v9 = vld [vmem:[#allocation2 + $0x220] sm:$0xff]  ;;  %v5505_v34 = vld [vmem:[#allocation2 + $0x228] sm:$0xff]  ;;  %v6632_v27 = vpack.c.bf16 %v5589_v15, %v5588_v2  ;;  %v10962_v63 = vld [vmem:[#allocation44_spill] sm:$0xff]  ;;  %5943 = vst [vmem:[#allocation11 + $0xd8] sm:$0xff] %v6631_v22 }
 0x56b   : > { %v5594_v51 = vadd.f32 %v5498_v37, %v10962_v63  ;;  %v10963_v10 = vld [vmem:[#allocation45_spill] sm:$0xff]  ;;  %v10964_v30 = vld [vmem:[#allocation46_spill] sm:$0xff]  ;;  %v5506_v8 = vld [vmem:[#allocation2 + $0x230] sm:$0xff]  ;;  %v6633_v0 = vpack.c.bf16 %v5591_v17, %v5590_v57 }
 0x56c   : > { %v5595_v42 = vadd.f32 %v5499_v41, %v10963_v10  ;;  %v5596_v47 = vadd.f32 %v5500_v39, %v10964_v30  ;;  %v5507_v26 = vld [vmem:[#allocation2 + $0x238] sm:$0xff]  ;;  %v5508_v33 = vld [vmem:[#allocation2 + $0x240] sm:$0xff]  ;;  %v6634_v28 = vpack.c.bf16 %v5593_v35, %v5592_v23  ;;  %v10965_v54 = vld [vmem:[#allocation47_spill] sm:$0xff]  ;;  %5944 = vst [vmem:[#allocation11 + $0xe0] sm:$0xff] %v6632_v27 }
 0x56d   : > { %v5597_v19 = vadd.f32 %v5501_v58, %v10965_v54  ;;  %v10966_v24 = vld [vmem:[#allocation48_spill] sm:$0xff]  ;;  %v5509_v11 = vld [vmem:[#allocation2 + $0x248] sm:$0xff]  ;;  %v10967_v21 = vld [vmem:[#allocation49_spill] sm:$0xff]  ;;  %5945 = vst [vmem:[#allocation11 + $0xe8] sm:$0xff] %v6633_v0 }
 0x56e   : > { %v5598_v31 = vadd.f32 %v5502_v14, %v10966_v24  ;;  %v5510_v50 = vld [vmem:[#allocation2 + $0x250] sm:$0xff]  ;;  %v6635_v44 = vpack.c.bf16 %v5595_v42, %v5594_v51  ;;  %v5599_v29 = vadd.f32 %v5503_v49, %v10967_v21  ;;  %v10968_v52 = vld [vmem:[#allocation50_spill] sm:$0xff]  ;;  %v10969_v55 = vld [vmem:[#allocation51_spill] sm:$0xff]  ;;  %5946 = vst [vmem:[#allocation11 + $0xf0] sm:$0xff] %v6634_v28 }
 0x56f   : > { %v5600_v61 = vadd.f32 %v5504_v9, %v10968_v52  ;;  %v5601_v3 = vadd.f32 %v5505_v34, %v10969_v55  ;;  %v5511_v59 = vld [vmem:[#allocation2 + $0x258] sm:$0xff]  ;;  %v5512_v46 = vld [vmem:[#allocation2 + $0x260] sm:$0xff]  ;;  %v5513_v53 = vld [vmem:[#allocation2 + $0x268] sm:$0xff]  ;;  %v6636_v62 = vpack.c.bf16 %v5597_v19, %v5596_v47 }
 0x570   : > { %v10970_v20 = vld [vmem:[#allocation52_spill] sm:$0xff]  ;;  %v10971_v43 = vld [vmem:[#allocation53_spill] sm:$0xff]  ;;  %v10972_v38 = vld [vmem:[#allocation54_spill] sm:$0xff]  ;;  %5947 = vst [vmem:[#allocation11 + $0xf8] sm:$0xff] %v6635_v44  ;;  %v6637_v56 = vpack.c.bf16 %v5599_v29, %v5598_v31 }
 0x571   : > { %v5602_v45 = vadd.f32 %v5506_v8, %v10970_v20  ;;  %v5603_v12 = vadd.f32 %v5507_v26, %v10971_v43  ;;  %v5604_v7 = vadd.f32 %v5508_v33, %v10972_v38  ;;  %v5514_v25 = vld [vmem:[#allocation2 + $0x270] sm:$0xff]  ;;  %v5515_v6 = vld [vmem:[#allocation2 + $0x278] sm:$0xff]  ;;  %v5516_v4 = vld [vmem:[#allocation2 + $0x280] sm:$0xff]  ;;  %v6638_v16 = vpack.c.bf16 %v5601_v3, %v5600_v61  ;;  %5948 = vst [vmem:[#allocation11 + $0x100] sm:$0xff] %v6636_v62 }
 0x572   : > { %v10973_v36 = vld [vmem:[#allocation55_spill] sm:$0xff]  ;;  %v10974_v2 = vld [vmem:[#allocation56_spill] sm:$0xff]  ;;  %v10975_v40 = vld [vmem:[#allocation57_spill] sm:$0xff]  ;;  %5949 = vst [vmem:[#allocation11 + $0x108] sm:$0xff] %v6637_v56 }
 0x573   : > { %v5605_v32 = vadd.f32 %v5509_v11, %v10973_v36  ;;  %v5606_v37 = vadd.f32 %v5510_v50, %v10974_v2  ;;  %v5517_v41 = vld [vmem:[#allocation2 + $0x288] sm:$0xff]  ;;  %v5518_v39 = vld [vmem:[#allocation2 + $0x290] sm:$0xff]  ;;  %v6639_v13 = vpack.c.bf16 %v5603_v12, %v5602_v45  ;;  %v5607_v60 = vadd.f32 %v5511_v59, %v10975_v40  ;;  %v10976_v15 = vld [vmem:[#allocation58_spill] sm:$0xff]  ;;  %5950 = vst [vmem:[#allocation11 + $0x110] sm:$0xff] %v6638_v16 }
 0x574   : > { %v5608_v5 = vadd.f32 %v5512_v46, %v10976_v15  ;;  %v10977_v57 = vld [vmem:[#allocation59_spill] sm:$0xff]  ;;  %v5519_v14 = vld [vmem:[#allocation2 + $0x298] sm:$0xff]  ;;  %v5520_v22 = vld [vmem:[#allocation2 + $0x2a0] sm:$0xff] }
 0x575   : > { %v5609_v58 = vadd.f32 %v5513_v53, %v10977_v57  ;;  %v5521_v48 = vld [vmem:[#allocation2 + $0x2a8] sm:$0xff]  ;;  %v6640_v17 = vpack.c.bf16 %v5605_v32, %v5604_v7  ;;  %v10978_v1 = vld [vmem:[#allocation60_spill] sm:$0xff]  ;;  %v10979_v18 = vld [vmem:[#allocation61_spill] sm:$0xff]  ;;  %5951 = vst [vmem:[#allocation11 + $0x118] sm:$0xff] %v6639_v13  ;;  %v6641_v51 = vpack.c.bf16 %v5607_v60, %v5606_v37 }
 0x576   : > { %v5610_v23 = vadd.f32 %v5514_v25, %v10978_v1  ;;  %v5611_v35 = vadd.f32 %v5515_v6, %v10979_v18  ;;  %v10980_v49 = vld [vmem:[#allocation62_spill] sm:$0xff]  ;;  %v5522_v34 = vld [vmem:[#allocation2 + $0x2b0] sm:$0xff]  ;;  %v5523_v27 = vld [vmem:[#allocation2 + $0x2b8] sm:$0xff] }
 0x577   : > { %v5612_v9 = vadd.f32 %v5516_v4, %v10980_v49  ;;  %v5524_v63 = vld [vmem:[#allocation2 + $0x2c0] sm:$0xff]  ;;  %v6642_v10 = vpack.c.bf16 %v5609_v58, %v5608_v5  ;;  %v10981_v42 = vld [vmem:[#allocation63_spill] sm:$0xff]  ;;  %v10982_v47 = vld [vmem:[#allocation64_spill] sm:$0xff]  ;;  %5952 = vst [vmem:[#allocation11 + $0x120] sm:$0xff] %v6640_v17 }
 0x578   : > { %v5613_v30 = vadd.f32 %v5517_v41, %v10981_v42  ;;  %v5614_v8 = vadd.f32 %v5518_v39, %v10982_v47  ;;  %v5525_v26 = vld [vmem:[#allocation2 + $0x2c8] sm:$0xff]  ;;  %v5526_v33 = vld [vmem:[#allocation2 + $0x2d0] sm:$0xff]  ;;  %v6643_v0 = vpack.c.bf16 %v5611_v35, %v5610_v23  ;;  %v10983_v28 = vld [vmem:[#allocation65_spill] sm:$0xff]  ;;  %5953 = vst [vmem:[#allocation11 + $0x128] sm:$0xff] %v6641_v51 }
 0x579   : > { %v5615_v54 = vadd.f32 %v5519_v14, %v10983_v28  ;;  %v10984_v19 = vld [vmem:[#allocation66_spill] sm:$0xff]  ;;  %v10985_v31 = vld [vmem:[#allocation67_spill] sm:$0xff]  ;;  %v5527_v50 = vld [vmem:[#allocation2 + $0x2d8] sm:$0xff]  ;;  %5954 = vst [vmem:[#allocation11 + $0x130] sm:$0xff] %v6642_v10 }
 0x57a   : > { %v5616_v24 = vadd.f32 %v5520_v22, %v10984_v19  ;;  %v5617_v11 = vadd.f32 %v5521_v48, %v10985_v31  ;;  %v5528_v44 = vld [vmem:[#allocation2 + $0x2e0] sm:$0xff]  ;;  %v5529_v21 = vld [vmem:[#allocation2 + $0x2e8] sm:$0xff]  ;;  %v6644_v29 = vpack.c.bf16 %v5613_v30, %v5612_v9  ;;  %v10986_v52 = vld [vmem:[#allocation68_spill] sm:$0xff]  ;;  %5955 = vst [vmem:[#allocation11 + $0x138] sm:$0xff] %v6643_v0 }
 0x57b   : > { %v5618_v61 = vadd.f32 %v5522_v34, %v10986_v52  ;;  %v10987_v55 = vld [vmem:[#allocation69_spill] sm:$0xff]  ;;  %v10988_v59 = vld [vmem:[#allocation70_spill] sm:$0xff]  ;;  %v5530_v53 = vld [vmem:[#allocation2 + $0x2f0] sm:$0xff]  ;;  %v6645_v20 = vpack.c.bf16 %v5615_v54, %v5614_v8 }
 0x57c   : > { %v5619_v3 = vadd.f32 %v5523_v27, %v10987_v55  ;;  %v5620_v46 = vadd.f32 %v5524_v63, %v10988_v59  ;;  %v5531_v62 = vld [vmem:[#allocation2 + $0x2f8] sm:$0xff]  ;;  %v6646_v45 = vpack.c.bf16 %v5617_v11, %v5616_v24  ;;  %v10989_v43 = vld [vmem:[#allocation71_spill] sm:$0xff]  ;;  %v10990_v38 = vld [vmem:[#allocation72_spill] sm:$0xff]  ;;  %5956 = vst [vmem:[#allocation11 + $0x140] sm:$0xff] %v6644_v29 }
 0x57d   : > { %v5621_v12 = vadd.f32 %v5525_v26, %v10989_v43  ;;  %v5622_v7 = vadd.f32 %v5526_v33, %v10990_v38  ;;  %v10991_v6 = vld [vmem:[#allocation73_spill] sm:$0xff]  ;;  %v10992_v56 = vld [vmem:[#allocation74_spill] sm:$0xff]  ;;  %v10993_v36 = vld [vmem:[#allocation75_spill] sm:$0xff]  ;;  %5957 = vst [vmem:[#allocation11 + $0x148] sm:$0xff] %v6645_v20 }
 0x57e   : > { %v6647_v25 = vpack.c.bf16 %v5619_v3, %v5618_v61  ;;  %v5623_v4 = vadd.f32 %v5527_v50, %v10991_v6  ;;  %v5624_v16 = vadd.f32 %v5528_v44, %v10992_v56  ;;  %v5625_v32 = vadd.f32 %v5529_v21, %v10993_v36  ;;  %5958 = vst [vmem:[#allocation11 + $0x150] sm:$0xff] %v6646_v45  ;;  %v10994_v37 = vld [vmem:[#allocation76_spill] sm:$0xff]  ;;  %v10995_v39 = vld [vmem:[#allocation77_spill] sm:$0xff] }
 0x57f   : > { %v6648_v2 = vpack.c.bf16 %v5621_v12, %v5620_v46  ;;  %v5626_v41 = vadd.f32 %v5530_v53, %v10994_v37  ;;  %v5627_v13 = vadd.f32 %v5531_v62, %v10995_v39 }
 0x580   : > { %5959 = vst [vmem:[#allocation11 + $0x158] sm:$0xff] %v6647_v25  ;;  %v6649_v40 = vpack.c.bf16 %v5623_v4, %v5622_v7  ;;  %v6650_v60 = vpack.c.bf16 %v5625_v32, %v5624_v16 }
 0x581   : > { %5960 = vst [vmem:[#allocation11 + $0x160] sm:$0xff] %v6648_v2  ;;  %v6651_v15 = vpack.c.bf16 %v5627_v13, %v5626_v41 }
 0x582   : > { %5961 = vst [vmem:[#allocation11 + $0x168] sm:$0xff] %v6649_v40  ;;  %5962 = vst [vmem:[#allocation11 + $0x170] sm:$0xff] %v6650_v60 }
 0x583   : > { %5963 = vst [vmem:[#allocation11 + $0x178] sm:$0xff] %v6651_v15 }
 0x584 PF: > { %p6779_p1 = scmp.eq.s32.totalorder %s8458_s13, 1  ;;  %s8303_s29 = smov [#allocation11]  }
 0x585   : > { %s5974_s10 = sshll.u32 %s8303_s29, 4  ;;  %s5975_s10 = int_to_ptr.vmem [resolvable:$true] %s5974_s10 }
 0x586   : > { %s8176_s21 = scalar_lea.vmem %s5975_s10, 6144  ;;  %p8183_p8 = scmp.lt.s32.totalorder %s5975_s10, %s5975_s10 }
 0x587   : > { %p8177_p13 = scmp.ne.s32.totalorder %s5975_s10, %s8176_s21  ;;  %p8184_p7 = scmp.lt.s32.totalorder %s8176_s21, %s8176_s21 }
 0x589   : > { %p8178_p4 = pnand %p8177_p13, %p6779_p1  ;;  %p8185_p5 = por %p8184_p7, %p8183_p8 }
 0x58b   : > { %p8179_p12 = pneg %p8178_p4 }
 0x58d   : > { %p8186_p9 = pnand %p8185_p5, %p8179_p12 }
 0x58f   : > { %8189 = shalt.err (!%p8186_p9)
}
 0x590   : > { %s10996_s12 = sld [smem:[#allocation81_spill]] }
 0x596   : > { %s8190_s1 = scalar_lea.hbm %s10996_s12, 6144 }
 0x597   : > { %p8191_p6 = scmp.ne.s32.totalorder %s10996_s12, %s8190_s1  ;;  %p8196_p10 = scmp.lt.u32.totalorder %s8190_s1, %s10996_s12 }
 0x599   : > { %p8192_p3 = pnand %p8191_p6, %p6779_p1 }
 0x59b   : > { %p8193_p2 = pneg %p8192_p3 }
 0x59d   : > { %p8198_p0 = pnand %p8196_p10, %p8193_p2 }
 0x59f   : > { %8201 = shalt.err (!%p8198_p0)
}
 0x5a0   : > { %s8304_s18 = smov 128   ;;  %s8305_s14 = smov 8  }
 0x5a1   : > { %6759 = dma.vmem_to_hbm [thread:$0]  (%p6779_p1), %s5975_s10, 6144, %s10996_s12, [#allocation5], %s8304_s18, %s8304_s18, %s8305_s14  }
 0x5a2   : > { %8255 = dma.done.wait (%p6779_p1), [#allocation5], 6144  }
 0x5a3   : > { %8257 = vsyncadd (%p6779_p1), [#allocation5], 4294961152 }
 0x5a4 PF: > { %s22_s23 = sadd.s32 1, %s8292_s23   ;;  %s10997_s27 = sld [smem:[#allocation20_spill]] }
 0x5a5   : > { %p19_p11 = scmp.ge.s32.totalorder %s22_s23, 4   ;;  %s10998_s21 = sld [smem:[#allocation18_spill]] }
 0x5a6   : > { %s10999_s22 = sld [smem:[#allocation19_spill]]  ;;  %s11000_s15 = smov %s8264_s16 }
 0x5a7   : > { %s11001_s16 = smov %s8268_s17  ;;  %s11002_s17 = smov %s8517_s7 }
 0x5a8   : > { %s11003_s18 = smov %s8276_s19  ;;  %s11004_s19 = smov %s8280_s20 }
 0x5a9   :  { %21 = sbr.rel (!%p19_p11) target bundleno = 13 (0xd), region = 116 }
 0x5aa   : > { %s11005_s20 = smov %s10997_s27 }
 0x5b0   :  { %5990 = vsyncpa [#allocation4], 1 }
 0x5b1   :  { %5992 = vsyncpa [#allocation4 + $0x1], 1 }
 0x5b2   :  { %5993 = vsyncpa [#allocation7], 1 }
 0x5b3   :  { %5995 = vsyncpa [#allocation7 + $0x1], 1 }
 0x5b4   :  { %5996 = vsyncpa [#allocation10], 1 }
 0x5b5   :  { %5998 = vsyncpa [#allocation10 + $0x1], 1 }
 0x5b6   :  { %5999 = vsyncpa [#allocation5], 1 }
 0x5b7   :  { %6001 = vsyncpa [#allocation5 + $0x1], 1 }

</bundles_post_ra>
